<compile_context>
chip_gen: v5e
topology: v5e:2x2
jax: 0.10.0
libtpu: 0.0.40
codegen_flags: <defaults>
</compile_context>

<pallas_src>
import jax
import jax.numpy as jnp
import numpy as np
from jax.experimental import pallas as pl
from jax.experimental.pallas import tpu as pltpu

K = 7                 # filter_size in the PyTorch module
PAD = (K - 1) // 2    # dilation=1 -> padding=3 preserves spatial dims


# --------------------------------------------------------------------------
# Host-side constant packing
# --------------------------------------------------------------------------
def _build_layer_constants(w_oihw, bias, Hs, Ws):
    """Constants for: pool2(source) -> zero-pad(3) -> 7x7 conv -> (+bias, ReLU).

    Source activation layout: (Hs, Ws*Cin) with lane index ws*Cin + ci.
    Output layout:            (H,  W*Cout) with lane index w*Cout + co,
    where H = Hs//2, W = Ws//2.
    """
    w_oihw = np.asarray(w_oihw, np.float32)
    bias = np.asarray(bias, np.float32)
    Cout, Cin = w_oihw.shape[0], w_oihw.shape[1]
    H, W = Hs // 2, Ws // 2
    Wp = W + 2 * PAD
    w = np.transpose(w_oihw, (2, 3, 1, 0))            # (kh, kw, ci, co)

    # Lk[kh]: (H, Hs). Row i of (Lk[kh] @ X) is row (kh+i) of the 2x2-row-pooled,
    # 3-zero-row-padded source (rows in the vertical padding band are zero).
    Lk = np.zeros((K, H, Hs), np.float32)
    for kh in range(K):
        for i in range(H):
            hp = kh + i
            if PAD <= hp < H + PAD:
                r = hp - PAD
                Lk[kh, i, 2 * r] = 0.5
                Lk[kh, i, 2 * r + 1] = 0.5

    # R: (Ws*Cin, Wp*Cin). X @ R is the 2x2-column-pooled source, zero-padded
    # by 3 columns on each side, still in the merged (w, c) lane layout.
    R = np.zeros((Ws * Cin, Wp * Cin), np.float32)
    for wp in range(PAD, W + PAD):
        r = wp - PAD
        for c in range(Cin):
            R[(2 * r) * Cin + c, wp * Cin + c] = 0.5
            R[(2 * r + 1) * Cin + c, wp * Cin + c] = 0.5

    # B[kh]: (Wp*Cin, W*Cout) banded weight matrix:
    # B[kh][wp*Cin+ci, w*Cout+co] = weight[co, ci, kh, wp-w] for 0 <= wp-w < 7.
    B = np.zeros((K, Wp * Cin, W * Cout), np.float32)
    for kh in range(K):
        for wo in range(W):
            for kw in range(K):
                wp = wo + kw
                B[kh, wp * Cin:(wp + 1) * Cin, wo * Cout:(wo + 1) * Cout] = w[kh, kw]

    brow = np.tile(bias, W).reshape(1, W * Cout).astype(np.float32)
    return [Lk, R, B, brow]


def _build_merged_constants(H0, W0, branch_channels):
    """Pooling + channel-placement matrices for mergedEmbeddings().

    Branch b (channels Cb, spatial (H0//s, W0//s), AvgPool by k = 16//s) is
    mapped into the merged layout (H16, W16*Ctot) at channel offset sum(C_<b).
    """
    Ho, Wo = H0 // 16, W0 // 16
    Ctot = int(sum(branch_channels))
    consts = []
    coff = 0
    for b, Cb in enumerate(branch_channels):
        s = 2 ** (b + 1)             # 2, 4, 8, 16
        k = 16 // s                  # 8, 4, 2, 1
        Hs, Ws = H0 // s, W0 // s
        L = np.zeros((Ho, Hs), np.float32)
        for p in range(Ho):
            L[p, p * k:(p + 1) * k] = 1.0 / k
        R = np.zeros((Ws * Cb, Wo * Ctot), np.float32)
        for w in range(Ws):
            q = w // k
            for c in range(Cb):
                R[w * Cb + c, q * Ctot + coff + c] = 1.0 / k
        consts += [L, R]
        coff += Cb
    return consts, Ctot


# --------------------------------------------------------------------------
# Fused backbone kernel (one batch element per grid step)
# --------------------------------------------------------------------------
def _backbone_kernel(*refs):
    x_ref = refs[0]
    layer_refs = refs[1:17]            # 4 layers x (Lk, R, B, bias_row)
    merged_refs = refs[17:25]          # 4 branches x (L, R)
    merged_ref, e2_ref, e4_ref, e8_ref = refs[25:]

    def conv_layer(src, Lk_ref, R_ref, B_ref, b_ref):
        # 2x2 pool + zero-pad along W (channel-merged lanes), one matmul:
        ar = jnp.dot(src, R_ref[...], preferred_element_type=jnp.float32)
        H = Lk_ref.shape[1]
        N = B_ref.shape[2]
        acc = jnp.zeros((H, N), jnp.float32)
        for kh in range(K):
            # 2x2 pool + zero-pad along H and select the kh-shifted row band,
            band = jnp.dot(Lk_ref[kh], ar, preferred_element_type=jnp.float32)
            # then contract (kw, ci) against the banded conv weight matrix.
            acc = acc + jnp.dot(band, B_ref[kh],
                                preferred_element_type=jnp.float32)
        return jnp.maximum(acc + b_ref[...], 0.0)

    x = x_ref[...]                                    # (H0, W0*3)
    e2 = conv_layer(x, *layer_refs[0:4])              # (H0/2,  W0/2 * 4)
    e4 = conv_layer(e2, *layer_refs[4:8])             # (H0/4,  W0/4 * 8)
    e8 = conv_layer(e4, *layer_refs[8:12])            # (H0/8,  W0/8 * 16)
    e16 = conv_layer(e8, *layer_refs[12:16])          # (H0/16, W0/16 * 64)

    e2_ref[...] = e2.astype(e2_ref.dtype)
    e4_ref[...] = e4.astype(e4_ref.dtype)
    e8_ref[...] = e8.astype(e8_ref.dtype)

    # mergedEmbeddings: pool8(e2) | pool4(e4) | pool2(e8) | e16, written as one
    # lane-dense block via pooling/placement matmuls.
    merged = jnp.zeros(merged_ref.shape, jnp.float32)
    for i, feat in enumerate((e2, e4, e8, e16)):
        Lb = merged_refs[2 * i][...]
        Rb = merged_refs[2 * i + 1][...]
        merged = merged + jnp.dot(
            jnp.dot(Lb, feat, preferred_element_type=jnp.float32),
            Rb, preferred_element_type=jnp.float32)
    merged_ref[...] = merged.astype(merged_ref.dtype)


# --------------------------------------------------------------------------
# Backbone forward (Pallas)
# --------------------------------------------------------------------------
def backbone_forward(x_nchw, params_oihw):
    """params_oihw: list of 4 (weight (Cout,Cin,7,7), bias (Cout,)) pairs."""
    Bsz, C0, H0, W0 = x_nchw.shape
    assert H0 % 16 == 0 and W0 % 16 == 0, "spatial dims must be divisible by 16"

    # Host-side constant packing (weights are tiny).
    const_arrays = []
    chans = [C0]
    Hs, Ws = H0, W0
    for (w, b) in params_oihw:
        const_arrays += _build_layer_constants(w, b, Hs, Ws)
        chans.append(int(w.shape[0]))
        Hs, Ws = Hs // 2, Ws // 2
    merged_consts, Ctot = _build_merged_constants(H0, W0, chans[1:])
    const_arrays += merged_consts
    const_arrays = [jnp.asarray(a) for a in const_arrays]

    c2, c4, c8, _ = chans[1:]
    H16, W16 = H0 // 16, W0 // 16

    # NCHW -> lane-dense 2-D merged layout (B, H, W*C)  (plain-JAX glue).
    x2d = jnp.transpose(x_nchw, (0, 2, 3, 1)).reshape(Bsz, H0, W0 * C0)

    out_shape = [
        jax.ShapeDtypeStruct((Bsz, H16, W16 * Ctot), jnp.float32),
        jax.ShapeDtypeStruct((Bsz, H0 // 2, (W0 // 2) * c2), jnp.float32),
        jax.ShapeDtypeStruct((Bsz, H0 // 4, (W0 // 4) * c4), jnp.float32),
        jax.ShapeDtypeStruct((Bsz, H0 // 8, (W0 // 8) * c8), jnp.float32),
    ]

    def _batched_spec(shape):
        return pl.BlockSpec((None,) + tuple(shape[1:]), lambda b: (b, 0, 0))

    def _const_spec(a):
        zeros = (0,) * a.ndim
        return pl.BlockSpec(a.shape, lambda b, _z=zeros: _z)

    in_specs = [_batched_spec(x2d.shape)] + [_const_spec(a) for a in const_arrays]
    out_specs = [_batched_spec(s.shape) for s in out_shape]

    merged2d, e2_2d, e4_2d, e8_2d = pl.pallas_call(
        _backbone_kernel,
        grid=(Bsz,),
        in_specs=in_specs,
        out_specs=out_specs,
        out_shape=out_shape,
        compiler_params=pltpu.CompilerParams(
            dimension_semantics=("parallel",)),
    )(x2d, *const_arrays)

    def to_nchw(a2d, Hsp, Wsp, C):
        return jnp.transpose(a2d.reshape(Bsz, Hsp, Wsp, C), (0, 3, 1, 2))

    merged = to_nchw(merged2d, H16, W16, Ctot)
    e2 = to_nchw(e2_2d, H0 // 2, W0 // 2, c2)
    e4 = to_nchw(e4_2d, H0 // 4, W0 // 4, c4)
    e8 = to_nchw(e8_2d, H0 // 8, W0 // 8, c8)
    return merged, e2, e4, e8


# --------------------------------------------------------------------------
# Pure-JAX reference (for correctness check)
# --------------------------------------------------------------------------
def ref_forward(x_nchw, params_oihw):
    def conv(x, w, b):
        y = jax.lax.conv_general_dilated(
            x, w, window_strides=(1, 1), padding=((PAD, PAD), (PAD, PAD)),
            dimension_numbers=('NCHW', 'OIHW', 'NCHW'))
        return jax.nn.relu(y + b[None, :, None, None])

    def pool(x, k):
        B, C, H, W = x.shape
        return x.reshape(B, C, H // k, k, W // k, k).mean(axis=(3, 5))

    xs = pool(x_nchw, 2)
    e2 = conv(xs, *params_oihw[0]); e2s = pool(e2, 2)
    e4 = conv(e2s, *params_oihw[1]); e4s = pool(e4, 2)
    e8 = conv(e4s, *params_oihw[2]); e8s = pool(e8, 2)
    e16 = conv(e8s, *params_oihw[3])
    merged = jnp.concatenate([pool(e2, 8), pool(e4, 4), pool(e8, 2), e16], axis=1)
    return merged, e2, e4, e8


# --------------------------------------------------------------------------
def init_conv(key, cin, cout):
    """PyTorch-default-style uniform init, deterministic from the key."""
    kw, kb = jax.random.split(key)
    bound = 1.0 / float(cin * K * K) ** 0.5
    w = jax.random.uniform(kw, (cout, cin, K, K), jnp.float32, -bound, bound)
    b = jax.random.uniform(kb, (cout,), jnp.float32, -bound, bound)
    return w, b


if __name__ == "__main__":
    hidden = 64
    channels = [3, hidden // 16, hidden // 8, hidden // 4, hidden]  # 3,4,8,16,64

    key = jax.random.PRNGKey(0)
    kx, *kls = jax.random.split(key, 5)

    params = [init_conv(kls[i], channels[i], channels[i + 1]) for i in range(4)]

    # input NCHW (as PyTorch): batch=2, 3 channels, 64x64 spatial
    x = jax.random.normal(kx, (2, 3, 64, 64), jnp.float32)

    outs = jax.block_until_ready(backbone_forward(x, params))
    refs = jax.block_until_ready(ref_forward(x, params))

    names = ["merged", "embeddings_2", "embeddings_4", "embeddings_8"]
    for name, o, r in zip(names, outs, refs):
        assert o.shape == r.shape, (name, o.shape, r.shape)
        np.testing.assert_allclose(np.asarray(o), np.asarray(r),
                                   rtol=1e-4, atol=1e-4, err_msg=name)

    print("KERNEL_OK")
</pallas_src>

<mosaic_0001>
module attributes {stable_mosaic.version = 11 : i64} {
  func.func @_backbone_kernel(%arg0: i32, %arg1: memref<1x64x192xf32, #tpu.memory_space<vmem>>, %arg2: memref<7x32x64xf32, #tpu.memory_space<vmem>>, %arg3: memref<192x114xf32, #tpu.memory_space<vmem>>, %arg4: memref<7x114x128xf32, #tpu.memory_space<vmem>>, %arg5: memref<1x128xf32, #tpu.memory_space<vmem>>, %arg6: memref<7x16x32xf32, #tpu.memory_space<vmem>>, %arg7: memref<128x88xf32, #tpu.memory_space<vmem>>, %arg8: memref<7x88x128xf32, #tpu.memory_space<vmem>>, %arg9: memref<1x128xf32, #tpu.memory_space<vmem>>, %arg10: memref<7x8x16xf32, #tpu.memory_space<vmem>>, %arg11: memref<128x112xf32, #tpu.memory_space<vmem>>, %arg12: memref<7x112x128xf32, #tpu.memory_space<vmem>>, %arg13: memref<1x128xf32, #tpu.memory_space<vmem>>, %arg14: memref<7x4x8xf32, #tpu.memory_space<vmem>>, %arg15: memref<128x160xf32, #tpu.memory_space<vmem>>, %arg16: memref<7x160x256xf32, #tpu.memory_space<vmem>>, %arg17: memref<1x256xf32, #tpu.memory_space<vmem>>, %arg18: memref<4x32xf32, #tpu.memory_space<vmem>>, %arg19: memref<128x368xf32, #tpu.memory_space<vmem>>, %arg20: memref<4x16xf32, #tpu.memory_space<vmem>>, %arg21: memref<128x368xf32, #tpu.memory_space<vmem>>, %arg22: memref<4x8xf32, #tpu.memory_space<vmem>>, %arg23: memref<128x368xf32, #tpu.memory_space<vmem>>, %arg24: memref<4x4xf32, #tpu.memory_space<vmem>>, %arg25: memref<256x368xf32, #tpu.memory_space<vmem>>, %arg26: memref<1x4x368xf32, #tpu.memory_space<vmem>>, %arg27: memref<1x32x128xf32, #tpu.memory_space<vmem>>, %arg28: memref<1x16x128xf32, #tpu.memory_space<vmem>>, %arg29: memref<1x8x128xf32, #tpu.memory_space<vmem>>) attributes {dimension_semantics = [#tpu.dimension_semantics<parallel>], iteration_bounds = array<i64: 2>, scalar_prefetch = 0 : i64, scratch_operands = 0 : i64, tpu.core_type = #tpu.core_type<tc>, window_params = [{transform_indices = @transform_0, window_bounds = array<i64: 1, 64, 192>}, {pipeline_mode = #tpu.pipeline_mode<synchronous>, transform_indices = @transform_1, window_bounds = array<i64: 7, 32, 64>}, {pipeline_mode = #tpu.pipeline_mode<synchronous>, transform_indices = @transform_2, window_bounds = array<i64: 192, 114>}, {pipeline_mode = #tpu.pipeline_mode<synchronous>, transform_indices = @transform_3, window_bounds = array<i64: 7, 114, 128>}, {pipeline_mode = #tpu.pipeline_mode<synchronous>, transform_indices = @transform_4, window_bounds = array<i64: 1, 128>}, {pipeline_mode = #tpu.pipeline_mode<synchronous>, transform_indices = @transform_5, window_bounds = array<i64: 7, 16, 32>}, {pipeline_mode = #tpu.pipeline_mode<synchronous>, transform_indices = @transform_6, window_bounds = array<i64: 128, 88>}, {pipeline_mode = #tpu.pipeline_mode<synchronous>, transform_indices = @transform_7, window_bounds = array<i64: 7, 88, 128>}, {pipeline_mode = #tpu.pipeline_mode<synchronous>, transform_indices = @transform_8, window_bounds = array<i64: 1, 128>}, {pipeline_mode = #tpu.pipeline_mode<synchronous>, transform_indices = @transform_9, window_bounds = array<i64: 7, 8, 16>}, {pipeline_mode = #tpu.pipeline_mode<synchronous>, transform_indices = @transform_10, window_bounds = array<i64: 128, 112>}, {pipeline_mode = #tpu.pipeline_mode<synchronous>, transform_indices = @transform_11, window_bounds = array<i64: 7, 112, 128>}, {pipeline_mode = #tpu.pipeline_mode<synchronous>, transform_indices = @transform_12, window_bounds = array<i64: 1, 128>}, {pipeline_mode = #tpu.pipeline_mode<synchronous>, transform_indices = @transform_13, window_bounds = array<i64: 7, 4, 8>}, {pipeline_mode = #tpu.pipeline_mode<synchronous>, transform_indices = @transform_14, window_bounds = array<i64: 128, 160>}, {pipeline_mode = #tpu.pipeline_mode<synchronous>, transform_indices = @transform_15, window_bounds = array<i64: 7, 160, 256>}, {pipeline_mode = #tpu.pipeline_mode<synchronous>, transform_indices = @transform_16, window_bounds = array<i64: 1, 256>}, {pipeline_mode = #tpu.pipeline_mode<synchronous>, transform_indices = @transform_17, window_bounds = array<i64: 4, 32>}, {pipeline_mode = #tpu.pipeline_mode<synchronous>, transform_indices = @transform_18, window_bounds = array<i64: 128, 368>}, {pipeline_mode = #tpu.pipeline_mode<synchronous>, transform_indices = @transform_19, window_bounds = array<i64: 4, 16>}, {pipeline_mode = #tpu.pipeline_mode<synchronous>, transform_indices = @transform_20, window_bounds = array<i64: 128, 368>}, {pipeline_mode = #tpu.pipeline_mode<synchronous>, transform_indices = @transform_21, window_bounds = array<i64: 4, 8>}, {pipeline_mode = #tpu.pipeline_mode<synchronous>, transform_indices = @transform_22, window_bounds = array<i64: 128, 368>}, {pipeline_mode = #tpu.pipeline_mode<synchronous>, transform_indices = @transform_23, window_bounds = array<i64: 4, 4>}, {pipeline_mode = #tpu.pipeline_mode<synchronous>, transform_indices = @transform_24, window_bounds = array<i64: 256, 368>}, {transform_indices = @transform_25, window_bounds = array<i64: 1, 4, 368>}, {transform_indices = @transform_26, window_bounds = array<i64: 1, 32, 128>}, {transform_indices = @transform_27, window_bounds = array<i64: 1, 16, 128>}, {transform_indices = @transform_28, window_bounds = array<i64: 1, 8, 128>}]} {
    %c0 = arith.constant 0 : index
    %c0_0 = arith.constant 0 : index
    %c0_1 = arith.constant 0 : index
    %0 = vector.load %arg1[%c0, %c0_0, %c0_1] : memref<1x64x192xf32, #tpu.memory_space<vmem>>, vector<1x64x192xf32>
    %1 = vector.shape_cast %0 : vector<1x64x192xf32> to vector<64x192xf32>
    %c0_2 = arith.constant 0 : index
    %c0_3 = arith.constant 0 : index
    %2 = vector.load %arg3[%c0_2, %c0_3] : memref<192x114xf32, #tpu.memory_space<vmem>>, vector<192x114xf32>
    %cst = arith.constant dense<0.000000e+00> : vector<64x114xf32>
    %3 = tpu.matmul %1, %2, %cst {dimension_numbers = #tpu.dot_dimension_numbers<[1], [0], [0], [1], [0, 0, 1, 1], [], []>} : vector<64x192xf32>, vector<192x114xf32>, vector<64x114xf32> -> vector<64x114xf32>
    %cst_4 = arith.constant 0.000000e+00 : f32
    %4 = vector.broadcast %cst_4 : f32 to vector<32x128xf32>
    %c0_5 = arith.constant 0 : index
    %c0_6 = arith.constant 0 : index
    %c0_7 = arith.constant 0 : index
    %5 = vector.load %arg2[%c0_5, %c0_6, %c0_7] : memref<7x32x64xf32, #tpu.memory_space<vmem>>, vector<1x32x64xf32>
    %6 = vector.shape_cast %5 : vector<1x32x64xf32> to vector<32x64xf32>
    %cst_8 = arith.constant dense<0.000000e+00> : vector<32x114xf32>
    %7 = tpu.matmul %6, %3, %cst_8 {dimension_numbers = #tpu.dot_dimension_numbers<[1], [0], [0], [1], [0, 0, 1, 1], [], []>} : vector<32x64xf32>, vector<64x114xf32>, vector<32x114xf32> -> vector<32x114xf32>
    %c0_9 = arith.constant 0 : index
    %c0_10 = arith.constant 0 : index
    %c0_11 = arith.constant 0 : index
    %8 = vector.load %arg4[%c0_9, %c0_10, %c0_11] : memref<7x114x128xf32, #tpu.memory_space<vmem>>, vector<1x114x128xf32>
    %9 = vector.shape_cast %8 : vector<1x114x128xf32> to vector<114x128xf32>
    %cst_12 = arith.constant dense<0.000000e+00> : vector<32x128xf32>
    %10 = tpu.matmul %7, %9, %cst_12 {dimension_numbers = #tpu.dot_dimension_numbers<[1], [0], [0], [1], [0, 0, 1, 1], [], []>} : vector<32x114xf32>, vector<114x128xf32>, vector<32x128xf32> -> vector<32x128xf32>
    %11 = arith.addf %4, %10 : vector<32x128xf32>
    %c1 = arith.constant 1 : index
    %c0_13 = arith.constant 0 : index
    %c0_14 = arith.constant 0 : index
    %12 = vector.load %arg2[%c1, %c0_13, %c0_14] : memref<7x32x64xf32, #tpu.memory_space<vmem>>, vector<1x32x64xf32>
    %13 = vector.shape_cast %12 : vector<1x32x64xf32> to vector<32x64xf32>
    %cst_15 = arith.constant dense<0.000000e+00> : vector<32x114xf32>
    %14 = tpu.matmul %13, %3, %cst_15 {dimension_numbers = #tpu.dot_dimension_numbers<[1], [0], [0], [1], [0, 0, 1, 1], [], []>} : vector<32x64xf32>, vector<64x114xf32>, vector<32x114xf32> -> vector<32x114xf32>
    %c1_16 = arith.constant 1 : index
    %c0_17 = arith.constant 0 : index
    %c0_18 = arith.constant 0 : index
    %15 = vector.load %arg4[%c1_16, %c0_17, %c0_18] : memref<7x114x128xf32, #tpu.memory_space<vmem>>, vector<1x114x128xf32>
    %16 = vector.shape_cast %15 : vector<1x114x128xf32> to vector<114x128xf32>
    %cst_19 = arith.constant dense<0.000000e+00> : vector<32x128xf32>
    %17 = tpu.matmul %14, %16, %cst_19 {dimension_numbers = #tpu.dot_dimension_numbers<[1], [0], [0], [1], [0, 0, 1, 1], [], []>} : vector<32x114xf32>, vector<114x128xf32>, vector<32x128xf32> -> vector<32x128xf32>
    %18 = arith.addf %11, %17 : vector<32x128xf32>
    %c2 = arith.constant 2 : index
    %c0_20 = arith.constant 0 : index
    %c0_21 = arith.constant 0 : index
    %19 = vector.load %arg2[%c2, %c0_20, %c0_21] : memref<7x32x64xf32, #tpu.memory_space<vmem>>, vector<1x32x64xf32>
    %20 = vector.shape_cast %19 : vector<1x32x64xf32> to vector<32x64xf32>
    %cst_22 = arith.constant dense<0.000000e+00> : vector<32x114xf32>
    %21 = tpu.matmul %20, %3, %cst_22 {dimension_numbers = #tpu.dot_dimension_numbers<[1], [0], [0], [1], [0, 0, 1, 1], [], []>} : vector<32x64xf32>, vector<64x114xf32>, vector<32x114xf32> -> vector<32x114xf32>
    %c2_23 = arith.constant 2 : index
    %c0_24 = arith.constant 0 : index
    %c0_25 = arith.constant 0 : index
    %22 = vector.load %arg4[%c2_23, %c0_24, %c0_25] : memref<7x114x128xf32, #tpu.memory_space<vmem>>, vector<1x114x128xf32>
    %23 = vector.shape_cast %22 : vector<1x114x128xf32> to vector<114x128xf32>
    %cst_26 = arith.constant dense<0.000000e+00> : vector<32x128xf32>
    %24 = tpu.matmul %21, %23, %cst_26 {dimension_numbers = #tpu.dot_dimension_numbers<[1], [0], [0], [1], [0, 0, 1, 1], [], []>} : vector<32x114xf32>, vector<114x128xf32>, vector<32x128xf32> -> vector<32x128xf32>
    %25 = arith.addf %18, %24 : vector<32x128xf32>
    %c3 = arith.constant 3 : index
    %c0_27 = arith.constant 0 : index
    %c0_28 = arith.constant 0 : index
    %26 = vector.load %arg2[%c3, %c0_27, %c0_28] : memref<7x32x64xf32, #tpu.memory_space<vmem>>, vector<1x32x64xf32>
    %27 = vector.shape_cast %26 : vector<1x32x64xf32> to vector<32x64xf32>
    %cst_29 = arith.constant dense<0.000000e+00> : vector<32x114xf32>
    %28 = tpu.matmul %27, %3, %cst_29 {dimension_numbers = #tpu.dot_dimension_numbers<[1], [0], [0], [1], [0, 0, 1, 1], [], []>} : vector<32x64xf32>, vector<64x114xf32>, vector<32x114xf32> -> vector<32x114xf32>
    %c3_30 = arith.constant 3 : index
    %c0_31 = arith.constant 0 : index
    %c0_32 = arith.constant 0 : index
    %29 = vector.load %arg4[%c3_30, %c0_31, %c0_32] : memref<7x114x128xf32, #tpu.memory_space<vmem>>, vector<1x114x128xf32>
    %30 = vector.shape_cast %29 : vector<1x114x128xf32> to vector<114x128xf32>
    %cst_33 = arith.constant dense<0.000000e+00> : vector<32x128xf32>
    %31 = tpu.matmul %28, %30, %cst_33 {dimension_numbers = #tpu.dot_dimension_numbers<[1], [0], [0], [1], [0, 0, 1, 1], [], []>} : vector<32x114xf32>, vector<114x128xf32>, vector<32x128xf32> -> vector<32x128xf32>
    %32 = arith.addf %25, %31 : vector<32x128xf32>
    %c4 = arith.constant 4 : index
    %c0_34 = arith.constant 0 : index
    %c0_35 = arith.constant 0 : index
    %33 = vector.load %arg2[%c4, %c0_34, %c0_35] : memref<7x32x64xf32, #tpu.memory_space<vmem>>, vector<1x32x64xf32>
    %34 = vector.shape_cast %33 : vector<1x32x64xf32> to vector<32x64xf32>
    %cst_36 = arith.constant dense<0.000000e+00> : vector<32x114xf32>
    %35 = tpu.matmul %34, %3, %cst_36 {dimension_numbers = #tpu.dot_dimension_numbers<[1], [0], [0], [1], [0, 0, 1, 1], [], []>} : vector<32x64xf32>, vector<64x114xf32>, vector<32x114xf32> -> vector<32x114xf32>
    %c4_37 = arith.constant 4 : index
    %c0_38 = arith.constant 0 : index
    %c0_39 = arith.constant 0 : index
    %36 = vector.load %arg4[%c4_37, %c0_38, %c0_39] : memref<7x114x128xf32, #tpu.memory_space<vmem>>, vector<1x114x128xf32>
    %37 = vector.shape_cast %36 : vector<1x114x128xf32> to vector<114x128xf32>
    %cst_40 = arith.constant dense<0.000000e+00> : vector<32x128xf32>
    %38 = tpu.matmul %35, %37, %cst_40 {dimension_numbers = #tpu.dot_dimension_numbers<[1], [0], [0], [1], [0, 0, 1, 1], [], []>} : vector<32x114xf32>, vector<114x128xf32>, vector<32x128xf32> -> vector<32x128xf32>
    %39 = arith.addf %32, %38 : vector<32x128xf32>
    %c5 = arith.constant 5 : index
    %c0_41 = arith.constant 0 : index
    %c0_42 = arith.constant 0 : index
    %40 = vector.load %arg2[%c5, %c0_41, %c0_42] : memref<7x32x64xf32, #tpu.memory_space<vmem>>, vector<1x32x64xf32>
    %41 = vector.shape_cast %40 : vector<1x32x64xf32> to vector<32x64xf32>
    %cst_43 = arith.constant dense<0.000000e+00> : vector<32x114xf32>
    %42 = tpu.matmul %41, %3, %cst_43 {dimension_numbers = #tpu.dot_dimension_numbers<[1], [0], [0], [1], [0, 0, 1, 1], [], []>} : vector<32x64xf32>, vector<64x114xf32>, vector<32x114xf32> -> vector<32x114xf32>
    %c5_44 = arith.constant 5 : index
    %c0_45 = arith.constant 0 : index
    %c0_46 = arith.constant 0 : index
    %43 = vector.load %arg4[%c5_44, %c0_45, %c0_46] : memref<7x114x128xf32, #tpu.memory_space<vmem>>, vector<1x114x128xf32>
    %44 = vector.shape_cast %43 : vector<1x114x128xf32> to vector<114x128xf32>
    %cst_47 = arith.constant dense<0.000000e+00> : vector<32x128xf32>
    %45 = tpu.matmul %42, %44, %cst_47 {dimension_numbers = #tpu.dot_dimension_numbers<[1], [0], [0], [1], [0, 0, 1, 1], [], []>} : vector<32x114xf32>, vector<114x128xf32>, vector<32x128xf32> -> vector<32x128xf32>
    %46 = arith.addf %39, %45 : vector<32x128xf32>
    %c6 = arith.constant 6 : index
    %c0_48 = arith.constant 0 : index
    %c0_49 = arith.constant 0 : index
    %47 = vector.load %arg2[%c6, %c0_48, %c0_49] : memref<7x32x64xf32, #tpu.memory_space<vmem>>, vector<1x32x64xf32>
    %48 = vector.shape_cast %47 : vector<1x32x64xf32> to vector<32x64xf32>
    %cst_50 = arith.constant dense<0.000000e+00> : vector<32x114xf32>
    %49 = tpu.matmul %48, %3, %cst_50 {dimension_numbers = #tpu.dot_dimension_numbers<[1], [0], [0], [1], [0, 0, 1, 1], [], []>} : vector<32x64xf32>, vector<64x114xf32>, vector<32x114xf32> -> vector<32x114xf32>
    %c6_51 = arith.constant 6 : index
    %c0_52 = arith.constant 0 : index
    %c0_53 = arith.constant 0 : index
    %50 = vector.load %arg4[%c6_51, %c0_52, %c0_53] : memref<7x114x128xf32, #tpu.memory_space<vmem>>, vector<1x114x128xf32>
    %51 = vector.shape_cast %50 : vector<1x114x128xf32> to vector<114x128xf32>
    %cst_54 = arith.constant dense<0.000000e+00> : vector<32x128xf32>
    %52 = tpu.matmul %49, %51, %cst_54 {dimension_numbers = #tpu.dot_dimension_numbers<[1], [0], [0], [1], [0, 0, 1, 1], [], []>} : vector<32x114xf32>, vector<114x128xf32>, vector<32x128xf32> -> vector<32x128xf32>
    %53 = arith.addf %46, %52 : vector<32x128xf32>
    %c0_55 = arith.constant 0 : index
    %c0_56 = arith.constant 0 : index
    %54 = vector.load %arg5[%c0_55, %c0_56] : memref<1x128xf32, #tpu.memory_space<vmem>>, vector<1x128xf32>
    %55 = vector.broadcast %54 : vector<1x128xf32> to vector<32x128xf32>
    %56 = arith.addf %53, %55 : vector<32x128xf32>
    %cst_57 = arith.constant 0.000000e+00 : f32
    %57 = vector.broadcast %cst_57 : f32 to vector<32x128xf32>
    %58 = arith.maximumf %56, %57 : vector<32x128xf32>
    %c0_58 = arith.constant 0 : index
    %c0_59 = arith.constant 0 : index
    %59 = vector.load %arg7[%c0_58, %c0_59] : memref<128x88xf32, #tpu.memory_space<vmem>>, vector<128x88xf32>
    %cst_60 = arith.constant dense<0.000000e+00> : vector<32x88xf32>
    %60 = tpu.matmul %58, %59, %cst_60 {dimension_numbers = #tpu.dot_dimension_numbers<[1], [0], [0], [1], [0, 0, 1, 1], [], []>} : vector<32x128xf32>, vector<128x88xf32>, vector<32x88xf32> -> vector<32x88xf32>
    %cst_61 = arith.constant 0.000000e+00 : f32
    %61 = vector.broadcast %cst_61 : f32 to vector<16x128xf32>
    %c0_62 = arith.constant 0 : index
    %c0_63 = arith.constant 0 : index
    %c0_64 = arith.constant 0 : index
    %62 = vector.load %arg6[%c0_62, %c0_63, %c0_64] : memref<7x16x32xf32, #tpu.memory_space<vmem>>, vector<1x16x32xf32>
    %63 = vector.shape_cast %62 : vector<1x16x32xf32> to vector<16x32xf32>
    %cst_65 = arith.constant dense<0.000000e+00> : vector<16x88xf32>
    %64 = tpu.matmul %63, %60, %cst_65 {dimension_numbers = #tpu.dot_dimension_numbers<[1], [0], [0], [1], [0, 0, 1, 1], [], []>} : vector<16x32xf32>, vector<32x88xf32>, vector<16x88xf32> -> vector<16x88xf32>
    %c0_66 = arith.constant 0 : index
    %c0_67 = arith.constant 0 : index
    %c0_68 = arith.constant 0 : index
    %65 = vector.load %arg8[%c0_66, %c0_67, %c0_68] : memref<7x88x128xf32, #tpu.memory_space<vmem>>, vector<1x88x128xf32>
    %66 = vector.shape_cast %65 : vector<1x88x128xf32> to vector<88x128xf32>
    %cst_69 = arith.constant dense<0.000000e+00> : vector<16x128xf32>
    %67 = tpu.matmul %64, %66, %cst_69 {dimension_numbers = #tpu.dot_dimension_numbers<[1], [0], [0], [1], [0, 0, 1, 1], [], []>} : vector<16x88xf32>, vector<88x128xf32>, vector<16x128xf32> -> vector<16x128xf32>
    %68 = arith.addf %61, %67 : vector<16x128xf32>
    %c1_70 = arith.constant 1 : index
    %c0_71 = arith.constant 0 : index
    %c0_72 = arith.constant 0 : index
    %69 = vector.load %arg6[%c1_70, %c0_71, %c0_72] : memref<7x16x32xf32, #tpu.memory_space<vmem>>, vector<1x16x32xf32>
    %70 = vector.shape_cast %69 : vector<1x16x32xf32> to vector<16x32xf32>
    %cst_73 = arith.constant dense<0.000000e+00> : vector<16x88xf32>
    %71 = tpu.matmul %70, %60, %cst_73 {dimension_numbers = #tpu.dot_dimension_numbers<[1], [0], [0], [1], [0, 0, 1, 1], [], []>} : vector<16x32xf32>, vector<32x88xf32>, vector<16x88xf32> -> vector<16x88xf32>
    %c1_74 = arith.constant 1 : index
    %c0_75 = arith.constant 0 : index
    %c0_76 = arith.constant 0 : index
    %72 = vector.load %arg8[%c1_74, %c0_75, %c0_76] : memref<7x88x128xf32, #tpu.memory_space<vmem>>, vector<1x88x128xf32>
    %73 = vector.shape_cast %72 : vector<1x88x128xf32> to vector<88x128xf32>
    %cst_77 = arith.constant dense<0.000000e+00> : vector<16x128xf32>
    %74 = tpu.matmul %71, %73, %cst_77 {dimension_numbers = #tpu.dot_dimension_numbers<[1], [0], [0], [1], [0, 0, 1, 1], [], []>} : vector<16x88xf32>, vector<88x128xf32>, vector<16x128xf32> -> vector<16x128xf32>
    %75 = arith.addf %68, %74 : vector<16x128xf32>
    %c2_78 = arith.constant 2 : index
    %c0_79 = arith.constant 0 : index
    %c0_80 = arith.constant 0 : index
    %76 = vector.load %arg6[%c2_78, %c0_79, %c0_80] : memref<7x16x32xf32, #tpu.memory_space<vmem>>, vector<1x16x32xf32>
    %77 = vector.shape_cast %76 : vector<1x16x32xf32> to vector<16x32xf32>
    %cst_81 = arith.constant dense<0.000000e+00> : vector<16x88xf32>
    %78 = tpu.matmul %77, %60, %cst_81 {dimension_numbers = #tpu.dot_dimension_numbers<[1], [0], [0], [1], [0, 0, 1, 1], [], []>} : vector<16x32xf32>, vector<32x88xf32>, vector<16x88xf32> -> vector<16x88xf32>
    %c2_82 = arith.constant 2 : index
    %c0_83 = arith.constant 0 : index
    %c0_84 = arith.constant 0 : index
    %79 = vector.load %arg8[%c2_82, %c0_83, %c0_84] : memref<7x88x128xf32, #tpu.memory_space<vmem>>, vector<1x88x128xf32>
    %80 = vector.shape_cast %79 : vector<1x88x128xf32> to vector<88x128xf32>
    %cst_85 = arith.constant dense<0.000000e+00> : vector<16x128xf32>
    %81 = tpu.matmul %78, %80, %cst_85 {dimension_numbers = #tpu.dot_dimension_numbers<[1], [0], [0], [1], [0, 0, 1, 1], [], []>} : vector<16x88xf32>, vector<88x128xf32>, vector<16x128xf32> -> vector<16x128xf32>
    %82 = arith.addf %75, %81 : vector<16x128xf32>
    %c3_86 = arith.constant 3 : index
    %c0_87 = arith.constant 0 : index
    %c0_88 = arith.constant 0 : index
    %83 = vector.load %arg6[%c3_86, %c0_87, %c0_88] : memref<7x16x32xf32, #tpu.memory_space<vmem>>, vector<1x16x32xf32>
    %84 = vector.shape_cast %83 : vector<1x16x32xf32> to vector<16x32xf32>
    %cst_89 = arith.constant dense<0.000000e+00> : vector<16x88xf32>
    %85 = tpu.matmul %84, %60, %cst_89 {dimension_numbers = #tpu.dot_dimension_numbers<[1], [0], [0], [1], [0, 0, 1, 1], [], []>} : vector<16x32xf32>, vector<32x88xf32>, vector<16x88xf32> -> vector<16x88xf32>
    %c3_90 = arith.constant 3 : index
    %c0_91 = arith.constant 0 : index
    %c0_92 = arith.constant 0 : index
    %86 = vector.load %arg8[%c3_90, %c0_91, %c0_92] : memref<7x88x128xf32, #tpu.memory_space<vmem>>, vector<1x88x128xf32>
    %87 = vector.shape_cast %86 : vector<1x88x128xf32> to vector<88x128xf32>
    %cst_93 = arith.constant dense<0.000000e+00> : vector<16x128xf32>
    %88 = tpu.matmul %85, %87, %cst_93 {dimension_numbers = #tpu.dot_dimension_numbers<[1], [0], [0], [1], [0, 0, 1, 1], [], []>} : vector<16x88xf32>, vector<88x128xf32>, vector<16x128xf32> -> vector<16x128xf32>
    %89 = arith.addf %82, %88 : vector<16x128xf32>
    %c4_94 = arith.constant 4 : index
    %c0_95 = arith.constant 0 : index
    %c0_96 = arith.constant 0 : index
    %90 = vector.load %arg6[%c4_94, %c0_95, %c0_96] : memref<7x16x32xf32, #tpu.memory_space<vmem>>, vector<1x16x32xf32>
    %91 = vector.shape_cast %90 : vector<1x16x32xf32> to vector<16x32xf32>
    %cst_97 = arith.constant dense<0.000000e+00> : vector<16x88xf32>
    %92 = tpu.matmul %91, %60, %cst_97 {dimension_numbers = #tpu.dot_dimension_numbers<[1], [0], [0], [1], [0, 0, 1, 1], [], []>} : vector<16x32xf32>, vector<32x88xf32>, vector<16x88xf32> -> vector<16x88xf32>
    %c4_98 = arith.constant 4 : index
    %c0_99 = arith.constant 0 : index
    %c0_100 = arith.constant 0 : index
    %93 = vector.load %arg8[%c4_98, %c0_99, %c0_100] : memref<7x88x128xf32, #tpu.memory_space<vmem>>, vector<1x88x128xf32>
    %94 = vector.shape_cast %93 : vector<1x88x128xf32> to vector<88x128xf32>
    %cst_101 = arith.constant dense<0.000000e+00> : vector<16x128xf32>
    %95 = tpu.matmul %92, %94, %cst_101 {dimension_numbers = #tpu.dot_dimension_numbers<[1], [0], [0], [1], [0, 0, 1, 1], [], []>} : vector<16x88xf32>, vector<88x128xf32>, vector<16x128xf32> -> vector<16x128xf32>
    %96 = arith.addf %89, %95 : vector<16x128xf32>
    %c5_102 = arith.constant 5 : index
    %c0_103 = arith.constant 0 : index
    %c0_104 = arith.constant 0 : index
    %97 = vector.load %arg6[%c5_102, %c0_103, %c0_104] : memref<7x16x32xf32, #tpu.memory_space<vmem>>, vector<1x16x32xf32>
    %98 = vector.shape_cast %97 : vector<1x16x32xf32> to vector<16x32xf32>
    %cst_105 = arith.constant dense<0.000000e+00> : vector<16x88xf32>
    %99 = tpu.matmul %98, %60, %cst_105 {dimension_numbers = #tpu.dot_dimension_numbers<[1], [0], [0], [1], [0, 0, 1, 1], [], []>} : vector<16x32xf32>, vector<32x88xf32>, vector<16x88xf32> -> vector<16x88xf32>
    %c5_106 = arith.constant 5 : index
    %c0_107 = arith.constant 0 : index
    %c0_108 = arith.constant 0 : index
    %100 = vector.load %arg8[%c5_106, %c0_107, %c0_108] : memref<7x88x128xf32, #tpu.memory_space<vmem>>, vector<1x88x128xf32>
    %101 = vector.shape_cast %100 : vector<1x88x128xf32> to vector<88x128xf32>
    %cst_109 = arith.constant dense<0.000000e+00> : vector<16x128xf32>
    %102 = tpu.matmul %99, %101, %cst_109 {dimension_numbers = #tpu.dot_dimension_numbers<[1], [0], [0], [1], [0, 0, 1, 1], [], []>} : vector<16x88xf32>, vector<88x128xf32>, vector<16x128xf32> -> vector<16x128xf32>
    %103 = arith.addf %96, %102 : vector<16x128xf32>
    %c6_110 = arith.constant 6 : index
    %c0_111 = arith.constant 0 : index
    %c0_112 = arith.constant 0 : index
    %104 = vector.load %arg6[%c6_110, %c0_111, %c0_112] : memref<7x16x32xf32, #tpu.memory_space<vmem>>, vector<1x16x32xf32>
    %105 = vector.shape_cast %104 : vector<1x16x32xf32> to vector<16x32xf32>
    %cst_113 = arith.constant dense<0.000000e+00> : vector<16x88xf32>
    %106 = tpu.matmul %105, %60, %cst_113 {dimension_numbers = #tpu.dot_dimension_numbers<[1], [0], [0], [1], [0, 0, 1, 1], [], []>} : vector<16x32xf32>, vector<32x88xf32>, vector<16x88xf32> -> vector<16x88xf32>
    %c6_114 = arith.constant 6 : index
    %c0_115 = arith.constant 0 : index
    %c0_116 = arith.constant 0 : index
    %107 = vector.load %arg8[%c6_114, %c0_115, %c0_116] : memref<7x88x128xf32, #tpu.memory_space<vmem>>, vector<1x88x128xf32>
    %108 = vector.shape_cast %107 : vector<1x88x128xf32> to vector<88x128xf32>
    %cst_117 = arith.constant dense<0.000000e+00> : vector<16x128xf32>
    %109 = tpu.matmul %106, %108, %cst_117 {dimension_numbers = #tpu.dot_dimension_numbers<[1], [0], [0], [1], [0, 0, 1, 1], [], []>} : vector<16x88xf32>, vector<88x128xf32>, vector<16x128xf32> -> vector<16x128xf32>
    %110 = arith.addf %103, %109 : vector<16x128xf32>
    %c0_118 = arith.constant 0 : index
    %c0_119 = arith.constant 0 : index
    %111 = vector.load %arg9[%c0_118, %c0_119] : memref<1x128xf32, #tpu.memory_space<vmem>>, vector<1x128xf32>
    %112 = vector.broadcast %111 : vector<1x128xf32> to vector<16x128xf32>
    %113 = arith.addf %110, %112 : vector<16x128xf32>
    %cst_120 = arith.constant 0.000000e+00 : f32
    %114 = vector.broadcast %cst_120 : f32 to vector<16x128xf32>
    %115 = arith.maximumf %113, %114 : vector<16x128xf32>
    %c0_121 = arith.constant 0 : index
    %c0_122 = arith.constant 0 : index
    %116 = vector.load %arg11[%c0_121, %c0_122] : memref<128x112xf32, #tpu.memory_space<vmem>>, vector<128x112xf32>
    %cst_123 = arith.constant dense<0.000000e+00> : vector<16x112xf32>
    %117 = tpu.matmul %115, %116, %cst_123 {dimension_numbers = #tpu.dot_dimension_numbers<[1], [0], [0], [1], [0, 0, 1, 1], [], []>} : vector<16x128xf32>, vector<128x112xf32>, vector<16x112xf32> -> vector<16x112xf32>
    %cst_124 = arith.constant 0.000000e+00 : f32
    %118 = vector.broadcast %cst_124 : f32 to vector<8x128xf32>
    %c0_125 = arith.constant 0 : index
    %c0_126 = arith.constant 0 : index
    %c0_127 = arith.constant 0 : index
    %119 = vector.load %arg10[%c0_125, %c0_126, %c0_127] : memref<7x8x16xf32, #tpu.memory_space<vmem>>, vector<1x8x16xf32>
    %120 = vector.shape_cast %119 : vector<1x8x16xf32> to vector<8x16xf32>
    %cst_128 = arith.constant dense<0.000000e+00> : vector<8x112xf32>
    %121 = tpu.matmul %120, %117, %cst_128 {dimension_numbers = #tpu.dot_dimension_numbers<[1], [0], [0], [1], [0, 0, 1, 1], [], []>} : vector<8x16xf32>, vector<16x112xf32>, vector<8x112xf32> -> vector<8x112xf32>
    %c0_129 = arith.constant 0 : index
    %c0_130 = arith.constant 0 : index
    %c0_131 = arith.constant 0 : index
    %122 = vector.load %arg12[%c0_129, %c0_130, %c0_131] : memref<7x112x128xf32, #tpu.memory_space<vmem>>, vector<1x112x128xf32>
    %123 = vector.shape_cast %122 : vector<1x112x128xf32> to vector<112x128xf32>
    %cst_132 = arith.constant dense<0.000000e+00> : vector<8x128xf32>
    %124 = tpu.matmul %121, %123, %cst_132 {dimension_numbers = #tpu.dot_dimension_numbers<[1], [0], [0], [1], [0, 0, 1, 1], [], []>} : vector<8x112xf32>, vector<112x128xf32>, vector<8x128xf32> -> vector<8x128xf32>
    %125 = arith.addf %118, %124 : vector<8x128xf32>
    %c1_133 = arith.constant 1 : index
    %c0_134 = arith.constant 0 : index
    %c0_135 = arith.constant 0 : index
    %126 = vector.load %arg10[%c1_133, %c0_134, %c0_135] : memref<7x8x16xf32, #tpu.memory_space<vmem>>, vector<1x8x16xf32>
    %127 = vector.shape_cast %126 : vector<1x8x16xf32> to vector<8x16xf32>
    %cst_136 = arith.constant dense<0.000000e+00> : vector<8x112xf32>
    %128 = tpu.matmul %127, %117, %cst_136 {dimension_numbers = #tpu.dot_dimension_numbers<[1], [0], [0], [1], [0, 0, 1, 1], [], []>} : vector<8x16xf32>, vector<16x112xf32>, vector<8x112xf32> -> vector<8x112xf32>
    %c1_137 = arith.constant 1 : index
    %c0_138 = arith.constant 0 : index
    %c0_139 = arith.constant 0 : index
    %129 = vector.load %arg12[%c1_137, %c0_138, %c0_139] : memref<7x112x128xf32, #tpu.memory_space<vmem>>, vector<1x112x128xf32>
    %130 = vector.shape_cast %129 : vector<1x112x128xf32> to vector<112x128xf32>
    %cst_140 = arith.constant dense<0.000000e+00> : vector<8x128xf32>
    %131 = tpu.matmul %128, %130, %cst_140 {dimension_numbers = #tpu.dot_dimension_numbers<[1], [0], [0], [1], [0, 0, 1, 1], [], []>} : vector<8x112xf32>, vector<112x128xf32>, vector<8x128xf32> -> vector<8x128xf32>
    %132 = arith.addf %125, %131 : vector<8x128xf32>
    %c2_141 = arith.constant 2 : index
    %c0_142 = arith.constant 0 : index
    %c0_143 = arith.constant 0 : index
    %133 = vector.load %arg10[%c2_141, %c0_142, %c0_143] : memref<7x8x16xf32, #tpu.memory_space<vmem>>, vector<1x8x16xf32>
    %134 = vector.shape_cast %133 : vector<1x8x16xf32> to vector<8x16xf32>
    %cst_144 = arith.constant dense<0.000000e+00> : vector<8x112xf32>
    %135 = tpu.matmul %134, %117, %cst_144 {dimension_numbers = #tpu.dot_dimension_numbers<[1], [0], [0], [1], [0, 0, 1, 1], [], []>} : vector<8x16xf32>, vector<16x112xf32>, vector<8x112xf32> -> vector<8x112xf32>
    %c2_145 = arith.constant 2 : index
    %c0_146 = arith.constant 0 : index
    %c0_147 = arith.constant 0 : index
    %136 = vector.load %arg12[%c2_145, %c0_146, %c0_147] : memref<7x112x128xf32, #tpu.memory_space<vmem>>, vector<1x112x128xf32>
    %137 = vector.shape_cast %136 : vector<1x112x128xf32> to vector<112x128xf32>
    %cst_148 = arith.constant dense<0.000000e+00> : vector<8x128xf32>
    %138 = tpu.matmul %135, %137, %cst_148 {dimension_numbers = #tpu.dot_dimension_numbers<[1], [0], [0], [1], [0, 0, 1, 1], [], []>} : vector<8x112xf32>, vector<112x128xf32>, vector<8x128xf32> -> vector<8x128xf32>
    %139 = arith.addf %132, %138 : vector<8x128xf32>
    %c3_149 = arith.constant 3 : index
    %c0_150 = arith.constant 0 : index
    %c0_151 = arith.constant 0 : index
    %140 = vector.load %arg10[%c3_149, %c0_150, %c0_151] : memref<7x8x16xf32, #tpu.memory_space<vmem>>, vector<1x8x16xf32>
    %141 = vector.shape_cast %140 : vector<1x8x16xf32> to vector<8x16xf32>
    %cst_152 = arith.constant dense<0.000000e+00> : vector<8x112xf32>
    %142 = tpu.matmul %141, %117, %cst_152 {dimension_numbers = #tpu.dot_dimension_numbers<[1], [0], [0], [1], [0, 0, 1, 1], [], []>} : vector<8x16xf32>, vector<16x112xf32>, vector<8x112xf32> -> vector<8x112xf32>
    %c3_153 = arith.constant 3 : index
    %c0_154 = arith.constant 0 : index
    %c0_155 = arith.constant 0 : index
    %143 = vector.load %arg12[%c3_153, %c0_154, %c0_155] : memref<7x112x128xf32, #tpu.memory_space<vmem>>, vector<1x112x128xf32>
    %144 = vector.shape_cast %143 : vector<1x112x128xf32> to vector<112x128xf32>
    %cst_156 = arith.constant dense<0.000000e+00> : vector<8x128xf32>
    %145 = tpu.matmul %142, %144, %cst_156 {dimension_numbers = #tpu.dot_dimension_numbers<[1], [0], [0], [1], [0, 0, 1, 1], [], []>} : vector<8x112xf32>, vector<112x128xf32>, vector<8x128xf32> -> vector<8x128xf32>
    %146 = arith.addf %139, %145 : vector<8x128xf32>
    %c4_157 = arith.constant 4 : index
    %c0_158 = arith.constant 0 : index
    %c0_159 = arith.constant 0 : index
    %147 = vector.load %arg10[%c4_157, %c0_158, %c0_159] : memref<7x8x16xf32, #tpu.memory_space<vmem>>, vector<1x8x16xf32>
    %148 = vector.shape_cast %147 : vector<1x8x16xf32> to vector<8x16xf32>
    %cst_160 = arith.constant dense<0.000000e+00> : vector<8x112xf32>
    %149 = tpu.matmul %148, %117, %cst_160 {dimension_numbers = #tpu.dot_dimension_numbers<[1], [0], [0], [1], [0, 0, 1, 1], [], []>} : vector<8x16xf32>, vector<16x112xf32>, vector<8x112xf32> -> vector<8x112xf32>
    %c4_161 = arith.constant 4 : index
    %c0_162 = arith.constant 0 : index
    %c0_163 = arith.constant 0 : index
    %150 = vector.load %arg12[%c4_161, %c0_162, %c0_163] : memref<7x112x128xf32, #tpu.memory_space<vmem>>, vector<1x112x128xf32>
    %151 = vector.shape_cast %150 : vector<1x112x128xf32> to vector<112x128xf32>
    %cst_164 = arith.constant dense<0.000000e+00> : vector<8x128xf32>
    %152 = tpu.matmul %149, %151, %cst_164 {dimension_numbers = #tpu.dot_dimension_numbers<[1], [0], [0], [1], [0, 0, 1, 1], [], []>} : vector<8x112xf32>, vector<112x128xf32>, vector<8x128xf32> -> vector<8x128xf32>
    %153 = arith.addf %146, %152 : vector<8x128xf32>
    %c5_165 = arith.constant 5 : index
    %c0_166 = arith.constant 0 : index
    %c0_167 = arith.constant 0 : index
    %154 = vector.load %arg10[%c5_165, %c0_166, %c0_167] : memref<7x8x16xf32, #tpu.memory_space<vmem>>, vector<1x8x16xf32>
    %155 = vector.shape_cast %154 : vector<1x8x16xf32> to vector<8x16xf32>
    %cst_168 = arith.constant dense<0.000000e+00> : vector<8x112xf32>
    %156 = tpu.matmul %155, %117, %cst_168 {dimension_numbers = #tpu.dot_dimension_numbers<[1], [0], [0], [1], [0, 0, 1, 1], [], []>} : vector<8x16xf32>, vector<16x112xf32>, vector<8x112xf32> -> vector<8x112xf32>
    %c5_169 = arith.constant 5 : index
    %c0_170 = arith.constant 0 : index
    %c0_171 = arith.constant 0 : index
    %157 = vector.load %arg12[%c5_169, %c0_170, %c0_171] : memref<7x112x128xf32, #tpu.memory_space<vmem>>, vector<1x112x128xf32>
    %158 = vector.shape_cast %157 : vector<1x112x128xf32> to vector<112x128xf32>
    %cst_172 = arith.constant dense<0.000000e+00> : vector<8x128xf32>
    %159 = tpu.matmul %156, %158, %cst_172 {dimension_numbers = #tpu.dot_dimension_numbers<[1], [0], [0], [1], [0, 0, 1, 1], [], []>} : vector<8x112xf32>, vector<112x128xf32>, vector<8x128xf32> -> vector<8x128xf32>
    %160 = arith.addf %153, %159 : vector<8x128xf32>
    %c6_173 = arith.constant 6 : index
    %c0_174 = arith.constant 0 : index
    %c0_175 = arith.constant 0 : index
    %161 = vector.load %arg10[%c6_173, %c0_174, %c0_175] : memref<7x8x16xf32, #tpu.memory_space<vmem>>, vector<1x8x16xf32>
    %162 = vector.shape_cast %161 : vector<1x8x16xf32> to vector<8x16xf32>
    %cst_176 = arith.constant dense<0.000000e+00> : vector<8x112xf32>
    %163 = tpu.matmul %162, %117, %cst_176 {dimension_numbers = #tpu.dot_dimension_numbers<[1], [0], [0], [1], [0, 0, 1, 1], [], []>} : vector<8x16xf32>, vector<16x112xf32>, vector<8x112xf32> -> vector<8x112xf32>
    %c6_177 = arith.constant 6 : index
    %c0_178 = arith.constant 0 : index
    %c0_179 = arith.constant 0 : index
    %164 = vector.load %arg12[%c6_177, %c0_178, %c0_179] : memref<7x112x128xf32, #tpu.memory_space<vmem>>, vector<1x112x128xf32>
    %165 = vector.shape_cast %164 : vector<1x112x128xf32> to vector<112x128xf32>
    %cst_180 = arith.constant dense<0.000000e+00> : vector<8x128xf32>
    %166 = tpu.matmul %163, %165, %cst_180 {dimension_numbers = #tpu.dot_dimension_numbers<[1], [0], [0], [1], [0, 0, 1, 1], [], []>} : vector<8x112xf32>, vector<112x128xf32>, vector<8x128xf32> -> vector<8x128xf32>
    %167 = arith.addf %160, %166 : vector<8x128xf32>
    %c0_181 = arith.constant 0 : index
    %c0_182 = arith.constant 0 : index
    %168 = vector.load %arg13[%c0_181, %c0_182] : memref<1x128xf32, #tpu.memory_space<vmem>>, vector<1x128xf32>
    %169 = vector.broadcast %168 : vector<1x128xf32> to vector<8x128xf32>
    %170 = arith.addf %167, %169 : vector<8x128xf32>
    %cst_183 = arith.constant 0.000000e+00 : f32
    %171 = vector.broadcast %cst_183 : f32 to vector<8x128xf32>
    %172 = arith.maximumf %170, %171 : vector<8x128xf32>
    %c0_184 = arith.constant 0 : index
    %c0_185 = arith.constant 0 : index
    %173 = vector.load %arg15[%c0_184, %c0_185] : memref<128x160xf32, #tpu.memory_space<vmem>>, vector<128x160xf32>
    %cst_186 = arith.constant dense<0.000000e+00> : vector<8x160xf32>
    %174 = tpu.matmul %172, %173, %cst_186 {dimension_numbers = #tpu.dot_dimension_numbers<[1], [0], [0], [1], [0, 0, 1, 1], [], []>} : vector<8x128xf32>, vector<128x160xf32>, vector<8x160xf32> -> vector<8x160xf32>
    %cst_187 = arith.constant 0.000000e+00 : f32
    %175 = vector.broadcast %cst_187 : f32 to vector<4x256xf32>
    %c0_188 = arith.constant 0 : index
    %c0_189 = arith.constant 0 : index
    %c0_190 = arith.constant 0 : index
    %176 = vector.load %arg14[%c0_188, %c0_189, %c0_190] : memref<7x4x8xf32, #tpu.memory_space<vmem>>, vector<1x4x8xf32>
    %177 = vector.shape_cast %176 : vector<1x4x8xf32> to vector<4x8xf32>
    %cst_191 = arith.constant dense<0.000000e+00> : vector<4x160xf32>
    %178 = tpu.matmul %177, %174, %cst_191 {dimension_numbers = #tpu.dot_dimension_numbers<[1], [0], [0], [1], [0, 0, 1, 1], [], []>} : vector<4x8xf32>, vector<8x160xf32>, vector<4x160xf32> -> vector<4x160xf32>
    %c0_192 = arith.constant 0 : index
    %c0_193 = arith.constant 0 : index
    %c0_194 = arith.constant 0 : index
    %179 = vector.load %arg16[%c0_192, %c0_193, %c0_194] : memref<7x160x256xf32, #tpu.memory_space<vmem>>, vector<1x160x256xf32>
    %180 = vector.shape_cast %179 : vector<1x160x256xf32> to vector<160x256xf32>
    %cst_195 = arith.constant dense<0.000000e+00> : vector<4x256xf32>
    %181 = tpu.matmul %178, %180, %cst_195 {dimension_numbers = #tpu.dot_dimension_numbers<[1], [0], [0], [1], [0, 0, 1, 1], [], []>} : vector<4x160xf32>, vector<160x256xf32>, vector<4x256xf32> -> vector<4x256xf32>
    %182 = arith.addf %175, %181 : vector<4x256xf32>
    %c1_196 = arith.constant 1 : index
    %c0_197 = arith.constant 0 : index
    %c0_198 = arith.constant 0 : index
    %183 = vector.load %arg14[%c1_196, %c0_197, %c0_198] : memref<7x4x8xf32, #tpu.memory_space<vmem>>, vector<1x4x8xf32>
    %184 = vector.shape_cast %183 : vector<1x4x8xf32> to vector<4x8xf32>
    %cst_199 = arith.constant dense<0.000000e+00> : vector<4x160xf32>
    %185 = tpu.matmul %184, %174, %cst_199 {dimension_numbers = #tpu.dot_dimension_numbers<[1], [0], [0], [1], [0, 0, 1, 1], [], []>} : vector<4x8xf32>, vector<8x160xf32>, vector<4x160xf32> -> vector<4x160xf32>
    %c1_200 = arith.constant 1 : index
    %c0_201 = arith.constant 0 : index
    %c0_202 = arith.constant 0 : index
    %186 = vector.load %arg16[%c1_200, %c0_201, %c0_202] : memref<7x160x256xf32, #tpu.memory_space<vmem>>, vector<1x160x256xf32>
    %187 = vector.shape_cast %186 : vector<1x160x256xf32> to vector<160x256xf32>
    %cst_203 = arith.constant dense<0.000000e+00> : vector<4x256xf32>
    %188 = tpu.matmul %185, %187, %cst_203 {dimension_numbers = #tpu.dot_dimension_numbers<[1], [0], [0], [1], [0, 0, 1, 1], [], []>} : vector<4x160xf32>, vector<160x256xf32>, vector<4x256xf32> -> vector<4x256xf32>
    %189 = arith.addf %182, %188 : vector<4x256xf32>
    %c2_204 = arith.constant 2 : index
    %c0_205 = arith.constant 0 : index
    %c0_206 = arith.constant 0 : index
    %190 = vector.load %arg14[%c2_204, %c0_205, %c0_206] : memref<7x4x8xf32, #tpu.memory_space<vmem>>, vector<1x4x8xf32>
    %191 = vector.shape_cast %190 : vector<1x4x8xf32> to vector<4x8xf32>
    %cst_207 = arith.constant dense<0.000000e+00> : vector<4x160xf32>
    %192 = tpu.matmul %191, %174, %cst_207 {dimension_numbers = #tpu.dot_dimension_numbers<[1], [0], [0], [1], [0, 0, 1, 1], [], []>} : vector<4x8xf32>, vector<8x160xf32>, vector<4x160xf32> -> vector<4x160xf32>
    %c2_208 = arith.constant 2 : index
    %c0_209 = arith.constant 0 : index
    %c0_210 = arith.constant 0 : index
    %193 = vector.load %arg16[%c2_208, %c0_209, %c0_210] : memref<7x160x256xf32, #tpu.memory_space<vmem>>, vector<1x160x256xf32>
    %194 = vector.shape_cast %193 : vector<1x160x256xf32> to vector<160x256xf32>
    %cst_211 = arith.constant dense<0.000000e+00> : vector<4x256xf32>
    %195 = tpu.matmul %192, %194, %cst_211 {dimension_numbers = #tpu.dot_dimension_numbers<[1], [0], [0], [1], [0, 0, 1, 1], [], []>} : vector<4x160xf32>, vector<160x256xf32>, vector<4x256xf32> -> vector<4x256xf32>
    %196 = arith.addf %189, %195 : vector<4x256xf32>
    %c3_212 = arith.constant 3 : index
    %c0_213 = arith.constant 0 : index
    %c0_214 = arith.constant 0 : index
    %197 = vector.load %arg14[%c3_212, %c0_213, %c0_214] : memref<7x4x8xf32, #tpu.memory_space<vmem>>, vector<1x4x8xf32>
    %198 = vector.shape_cast %197 : vector<1x4x8xf32> to vector<4x8xf32>
    %cst_215 = arith.constant dense<0.000000e+00> : vector<4x160xf32>
    %199 = tpu.matmul %198, %174, %cst_215 {dimension_numbers = #tpu.dot_dimension_numbers<[1], [0], [0], [1], [0, 0, 1, 1], [], []>} : vector<4x8xf32>, vector<8x160xf32>, vector<4x160xf32> -> vector<4x160xf32>
    %c3_216 = arith.constant 3 : index
    %c0_217 = arith.constant 0 : index
    %c0_218 = arith.constant 0 : index
    %200 = vector.load %arg16[%c3_216, %c0_217, %c0_218] : memref<7x160x256xf32, #tpu.memory_space<vmem>>, vector<1x160x256xf32>
    %201 = vector.shape_cast %200 : vector<1x160x256xf32> to vector<160x256xf32>
    %cst_219 = arith.constant dense<0.000000e+00> : vector<4x256xf32>
    %202 = tpu.matmul %199, %201, %cst_219 {dimension_numbers = #tpu.dot_dimension_numbers<[1], [0], [0], [1], [0, 0, 1, 1], [], []>} : vector<4x160xf32>, vector<160x256xf32>, vector<4x256xf32> -> vector<4x256xf32>
    %203 = arith.addf %196, %202 : vector<4x256xf32>
    %c4_220 = arith.constant 4 : index
    %c0_221 = arith.constant 0 : index
    %c0_222 = arith.constant 0 : index
    %204 = vector.load %arg14[%c4_220, %c0_221, %c0_222] : memref<7x4x8xf32, #tpu.memory_space<vmem>>, vector<1x4x8xf32>
    %205 = vector.shape_cast %204 : vector<1x4x8xf32> to vector<4x8xf32>
    %cst_223 = arith.constant dense<0.000000e+00> : vector<4x160xf32>
    %206 = tpu.matmul %205, %174, %cst_223 {dimension_numbers = #tpu.dot_dimension_numbers<[1], [0], [0], [1], [0, 0, 1, 1], [], []>} : vector<4x8xf32>, vector<8x160xf32>, vector<4x160xf32> -> vector<4x160xf32>
    %c4_224 = arith.constant 4 : index
    %c0_225 = arith.constant 0 : index
    %c0_226 = arith.constant 0 : index
    %207 = vector.load %arg16[%c4_224, %c0_225, %c0_226] : memref<7x160x256xf32, #tpu.memory_space<vmem>>, vector<1x160x256xf32>
    %208 = vector.shape_cast %207 : vector<1x160x256xf32> to vector<160x256xf32>
    %cst_227 = arith.constant dense<0.000000e+00> : vector<4x256xf32>
    %209 = tpu.matmul %206, %208, %cst_227 {dimension_numbers = #tpu.dot_dimension_numbers<[1], [0], [0], [1], [0, 0, 1, 1], [], []>} : vector<4x160xf32>, vector<160x256xf32>, vector<4x256xf32> -> vector<4x256xf32>
    %210 = arith.addf %203, %209 : vector<4x256xf32>
    %c5_228 = arith.constant 5 : index
    %c0_229 = arith.constant 0 : index
    %c0_230 = arith.constant 0 : index
    %211 = vector.load %arg14[%c5_228, %c0_229, %c0_230] : memref<7x4x8xf32, #tpu.memory_space<vmem>>, vector<1x4x8xf32>
    %212 = vector.shape_cast %211 : vector<1x4x8xf32> to vector<4x8xf32>
    %cst_231 = arith.constant dense<0.000000e+00> : vector<4x160xf32>
    %213 = tpu.matmul %212, %174, %cst_231 {dimension_numbers = #tpu.dot_dimension_numbers<[1], [0], [0], [1], [0, 0, 1, 1], [], []>} : vector<4x8xf32>, vector<8x160xf32>, vector<4x160xf32> -> vector<4x160xf32>
    %c5_232 = arith.constant 5 : index
    %c0_233 = arith.constant 0 : index
    %c0_234 = arith.constant 0 : index
    %214 = vector.load %arg16[%c5_232, %c0_233, %c0_234] : memref<7x160x256xf32, #tpu.memory_space<vmem>>, vector<1x160x256xf32>
    %215 = vector.shape_cast %214 : vector<1x160x256xf32> to vector<160x256xf32>
    %cst_235 = arith.constant dense<0.000000e+00> : vector<4x256xf32>
    %216 = tpu.matmul %213, %215, %cst_235 {dimension_numbers = #tpu.dot_dimension_numbers<[1], [0], [0], [1], [0, 0, 1, 1], [], []>} : vector<4x160xf32>, vector<160x256xf32>, vector<4x256xf32> -> vector<4x256xf32>
    %217 = arith.addf %210, %216 : vector<4x256xf32>
    %c6_236 = arith.constant 6 : index
    %c0_237 = arith.constant 0 : index
    %c0_238 = arith.constant 0 : index
    %218 = vector.load %arg14[%c6_236, %c0_237, %c0_238] : memref<7x4x8xf32, #tpu.memory_space<vmem>>, vector<1x4x8xf32>
    %219 = vector.shape_cast %218 : vector<1x4x8xf32> to vector<4x8xf32>
    %cst_239 = arith.constant dense<0.000000e+00> : vector<4x160xf32>
    %220 = tpu.matmul %219, %174, %cst_239 {dimension_numbers = #tpu.dot_dimension_numbers<[1], [0], [0], [1], [0, 0, 1, 1], [], []>} : vector<4x8xf32>, vector<8x160xf32>, vector<4x160xf32> -> vector<4x160xf32>
    %c6_240 = arith.constant 6 : index
    %c0_241 = arith.constant 0 : index
    %c0_242 = arith.constant 0 : index
    %221 = vector.load %arg16[%c6_240, %c0_241, %c0_242] : memref<7x160x256xf32, #tpu.memory_space<vmem>>, vector<1x160x256xf32>
    %222 = vector.shape_cast %221 : vector<1x160x256xf32> to vector<160x256xf32>
    %cst_243 = arith.constant dense<0.000000e+00> : vector<4x256xf32>
    %223 = tpu.matmul %220, %222, %cst_243 {dimension_numbers = #tpu.dot_dimension_numbers<[1], [0], [0], [1], [0, 0, 1, 1], [], []>} : vector<4x160xf32>, vector<160x256xf32>, vector<4x256xf32> -> vector<4x256xf32>
    %224 = arith.addf %217, %223 : vector<4x256xf32>
    %c0_244 = arith.constant 0 : index
    %c0_245 = arith.constant 0 : index
    %225 = vector.load %arg17[%c0_244, %c0_245] : memref<1x256xf32, #tpu.memory_space<vmem>>, vector<1x256xf32>
    %226 = vector.broadcast %225 : vector<1x256xf32> to vector<4x256xf32>
    %227 = arith.addf %224, %226 : vector<4x256xf32>
    %cst_246 = arith.constant 0.000000e+00 : f32
    %228 = vector.broadcast %cst_246 : f32 to vector<4x256xf32>
    %229 = arith.maximumf %227, %228 : vector<4x256xf32>
    %c0_247 = arith.constant 0 : index
    %c0_248 = arith.constant 0 : index
    %c0_249 = arith.constant 0 : index
    %230 = vector.load %arg27[%c0_247, %c0_248, %c0_249] : memref<1x32x128xf32, #tpu.memory_space<vmem>>, vector<1x32x128xf32>
    %231 = vector.shape_cast %230 : vector<1x32x128xf32> to vector<32x128xf32>
    %232 = vector.shape_cast %58 : vector<32x128xf32> to vector<1x32x128xf32>
    tpu.vector_store %arg27[%c0_247, %c0_248, %c0_249], %232 {strides = array<i32>} : memref<1x32x128xf32, #tpu.memory_space<vmem>>, vector<1x32x128xf32>,
    %c0_250 = arith.constant 0 : index
    %c0_251 = arith.constant 0 : index
    %c0_252 = arith.constant 0 : index
    %233 = vector.load %arg28[%c0_250, %c0_251, %c0_252] : memref<1x16x128xf32, #tpu.memory_space<vmem>>, vector<1x16x128xf32>
    %234 = vector.shape_cast %233 : vector<1x16x128xf32> to vector<16x128xf32>
    %235 = vector.shape_cast %115 : vector<16x128xf32> to vector<1x16x128xf32>
    tpu.vector_store %arg28[%c0_250, %c0_251, %c0_252], %235 {strides = array<i32>} : memref<1x16x128xf32, #tpu.memory_space<vmem>>, vector<1x16x128xf32>,
    %c0_253 = arith.constant 0 : index
    %c0_254 = arith.constant 0 : index
    %c0_255 = arith.constant 0 : index
    %236 = vector.load %arg29[%c0_253, %c0_254, %c0_255] : memref<1x8x128xf32, #tpu.memory_space<vmem>>, vector<1x8x128xf32>
    %237 = vector.shape_cast %236 : vector<1x8x128xf32> to vector<8x128xf32>
    %238 = vector.shape_cast %172 : vector<8x128xf32> to vector<1x8x128xf32>
    tpu.vector_store %arg29[%c0_253, %c0_254, %c0_255], %238 {strides = array<i32>} : memref<1x8x128xf32, #tpu.memory_space<vmem>>, vector<1x8x128xf32>,
    %cst_256 = arith.constant 0.000000e+00 : f32
    %239 = vector.broadcast %cst_256 : f32 to vector<4x368xf32>
    %c0_257 = arith.constant 0 : index
    %c0_258 = arith.constant 0 : index
    %240 = vector.load %arg18[%c0_257, %c0_258] : memref<4x32xf32, #tpu.memory_space<vmem>>, vector<4x32xf32>
    %c0_259 = arith.constant 0 : index
    %c0_260 = arith.constant 0 : index
    %241 = vector.load %arg19[%c0_259, %c0_260] : memref<128x368xf32, #tpu.memory_space<vmem>>, vector<128x368xf32>
    %cst_261 = arith.constant dense<0.000000e+00> : vector<4x128xf32>
    %242 = tpu.matmul %240, %58, %cst_261 {dimension_numbers = #tpu.dot_dimension_numbers<[1], [0], [0], [1], [0, 0, 1, 1], [], []>} : vector<4x32xf32>, vector<32x128xf32>, vector<4x128xf32> -> vector<4x128xf32>
    %cst_262 = arith.constant dense<0.000000e+00> : vector<4x368xf32>
    %243 = tpu.matmul %242, %241, %cst_262 {dimension_numbers = #tpu.dot_dimension_numbers<[1], [0], [0], [1], [0, 0, 1, 1], [], []>} : vector<4x128xf32>, vector<128x368xf32>, vector<4x368xf32> -> vector<4x368xf32>
    %244 = arith.addf %239, %243 : vector<4x368xf32>
    %c0_263 = arith.constant 0 : index
    %c0_264 = arith.constant 0 : index
    %245 = vector.load %arg20[%c0_263, %c0_264] : memref<4x16xf32, #tpu.memory_space<vmem>>, vector<4x16xf32>
    %c0_265 = arith.constant 0 : index
    %c0_266 = arith.constant 0 : index
    %246 = vector.load %arg21[%c0_265, %c0_266] : memref<128x368xf32, #tpu.memory_space<vmem>>, vector<128x368xf32>
    %cst_267 = arith.constant dense<0.000000e+00> : vector<4x128xf32>
    %247 = tpu.matmul %245, %115, %cst_267 {dimension_numbers = #tpu.dot_dimension_numbers<[1], [0], [0], [1], [0, 0, 1, 1], [], []>} : vector<4x16xf32>, vector<16x128xf32>, vector<4x128xf32> -> vector<4x128xf32>
    %cst_268 = arith.constant dense<0.000000e+00> : vector<4x368xf32>
    %248 = tpu.matmul %247, %246, %cst_268 {dimension_numbers = #tpu.dot_dimension_numbers<[1], [0], [0], [1], [0, 0, 1, 1], [], []>} : vector<4x128xf32>, vector<128x368xf32>, vector<4x368xf32> -> vector<4x368xf32>
    %249 = arith.addf %244, %248 : vector<4x368xf32>
    %c0_269 = arith.constant 0 : index
    %c0_270 = arith.constant 0 : index
    %250 = vector.load %arg22[%c0_269, %c0_270] : memref<4x8xf32, #tpu.memory_space<vmem>>, vector<4x8xf32>
    %c0_271 = arith.constant 0 : index
    %c0_272 = arith.constant 0 : index
    %251 = vector.load %arg23[%c0_271, %c0_272] : memref<128x368xf32, #tpu.memory_space<vmem>>, vector<128x368xf32>
    %cst_273 = arith.constant dense<0.000000e+00> : vector<4x128xf32>
    %252 = tpu.matmul %250, %172, %cst_273 {dimension_numbers = #tpu.dot_dimension_numbers<[1], [0], [0], [1], [0, 0, 1, 1], [], []>} : vector<4x8xf32>, vector<8x128xf32>, vector<4x128xf32> -> vector<4x128xf32>
    %cst_274 = arith.constant dense<0.000000e+00> : vector<4x368xf32>
    %253 = tpu.matmul %252, %251, %cst_274 {dimension_numbers = #tpu.dot_dimension_numbers<[1], [0], [0], [1], [0, 0, 1, 1], [], []>} : vector<4x128xf32>, vector<128x368xf32>, vector<4x368xf32> -> vector<4x368xf32>
    %254 = arith.addf %249, %253 : vector<4x368xf32>
    %c0_275 = arith.constant 0 : index
    %c0_276 = arith.constant 0 : index
    %255 = vector.load %arg24[%c0_275, %c0_276] : memref<4x4xf32, #tpu.memory_space<vmem>>, vector<4x4xf32>
    %c0_277 = arith.constant 0 : index
    %c0_278 = arith.constant 0 : index
    %256 = vector.load %arg25[%c0_277, %c0_278] : memref<256x368xf32, #tpu.memory_space<vmem>>, vector<256x368xf32>
    %cst_279 = arith.constant dense<0.000000e+00> : vector<4x256xf32>
    %257 = tpu.matmul %255, %229, %cst_279 {dimension_numbers = #tpu.dot_dimension_numbers<[1], [0], [0], [1], [0, 0, 1, 1], [], []>} : vector<4x4xf32>, vector<4x256xf32>, vector<4x256xf32> -> vector<4x256xf32>
    %cst_280 = arith.constant dense<0.000000e+00> : vector<4x368xf32>
    %258 = tpu.matmul %257, %256, %cst_280 {dimension_numbers = #tpu.dot_dimension_numbers<[1], [0], [0], [1], [0, 0, 1, 1], [], []>} : vector<4x256xf32>, vector<256x368xf32>, vector<4x368xf32> -> vector<4x368xf32>
    %259 = arith.addf %254, %258 : vector<4x368xf32>
    %c0_281 = arith.constant 0 : index
    %c0_282 = arith.constant 0 : index
    %c0_283 = arith.constant 0 : index
    %260 = vector.load %arg26[%c0_281, %c0_282, %c0_283] : memref<1x4x368xf32, #tpu.memory_space<vmem>>, vector<1x4x368xf32>
    %261 = vector.shape_cast %260 : vector<1x4x368xf32> to vector<4x368xf32>
    %262 = vector.shape_cast %259 : vector<4x368xf32> to vector<1x4x368xf32>
    tpu.vector_store %arg26[%c0_281, %c0_282, %c0_283], %262 {strides = array<i32>} : memref<1x4x368xf32, #tpu.memory_space<vmem>>, vector<1x4x368xf32>,
    return
  }
  func.func @transform_0(%arg0: i32) -> (i32, i32, i32) {
    %c0_i32 = arith.constant 0 : i32
    %c0_i32_0 = arith.constant 0 : i32
    %c0_i32_1 = arith.constant 0 : i32
    return %arg0, %c0_i32, %c0_i32_0 : i32, i32, i32
  }
  func.func @transform_1(%arg0: i32) -> (i32, i32, i32) {
    %c0_i32 = arith.constant 0 : i32
    %c0_i32_0 = arith.constant 0 : i32
    %c0_i32_1 = arith.constant 0 : i32
    %c0_i32_2 = arith.constant 0 : i32
    return %c0_i32, %c0_i32_0, %c0_i32_1 : i32, i32, i32
  }
  func.func @transform_2(%arg0: i32) -> (i32, i32) {
    %c0_i32 = arith.constant 0 : i32
    %c0_i32_0 = arith.constant 0 : i32
    %c0_i32_1 = arith.constant 0 : i32
    return %c0_i32, %c0_i32_0 : i32, i32
  }
  func.func @transform_3(%arg0: i32) -> (i32, i32, i32) {
    %c0_i32 = arith.constant 0 : i32
    %c0_i32_0 = arith.constant 0 : i32
    %c0_i32_1 = arith.constant 0 : i32
    %c0_i32_2 = arith.constant 0 : i32
    return %c0_i32, %c0_i32_0, %c0_i32_1 : i32, i32, i32
  }
  func.func @transform_4(%arg0: i32) -> (i32, i32) {
    %c0_i32 = arith.constant 0 : i32
    %c0_i32_0 = arith.constant 0 : i32
    %c0_i32_1 = arith.constant 0 : i32
    return %c0_i32, %c0_i32_0 : i32, i32
  }
  func.func @transform_5(%arg0: i32) -> (i32, i32, i32) {
    %c0_i32 = arith.constant 0 : i32
    %c0_i32_0 = arith.constant 0 : i32
    %c0_i32_1 = arith.constant 0 : i32
    %c0_i32_2 = arith.constant 0 : i32
    return %c0_i32, %c0_i32_0, %c0_i32_1 : i32, i32, i32
  }
  func.func @transform_6(%arg0: i32) -> (i32, i32) {
    %c0_i32 = arith.constant 0 : i32
    %c0_i32_0 = arith.constant 0 : i32
    %c0_i32_1 = arith.constant 0 : i32
    return %c0_i32, %c0_i32_0 : i32, i32
  }
  func.func @transform_7(%arg0: i32) -> (i32, i32, i32) {
    %c0_i32 = arith.constant 0 : i32
    %c0_i32_0 = arith.constant 0 : i32
    %c0_i32_1 = arith.constant 0 : i32
    %c0_i32_2 = arith.constant 0 : i32
    return %c0_i32, %c0_i32_0, %c0_i32_1 : i32, i32, i32
  }
  func.func @transform_8(%arg0: i32) -> (i32, i32) {
    %c0_i32 = arith.constant 0 : i32
    %c0_i32_0 = arith.constant 0 : i32
    %c0_i32_1 = arith.constant 0 : i32
    return %c0_i32, %c0_i32_0 : i32, i32
  }
  func.func @transform_9(%arg0: i32) -> (i32, i32, i32) {
    %c0_i32 = arith.constant 0 : i32
    %c0_i32_0 = arith.constant 0 : i32
    %c0_i32_1 = arith.constant 0 : i32
    %c0_i32_2 = arith.constant 0 : i32
    return %c0_i32, %c0_i32_0, %c0_i32_1 : i32, i32, i32
  }
  func.func @transform_10(%arg0: i32) -> (i32, i32) {
    %c0_i32 = arith.constant 0 : i32
    %c0_i32_0 = arith.constant 0 : i32
    %c0_i32_1 = arith.constant 0 : i32
    return %c0_i32, %c0_i32_0 : i32, i32
  }
  func.func @transform_11(%arg0: i32) -> (i32, i32, i32) {
    %c0_i32 = arith.constant 0 : i32
    %c0_i32_0 = arith.constant 0 : i32
    %c0_i32_1 = arith.constant 0 : i32
    %c0_i32_2 = arith.constant 0 : i32
    return %c0_i32, %c0_i32_0, %c0_i32_1 : i32, i32, i32
  }
  func.func @transform_12(%arg0: i32) -> (i32, i32) {
    %c0_i32 = arith.constant 0 : i32
    %c0_i32_0 = arith.constant 0 : i32
    %c0_i32_1 = arith.constant 0 : i32
    return %c0_i32, %c0_i32_0 : i32, i32
  }
  func.func @transform_13(%arg0: i32) -> (i32, i32, i32) {
    %c0_i32 = arith.constant 0 : i32
    %c0_i32_0 = arith.constant 0 : i32
    %c0_i32_1 = arith.constant 0 : i32
    %c0_i32_2 = arith.constant 0 : i32
    return %c0_i32, %c0_i32_0, %c0_i32_1 : i32, i32, i32
  }
  func.func @transform_14(%arg0: i32) -> (i32, i32) {
    %c0_i32 = arith.constant 0 : i32
    %c0_i32_0 = arith.constant 0 : i32
    %c0_i32_1 = arith.constant 0 : i32
    return %c0_i32, %c0_i32_0 : i32, i32
  }
  func.func @transform_15(%arg0: i32) -> (i32, i32, i32) {
    %c0_i32 = arith.constant 0 : i32
    %c0_i32_0 = arith.constant 0 : i32
    %c0_i32_1 = arith.constant 0 : i32
    %c0_i32_2 = arith.constant 0 : i32
    return %c0_i32, %c0_i32_0, %c0_i32_1 : i32, i32, i32
  }
  func.func @transform_16(%arg0: i32) -> (i32, i32) {
    %c0_i32 = arith.constant 0 : i32
    %c0_i32_0 = arith.constant 0 : i32
    %c0_i32_1 = arith.constant 0 : i32
    return %c0_i32, %c0_i32_0 : i32, i32
  }
  func.func @transform_17(%arg0: i32) -> (i32, i32) {
    %c0_i32 = arith.constant 0 : i32
    %c0_i32_0 = arith.constant 0 : i32
    %c0_i32_1 = arith.constant 0 : i32
    return %c0_i32, %c0_i32_0 : i32, i32
  }
  func.func @transform_18(%arg0: i32) -> (i32, i32) {
    %c0_i32 = arith.constant 0 : i32
    %c0_i32_0 = arith.constant 0 : i32
    %c0_i32_1 = arith.constant 0 : i32
    return %c0_i32, %c0_i32_0 : i32, i32
  }
  func.func @transform_19(%arg0: i32) -> (i32, i32) {
    %c0_i32 = arith.constant 0 : i32
    %c0_i32_0 = arith.constant 0 : i32
    %c0_i32_1 = arith.constant 0 : i32
    return %c0_i32, %c0_i32_0 : i32, i32
  }
  func.func @transform_20(%arg0: i32) -> (i32, i32) {
    %c0_i32 = arith.constant 0 : i32
    %c0_i32_0 = arith.constant 0 : i32
    %c0_i32_1 = arith.constant 0 : i32
    return %c0_i32, %c0_i32_0 : i32, i32
  }
  func.func @transform_21(%arg0: i32) -> (i32, i32) {
    %c0_i32 = arith.constant 0 : i32
    %c0_i32_0 = arith.constant 0 : i32
    %c0_i32_1 = arith.constant 0 : i32
    return %c0_i32, %c0_i32_0 : i32, i32
  }
  func.func @transform_22(%arg0: i32) -> (i32, i32) {
    %c0_i32 = arith.constant 0 : i32
    %c0_i32_0 = arith.constant 0 : i32
    %c0_i32_1 = arith.constant 0 : i32
    return %c0_i32, %c0_i32_0 : i32, i32
  }
  func.func @transform_23(%arg0: i32) -> (i32, i32) {
    %c0_i32 = arith.constant 0 : i32
    %c0_i32_0 = arith.constant 0 : i32
    %c0_i32_1 = arith.constant 0 : i32
    return %c0_i32, %c0_i32_0 : i32, i32
  }
  func.func @transform_24(%arg0: i32) -> (i32, i32) {
    %c0_i32 = arith.constant 0 : i32
    %c0_i32_0 = arith.constant 0 : i32
    %c0_i32_1 = arith.constant 0 : i32
    return %c0_i32, %c0_i32_0 : i32, i32
  }
  func.func @transform_25(%arg0: i32) -> (i32, i32, i32) {
    %c0_i32 = arith.constant 0 : i32
    %c0_i32_0 = arith.constant 0 : i32
    %c0_i32_1 = arith.constant 0 : i32
    return %arg0, %c0_i32, %c0_i32_0 : i32, i32, i32
  }
  func.func @transform_26(%arg0: i32) -> (i32, i32, i32) {
    %c0_i32 = arith.constant 0 : i32
    %c0_i32_0 = arith.constant 0 : i32
    %c0_i32_1 = arith.constant 0 : i32
    return %arg0, %c0_i32, %c0_i32_0 : i32, i32, i32
  }
  func.func @transform_27(%arg0: i32) -> (i32, i32, i32) {
    %c0_i32 = arith.constant 0 : i32
    %c0_i32_0 = arith.constant 0 : i32
    %c0_i32_1 = arith.constant 0 : i32
    return %arg0, %c0_i32, %c0_i32_0 : i32, i32, i32
  }
  func.func @transform_28(%arg0: i32) -> (i32, i32, i32) {
    %c0_i32 = arith.constant 0 : i32
    %c0_i32_0 = arith.constant 0 : i32
    %c0_i32_1 = arith.constant 0 : i32
    return %arg0, %c0_i32, %c0_i32_0 : i32, i32, i32
  }
}

</mosaic_0001>

<bundles_post_ra>
// kernel: tpu_custom_call.1
= control target key start
LH: loop header
LB: loop body
LE: loop exit
PB: predicated region body
PF: predicated region fallthrough
CT: control target
= control target key end

     0   :  { %s9236_s0 = inlined_call_operand.vmem [shape: f32[2,64,192], index: 0, kind: input, shape index: {}]   ;;  %s9237_s1 = inlined_call_operand.hbm [shape: f32[7,32,64], index: 1, kind: input, shape index: {}]   ;;  %s9238_s2 = inlined_call_operand.vmem [shape: f32[192,114], index: 2, kind: input, shape index: {}]   ;;  %s9239_s3 = inlined_call_operand.vmem [shape: f32[7,114,128], index: 3, kind: input, shape index: {}]   ;;  %s9240_s4 = inlined_call_operand.vmem [shape: f32[1,128], index: 4, kind: input, shape index: {}]   ;;  %s9241_s5 = inlined_call_operand.hbm [shape: f32[7,16,32], index: 5, kind: input, shape index: {}]   ;;  %s9242_s6 = inlined_call_operand.vmem [shape: f32[128,88], index: 6, kind: input, shape index: {}]   ;;  %s9243_s7 = inlined_call_operand.hbm [shape: f32[7,88,128], index: 7, kind: input, shape index: {}]   ;;  %s9244_s8 = inlined_call_operand.vmem [shape: f32[1,128], index: 8, kind: input, shape index: {}]   ;;  %s9245_s9 = inlined_call_operand.hbm [shape: f32[7,8,16], index: 9, kind: input, shape index: {}]   ;;  %s9246_s10 = inlined_call_operand.vmem [shape: f32[128,112], index: 10, kind: input, shape index: {}]   ;;  %s9247_s11 = inlined_call_operand.hbm [shape: f32[7,112,128], index: 11, kind: input, shape index: {}]   ;;  %s9248_s12 = inlined_call_operand.vmem [shape: f32[1,128], index: 12, kind: input, shape index: {}]   ;;  %s9249_s13 = inlined_call_operand.hbm [shape: f32[7,4,8], index: 13, kind: input, shape index: {}]   ;;  %s9250_s14 = inlined_call_operand.vmem [shape: f32[128,160], index: 14, kind: input, shape index: {}]   ;;  %s9251_s15 = inlined_call_operand.vmem [shape: f32[7,160,256], index: 15, kind: input, shape index: {}]   ;;  %s9252_s16 = inlined_call_operand.vmem [shape: f32[1,256], index: 16, kind: input, shape index: {}]   ;;  %s9253_s17 = inlined_call_operand.vmem [shape: f32[4,32], index: 17, kind: input, shape index: {}]   ;;  %s9254_s18 = inlined_call_operand.vmem [shape: f32[128,368], index: 18, kind: input, shape index: {}]   ;;  %s9255_s19 = inlined_call_operand.vmem [shape: f32[4,16], index: 19, kind: input, shape index: {}]   ;;  %s9256_s20 = inlined_call_operand.vmem [shape: f32[128,368], index: 20, kind: input, shape index: {}]   ;;  %s9257_s21 = inlined_call_operand.vmem [shape: f32[4,8], index: 21, kind: input, shape index: {}]   ;;  %s9258_s22 = inlined_call_operand.vmem [shape: f32[128,368], index: 22, kind: input, shape index: {}]   ;;  %s9259_s23 = inlined_call_operand.vmem [shape: f32[4,4], index: 23, kind: input, shape index: {}]   ;;  %s9260_s24 = inlined_call_operand.vmem [shape: f32[256,368], index: 24, kind: input, shape index: {}]   ;;  %s9261_s25 = inlined_call_operand.hbm [shape: f32[2,4,368], index: 25, kind: output, shape index: {0}]   ;;  %s9262_s26 = inlined_call_operand.hbm [shape: f32[2,32,128], index: 26, kind: output, shape index: {1}]   ;;  %s9263_s27 = inlined_call_operand.hbm [shape: f32[2,16,128], index: 27, kind: output, shape index: {2}]   ;;  %s9264_s28 = inlined_call_operand.hbm [shape: f32[2,8,128], index: 28, kind: output, shape index: {3}]  }
   0x1   :  { %9290 = sst [smem:[#allocation33_spill]] %s9236_s0 }
   0x2   :  { %9291 = sst [smem:[#allocation34_spill]] %s9237_s1 }
   0x3   :  { %9292 = sst [smem:[#allocation35_spill]] %s9238_s2 }
   0x4   :  { %9293 = sst [smem:[#allocation36_spill]] %s9239_s3 }
   0x5   :  { %9294 = sst [smem:[#allocation37_spill]] %s9240_s4 }
   0x6   :  { %9295 = sst [smem:[#allocation38_spill]] %s9241_s5 }
   0x7   :  { %9296 = sst [smem:[#allocation39_spill]] %s9242_s6 }
   0x8   :  { %9297 = sst [smem:[#allocation40_spill]] %s9243_s7 }
   0x9   :  { %9298 = sst [smem:[#allocation41_spill]] %s9244_s8 }
   0xa   :  { %9299 = sst [smem:[#allocation42_spill]] %s9245_s9 }
   0xb   :  { %9300 = sst [smem:[#allocation43_spill]] %s9246_s10 }
   0xc   :  { %9301 = sst [smem:[#allocation44_spill]] %s9247_s11 }
   0xd   :  { %9302 = sst [smem:[#allocation45_spill]] %s9248_s12 }
   0xe   :  { %9303 = sst [smem:[#allocation46_spill]] %s9249_s13 }
   0xf   :  { %9304 = sst [smem:[#allocation47_spill]] %s9250_s14 }
  0x10   :  { %9305 = sst [smem:[#allocation48_spill]] %s9259_s23 }
  0x11   :  { %9306 = sst [smem:[#allocation49_spill]] %s9260_s24 }
  0x12   :  { %9307 = sst [smem:[#allocation50_spill]] %s9261_s25 }
  0x13   :  { %9308 = sst [smem:[#allocation51_spill]] %s9262_s26 }
  0x14   :  { %9309 = sst [smem:[#allocation52_spill]] %s9263_s27 }
  0x15   :  { %9310 = sst [smem:[#allocation53_spill]] %s9264_s28 }
  0x16   :  { %34 = vsyncpa [#allocation3], 0 }
  0x17   :  { %35 = vsyncpa [#allocation6], 0 }
  0x18   :  { %36 = vsyncpa [#allocation9], 0 }
  0x19   :  { %37 = vsyncpa [#allocation12], 0 }
  0x1a   :  { %38 = vsyncpa [#allocation4], 0 }
  0x1b   :  { %40 = vsyncpa [#allocation4 + $0x1], 0 }
  0x1c   :  { %41 = vsyncpa [#allocation15], 0 }
  0x1d   :  { %43 = vsyncpa [#allocation15 + $0x1], 0 }
  0x1e   :  { %44 = vsyncpa [#allocation18], 0 }
  0x1f   :  { %46 = vsyncpa [#allocation18 + $0x1], 0  ;;  %s6382_s8 = smov 0   ;;  %s6384_s5 = smov 0  }
  0x20   :  { %s6386_s9 = smov 0   ;;  %s6388_s30 = smov 0  }
  0x21 LB: > { %9311 = sst [smem:[#allocation26_spill]] %s6211_s8  ;;  %s6403_s3 = sadd.s32 4294967295, %s6223_s30   ;;  %s6223_s30 = sphi %s6388_s30, %s9349_s30   ;;  %s6219_s9 = sphi %s6386_s9, %s9351_s9   ;;  %s6215_s5 = sphi %s6384_s5, %s9353_s5   ;;  %s6211_s8 = sphi %s6382_s8, %s9352_s8  }
  0x22   : > { %9312 = sst [smem:[#allocation27_spill]] %s6219_s9  ;;  %s9269_s6 = sadd.s32 4294967294, %s6223_s30  }
  0x23   : > { %9313 = sst [smem:[#allocation28_spill]] %s6223_s30  ;;  %s6407_s10 = sadd.s32 1, %s6223_s30  }
  0x24   : > { %9314 = sst [smem:[#allocation29_spill]] %s6407_s10  ;;  %s589_s0 = sadd.s32 1, %s6219_s9 }
  0x25   : > { %s586_s11 = ssub.s32 %s6223_s30, %s6407_s10  ;;  %p599_p0 = scmp.ne.s32.totalorder %s6219_s9, %s6215_s5 }
  0x26   : > { %p587_p1 = scmp.eq.s32.totalorder %s586_s11, 0  ;;  %p600_p2 = scmp.eq.s32.totalorder %s6403_s3, 1 }
  0x27   : > { %p605_p3 = scmp.ne.s32.totalorder %s6215_s5, %s6211_s8  ;;  %p606_p4 = scmp.eq.s32.totalorder %s9269_s6, 1 }
  0x28   : > { %s6420_s29 = scalar_select %p587_p1, %s6219_s9, %s589_s0  }
  0x29   : > { %p6422_p5 = por %p600_p2, %p599_p0  ;;  %p6426_p6 = por %p606_p4, %p605_p3 }
  0x2a   : > { %9315 = sst [smem:[#allocation30_spill]] %s6420_s29  ;;  %p5213_p7 = scmp.ge.s32.totalorder %s6223_s30, 1 }
  0x2b   : > { %s9316_s2 = scalar_select %p6422_p5, 1, 0 }
  0x2c   : > { %s9318_s7 = scalar_select %p6426_p6, 1, 0 }
  0x2d   : > { %9317 = sst [smem:[#allocation31_spill]] %s9316_s2  ;;  %p691_p8 = scmp.lt.s32.totalorder %s6223_s30, 3 }
  0x2e   : > { %9319 = sst [smem:[#allocation32_spill]] %s9318_s7  ;;  %p5806_p9 = scmp.eq.s32.totalorder %s6403_s3, 0 }
  0x2f   : > { %p6433_p10 = pnand %p5213_p7, %p691_p8  ;;  %s9321_s11 = sld [smem:[#allocation38_spill]] }
  0x30   : > { %s9322_s9 = sld [smem:[#allocation42_spill]]  ;;  %s6225_s8 = smov [#allocation5]  }
  0x31   : > { %p5774_p11 = pneg %p6433_p10  ;;  %s727_s30 = sshll.u32 %s6225_s8, 4  ;;  %s728_s30 = int_to_ptr.vmem [resolvable:$true] %s727_s30 }
  0x32   : > { %s6226_s1 = smov 128   ;;  %s6227_s4 = smov 8  }
  0x33   : > { %p6447_p12 = pnand %p5806_p9, %p5774_p11  ;;  %s9324_s29 = sld [smem:[#allocation34_spill]] }
  0x34   : > { %s9325_s26 = sld [smem:[#allocation40_spill]]  ;;  %s6229_s24 = smov [#allocation2]  }
  0x35   : > { %s725_s0 = sshll.u32 %s9321_s11, 4  ;;  %s6228_s11 = smov [#allocation8]   ;;  %s726_s0 = int_to_ptr.hbm [resolvable:$true] %s725_s0 }
  0x36   : > { %s759_s10 = sshll.u32 %s9322_s9, 4  ;;  %s761_s25 = sshll.u32 %s6228_s11, 4  ;;  %s760_s10 = int_to_ptr.hbm [resolvable:$true] %s759_s10  ;;  %s762_s25 = int_to_ptr.vmem [resolvable:$true] %s761_s25 }
  0x37   : > { %5780 = dma.hbm_to_vmem [thread:$0]  (!%p6447_p12), %s726_s0, 1792, %s728_s30, [#allocation6], %s6226_s1, %s6226_s1, %s6227_s4  }
  0x38   : > { %5786 = dma.hbm_to_vmem [thread:$0]  (!%p6447_p12), %s760_s10, 896, %s762_s25, [#allocation9], %s6226_s1, %s6226_s1, %s6227_s4  }
  0x39   : > { %s702_s28 = sshll.u32 %s9324_s29, 4  ;;  %s704_s23 = sshll.u32 %s6229_s24, 4  ;;  %s703_s28 = int_to_ptr.hbm [resolvable:$true] %s702_s28  ;;  %s705_s23 = int_to_ptr.vmem [resolvable:$true] %s704_s23 }
  0x3a   : > { %s742_s2 = sshll.u32 %s9325_s26, 4  ;;  %s6230_s30 = smov [#allocation7]   ;;  %s743_s2 = int_to_ptr.hbm [resolvable:$true] %s742_s2 }
  0x3b   : > { %5777 = dma.hbm_to_vmem [thread:$0]  (!%p6447_p12), %s703_s28, 3584, %s705_s23, [#allocation3], %s6226_s1, %s6226_s1, %s6227_s4  }
  0x3c   : > { %s744_s0 = sshll.u32 %s6230_s30, 4  ;;  %s9326_s9 = sld [smem:[#allocation44_spill]]  ;;  %s745_s0 = int_to_ptr.vmem [resolvable:$true] %s744_s0 }
  0x3d   : > { %5783 = dma.hbm_to_vmem [thread:$0]  (!%p6447_p12), %s743_s2, 9856, %s745_s0, [#allocation6], %s6226_s1, %s6226_s1, %s6227_s4  }
  0x3e   : > { %s9327_s13 = sld [smem:[#allocation46_spill]]  ;;  %s6231_s24 = smov [#allocation10]  }
  0x3f   : > { %s778_s10 = sshll.u32 %s6231_s24, 4  ;;  %s6232_s23 = smov [#allocation11]   ;;  %s779_s10 = int_to_ptr.vmem [resolvable:$true] %s778_s10 }
  0x40   : > { %s795_s28 = sshll.u32 %s6232_s23, 4  ;;  %s6233_s8 = smov 64   ;;  %s796_s28 = int_to_ptr.vmem [resolvable:$true] %s795_s28 }
  0x41   : > { %s6234_s30 = smov 4   ;;  %852 = sbr.rel (%p6433_p10) target bundleno = 3516 (0xdbc), region = 120 }
  0x42   : > { %s776_s29 = sshll.u32 %s9326_s9, 4  ;;  %s777_s29 = int_to_ptr.hbm [resolvable:$true] %s776_s29 }
  0x43   : > { %5789 = dma.hbm_to_vmem [thread:$0]  (!%p6447_p12), %s777_s29, 12544, %s779_s10, [#allocation9], %s6226_s1, %s6226_s1, %s6227_s4  }
  0x44   : > { %s793_s27 = sshll.u32 %s9327_s13, 4  ;;  %s794_s27 = int_to_ptr.hbm [resolvable:$true] %s793_s27 }
  0x45   : > { %5792 = dma.hbm_to_vmem [thread:$0]  (!%p6447_p12), %s794_s27, 448, %s796_s28, [#allocation12], %s6233_s8, %s6233_s8, %s6234_s30  }
  0x46   : > { %6182 = dma.done.wait (%p5806_p9), [#allocation3], 3584  }
  0x47   : > { %6184 = vsyncadd (%p5806_p9), [#allocation3], 4294963712 }
  0x48   : > { %6186 = dma.done.wait (%p5806_p9), [#allocation6], 11648  }
  0x49   : > { %6188 = vsyncadd (%p5806_p9), [#allocation6], 4294955648 }
  0x4a   : > { %6190 = dma.done.wait (%p5806_p9), [#allocation9], 13440  }
  0x4b   : > { %6192 = vsyncadd (%p5806_p9), [#allocation9], 4294953856 }
  0x4c   : > { %6194 = dma.done.wait (%p5806_p9), [#allocation12], 448  }
  0x4d   : > { %6196 = vsyncadd (%p5806_p9), [#allocation12], 4294966848  ;;  %s9328_s12 = sld [smem:[#allocation35_spill]]  ;;  %p967_p13 = scmp.lt.s32.totalorder %s6403_s3, 1  ;;  %vm1012_vm0 = vcmask 523264   ;;  %vm1254_vm1 = vcmask 1041408  }
  0x4e   : > { %s9329_s30 = sld [smem:[#allocation33_spill]]  ;;  %vm1241_vm2 = vcmask 932864   ;;  %vm1940_vm3 = vcmask 261120   ;;  %vm2025_vm4 = vcmask 719872   ;;  %vm2507_vm5 = vcmask 130048   ;;  %s4922_s28 = sand.u32 1, %s6403_s3  }
  0x4f   : > { %s968_s8 = scalar_select %p967_p13, %s6403_s3, 1  ;;  %vm2585_vm6 = vcmask 916480   ;;  %vm3031_vm7 = vcmask 64512   ;;  %vm4739_vm8 = vcmask 1043456   ;;  %vm4735_vm9 = vcmask 31744  }
  0x50   : > { %s9330_s4 = sld [smem:[#allocation36_spill]] }
  0x51   : > { %s5722_s9 = sshll.u32 %s968_s8, 7  ;;  %s9331_s25 = sld [smem:[#allocation39_spill]] }
  0x52   : > { %s9332_s27 = sld [smem:[#allocation37_spill]] }
  0x53   : > { %v1003_v0 = vld [vmem:[%s9328_s12 + $0x78] sm:$0xff]  ;;  %v1002_v1 = vld [vmem:[%s9328_s12 + $0x70] sm:$0xff]  ;;  %v1001_v2 = vld [vmem:[%s9328_s12 + $0x68] sm:$0xff]  ;;  %s9335_s29 = sld [smem:[#allocation41_spill]] }
  0x54   : > { %1037 = vmatpush.msra.mxu0 %v1003_v0  ;;  %v1011_v3 = vld [vmem:[%s9328_s12 + $0xb8] sm:$0xff]  ;;  %v1010_v4 = vld [vmem:[%s9328_s12 + $0xb0] sm:$0xff]  ;;  %v1000_v5 = vld [vmem:[%s9328_s12 + $0x60] sm:$0xff]  ;;  %s6543_s2 = scalar_lea.vmem %s9329_s30, %s5722_s9  ;;  %s7178_s9 = sand.u32 1, %s6215_s5  }
  0x55   : > { %1086 = vmatpush.msra.mxu1 %v1011_v3  ;;  %v1009_v6 = vld [vmem:[%s9328_s12 + $0xa8] sm:$0xff]  ;;  %v999_v7 = vld [vmem:[%s9328_s12 + $0x58] sm:$0xff]  ;;  %v1008_v8 = vld [vmem:[%s9328_s12 + $0xa0] sm:$0xff]  ;;  %s5228_s24 = sshll.u32 %s7178_s9, 5  ;;  %s9333_s30 = sld [smem:[#allocation43_spill]] }
  0x56   : > { %1038 = vmatpush.msra.mxu0 %v1002_v1  ;;  %v998_v9 = vld [vmem:[%s9328_s12 + $0x50] sm:$0xff]  ;;  %v1007_v10 = vld [vmem:[%s9328_s12 + $0x98] sm:$0xff]  ;;  %v997_v11 = vld [vmem:[%s9328_s12 + $0x48] sm:$0xff]  ;;  %s7187_s10 = scalar_lea.vmem [#allocation14], %s5228_s24  ;;  %s5229_s26 = sshll.u32 %s7178_s9, 4 }
  0x57   : > { %1087 = vmatpush.msra.mxu1 %v1010_v4  ;;  %v1006_v12 = vld [vmem:[%s9328_s12 + $0x90] sm:$0xff]  ;;  %v996_v13 = vld [vmem:[%s9328_s12 + $0x40] sm:$0xff]  ;;  %v1005_v14 = vld [vmem:[%s9328_s12 + $0x88] sm:$0xff]  ;;  %s9336_s14 = sld [smem:[#allocation47_spill]]  ;;  %s5230_s11 = sshll.u32 %s7178_s9, 3 }
  0x58   : > { %1039 = vmatpush.msra.mxu0 %v1001_v2  ;;  %v995_v15 = vld [vmem:[%s9328_s12 + $0x38] sm:$0xff]  ;;  %v1004_v16 = vld [vmem:[%s9328_s12 + $0x80] sm:$0xff]  ;;  %v994_v17 = vld [vmem:[%s9328_s12 + $0x30] sm:$0xff]  ;;  %s9337_s0 = sld [smem:[#allocation45_spill]]  ;;  %s4960_s23 = sshll.u32 %s7187_s10, 4  ;;  %s4961_s23 = int_to_ptr.vmem [resolvable:$true] %s4960_s23 }
  0x59   : > { %1088 = vmatpush.msra.mxu1 %v1009_v6  ;;  %v973_v18 = vld [vmem:[%s6543_s2 + $0x8] sm:$0xff]  ;;  %v992_v20 = vld [vmem:[%s9328_s12 + $0x20] sm:$0xff]  ;;  %v991_v21 = vld [vmem:[%s9328_s12 + $0x18] sm:$0xff] }
  0x5a   : > { %1040 = vmatpush.msra.mxu0 %v1000_v5  ;;  %v993_v19 = vld [vmem:[%s9328_s12 + $0x28] sm:$0xff]  ;;  %v990_v22 = vld [vmem:[%s9328_s12 + $0x10] sm:$0xff]  ;;  %v975_v23 = vld [vmem:[%s6543_s2 + $0x18] sm:$0xff] }
  0x5b   : > { %1089 = vmatpush.msra.mxu1 %v1008_v8  ;;  %v989_v24 = vld [vmem:[%s9328_s12 + $0x8] sm:$0xff]  ;;  %v988_v25 = vld [vmem:[%s9328_s12] sm:$0xff]  ;;  %v974_v28 = vld [vmem:[%s6543_s2 + $0x10] sm:$0xff]  ;;  %s9334_s7 = smov %s9333_s30 }
  0x5c   : > { %1041 = vmatpush.msra.mxu0 %v999_v7  ;;  %v972_v26 = vld [vmem:[%s6543_s2] sm:$0xff]  ;;  %v977_v27 = vld [vmem:[%s6543_s2 + $0x28] sm:$0xff]  ;;  %v979_v29 = vld [vmem:[%s6543_s2 + $0x38] sm:$0xff] }
  0x5d   : > { %1090 = vmatpush.msra.mxu1 %v1007_v10  ;;  %v976_v30 = vld [vmem:[%s6543_s2 + $0x20] sm:$0xff]  ;;  %v981_v31 = vld [vmem:[%s6543_s2 + $0x48] sm:$0xff]  ;;  %v978_v32 = vld [vmem:[%s6543_s2 + $0x30] sm:$0xff] }
  0x5e   : > { %1042 = vmatpush.msra.mxu0 %v998_v9  ;;  %v983_v33 = vld [vmem:[%s6543_s2 + $0x58] sm:$0xff]  ;;  %v980_v34 = vld [vmem:[%s6543_s2 + $0x40] sm:$0xff]  ;;  %v985_v35 = vld [vmem:[%s6543_s2 + $0x68] sm:$0xff] }
  0x5f   : > { %1091 = vmatpush.msra.mxu1 %v1006_v12  ;;  %v982_v36 = vld [vmem:[%s6543_s2 + $0x50] sm:$0xff]  ;;  %v987_v37 = vld [vmem:[%s6543_s2 + $0x78] sm:$0xff]  ;;  %v984_v38 = vld [vmem:[%s6543_s2 + $0x60] sm:$0xff] }
  0x60   : > { %1043 = vmatpush.msra.mxu0 %v997_v11  ;;  %v986_v39 = vld [vmem:[%s6543_s2 + $0x70] sm:$0xff]  ;;  %v6610_v43 = vld [vmem:[%s9330_s4 + $0x68] sm:$0xff]  ;;  %v6618_v45 = vld [vmem:[%s9330_s4 + $0x60] sm:$0xff]  ;;  %s7489_s2 = scalar_lea.vmem [#allocation17], %s5230_s11  ;;  %s9341_s11 = sld [smem:[#allocation51_spill]] }
  0x61   : > { %1092 = vmatpush.msra.mxu1 %v1005_v14  ;;  %v6601_v41 = vld [vmem:[%s9330_s4 + $0x70] sm:$0x3]  ;;  %v6623_v46 = vld [vmem:[%s9330_s4 + $0x58] sm:$0xff]  ;;  %v6636_v49 = vld [vmem:[%s9330_s4 + $0x48] sm:$0xff] }
  0x62   : > { %1044 = vmatpush.msra.mxu0 %v996_v13  ;;  %v6629_v47 = vld [vmem:[%s9330_s4 + $0x50] sm:$0xff]  ;;  %v6642_v51 = vld [vmem:[%s9330_s4 + $0x40] sm:$0xff]  ;;  %v6647_v52 = vld [vmem:[%s9330_s4 + $0x38] sm:$0xff] }
  0x63   : > { %1093 = vmatpush.msra.mxu1 %v1004_v16  ;;  %v6653_v53 = vld [vmem:[%s9330_s4 + $0x30] sm:$0xff]  ;;  %v6660_v55 = vld [vmem:[%s9330_s4 + $0x28] sm:$0xff]  ;;  %v6666_v57 = vld [vmem:[%s9330_s4 + $0x20] sm:$0xff] }
  0x64   : > { %1045 = vmatpush.msra.mxu0 %v995_v15  ;;  %5233 = vmatmul.msk.f32.vlgmr.msra.gmra.mxu1 %vm1012_vm0, %v973_v18  ;;  %v6671_v58 = vld [vmem:[%s9330_s4 + $0x18] sm:$0xff]  ;;  %v6677_v59 = vld [vmem:[%s9330_s4 + $0x10] sm:$0xff]  ;;  %v6684_v60 = vld [vmem:[%s9330_s4 + $0x8] sm:$0xff] }
  0x65   : > { %5269 = vmatpush.msk.msrb.mxu1 %vm1254_vm1, %v6601_v41  ;;  %v6690_v63 = vld [vmem:[%s9330_s4] sm:$0xff]  ;;  %v1181_v18 = vld [vmem:[#allocation2 + $0x28] sm:$0xff] }
  0x66   : > { %1046 = vmatpush.msra.mxu0 %v994_v17  ;;  %v1119_v15 = vld [vmem:[#allocation2] sm:$0xff]  ;;  %v1120_v17 = vld [vmem:[#allocation2 + $0x8] sm:$0xff]  ;;  %s6073_s12 = scalar_lea.hbm %s9341_s11, 64 }
  0x67   : > { %1304 = vmatpush.msrb.mxu1 %v6610_v43  ;;  %v1180_v16 = vld [vmem:[#allocation2 + $0x20] sm:$0xff] }
  0x68   : > { %1047 = vmatpush.msra.mxu0 %v993_v19  ;;  %v1121_v19 = vld [vmem:[#allocation2 + $0x10] sm:$0xff] }
  0x69   : > { %1305 = vmatpush.msrb.mxu1 %v6618_v45 }
  0x6a   : > { %1048 = vmatpush.msra.mxu0 %v992_v20  ;;  %v5263_v20 = vld [vmem:[%s9330_s4 + $0xe8] sm:$0x3] }
  0x6b   : > { %1306 = vmatpush.msrb.mxu1 %v6623_v46 }
  0x6c   : > { %1049 = vmatpush.msra.mxu0 %v991_v21  ;;  %5234 = vmatmul.msk.f32.gmra.mxu1 %vm1012_vm0, %v975_v23  ;;  %v1182_v21 = vld [vmem:[#allocation2 + $0x30] sm:$0xff]  ;;  %v5261_v23 = vld [vmem:[%s9330_s4 + $0xd8] sm:$0xff] }
  0x6d   : > { %1307 = vmatpush.msrb.mxu1 %v6629_v47 }
  0x6e   : > { %1050 = vmatpush.msra.mxu0 %v990_v22  ;;  %v5262_v22 = vld [vmem:[%s9330_s4 + $0xe0] sm:$0xff] }
  0x6f   : > { %1308 = vmatpush.msrb.mxu1 %v6636_v49 }
  0x70   : > { %1051 = vmatpush.msra.mxu0 %v989_v24  ;;  %v5260_v24 = vld [vmem:[%s9330_s4 + $0xd0] sm:$0xff] }
  0x71   : > { %1309 = vmatpush.msrb.mxu1 %v6642_v51 }
  0x72   : > { %1052 = vmatpush.msra.mxu0 %v988_v25  ;;  %v5259_v25 = vld [vmem:[%s9330_s4 + $0xc8] sm:$0xff] }
  0x73   : > { %1053 = vmatmul.f32.vlgmr.msra.gmra.mxu0 %v972_v26  ;;  %1310 = vmatpush.msrb.mxu1 %v6647_v52  ;;  %v1122_v26 = vld [vmem:[#allocation2 + $0x18] sm:$0xff] }
  0x74   : > { %5235 = vmatmul.msk.f32.gmra.mxu1 %vm1012_vm0, %v977_v27  ;;  %v1183_v27 = vld [vmem:[#allocation2 + $0x38] sm:$0xff] }
  0x75   : > { %1311 = vmatpush.msrb.mxu1 %v6653_v53 }
  0x77   : > { %1312 = vmatpush.msrb.mxu1 %v6660_v55 }
  0x79   : > { %1313 = vmatpush.msrb.mxu1 %v6666_v57 }
  0x7b   : > { %1056 = vmatmul.f32.gmra.mxu0 %v974_v28  ;;  %1314 = vmatpush.msrb.mxu1 %v6671_v58  ;;  %v5258_v28 = vld [vmem:[%s9330_s4 + $0xc0] sm:$0xff] }
  0x7c   : > { %5236 = vmatmul.msk.f32.gmra.mxu1 %vm1012_vm0, %v979_v29  ;;  %v5257_v29 = vld [vmem:[%s9330_s4 + $0xb8] sm:$0xff] }
  0x7d   : > { %1315 = vmatpush.msrb.mxu1 %v6677_v59 }
  0x7f   : > { %1316 = vmatpush.msrb.mxu1 %v6684_v60 }
  0x81   : > { %1317 = vmatpush.msrb.mxu1 %v6690_v63 }
  0x83   : > { %1059 = vmatmul.f32.gmra.mxu0 %v976_v30  ;;  %v5256_v30 = vld [vmem:[%s9330_s4 + $0xb0] sm:$0xff] }
  0x84   : > { %5237 = vmatmul.msk.f32.gmra.mxu1 %vm1012_vm0, %v981_v31  ;;  %v5255_v31 = vld [vmem:[%s9330_s4 + $0xa8] sm:$0xff] }
  0x8b   : > { %1062 = vmatmul.f32.gmra.mxu0 %v978_v32  ;;  %v5254_v32 = vld [vmem:[%s9330_s4 + $0xa0] sm:$0xff] }
  0x8c   : > { %5238 = vmatmul.msk.f32.gmra.mxu1 %vm1012_vm0, %v983_v33  ;;  %v5253_v33 = vld [vmem:[%s9330_s4 + $0x98] sm:$0xff] }
  0x93   : > { %1065 = vmatmul.f32.gmra.mxu0 %v980_v34  ;;  %v5252_v34 = vld [vmem:[%s9330_s4 + $0x90] sm:$0xff] }
  0x94   : > { %5239 = vmatmul.msk.f32.gmra.mxu1 %vm1012_vm0, %v985_v35  ;;  %v5251_v35 = vld [vmem:[%s9330_s4 + $0x88] sm:$0xff] }
  0x9b   : > { %1068 = vmatmul.f32.gmra.mxu0 %v982_v36  ;;  %v5250_v36 = vld [vmem:[%s9330_s4 + $0x80] sm:$0xff] }
  0x9c   : > { %5240 = vmatmul.msk.f32.gmra.mxu1 %vm1012_vm0, %v987_v37  ;;  %v5249_v37 = vld [vmem:[%s9330_s4 + $0x78] sm:$0xff] }
  0xa3   : > { %1071 = vmatmul.f32.gmra.mxu0 %v984_v38 }
  0xab   : > { %1074 = vmatmul.f32.gmra.mxu0 %v986_v39 }
  0xe1   : > { %v6596_v40 = vpop.f32.mrf.mxu1 }
  0xe9   : > { %v6605_v42 = vpop.f32.mrf.mxu1 }
  0xf0   : > { %v6612_v44 = vpop.f32.mrf.mxu0 }
  0xf1   : > { %v1101_v48 = vpop.f32.mrf.mxu1  ;;  %v6728_v14 = vadd.f32 %v6596_v40, %v6612_v44 }
  0xf8   : > { %v1057_v50 = vpop.f32.mrf.mxu0 }
  0xf9   : > { %v1104_v54 = vpop.f32.mrf.mxu1  ;;  %v6721_v13 = vadd.f32 %v6605_v42, %v1057_v50  ;;  %v1332_v42 = vld [vmem:[#allocation2 + $0x40] sm:$0xff]  ;;  %v1335_v50 = vld [vmem:[#allocation2 + $0x58] sm:$0xff] }
 0x100   : > { %v1060_v56 = vpop.f32.mrf.mxu0 }
 0x101   : > { %v1107_v62 = vpop.f32.mrf.mxu1  ;;  %v6715_v12 = vadd.f32 %v1101_v48, %v1060_v56  ;;  %v1334_v48 = vld [vmem:[#allocation2 + $0x50] sm:$0xff] }
 0x102   : > { %v1554_v56 = vld [vmem:[#allocation2 + $0x90] sm:$0xff] }
 0x108   : > { %v1063_v61 = vpop.f32.mrf.mxu0 }
 0x109   : > { %v1110_v1 = vpop.f32.mrf.mxu1  ;;  %v6710_v11 = vadd.f32 %v1104_v54, %v1063_v61  ;;  %v1445_v54 = vld [vmem:[#allocation2 + $0x78] sm:$0xff] }
 0x10a   : > { %v5291_v61 = vld [vmem:[%s9330_s4 + $0x158] sm:$0xff] }
 0x110   : > { %v1066_v0 = vpop.f32.mrf.mxu0 }
 0x111   : > { %v1113_v3 = vpop.f32.mrf.mxu1  ;;  %v6705_v10 = vadd.f32 %v1107_v62, %v1066_v0  ;;  %v5290_v62 = vld [vmem:[%s9330_s4 + $0x150] sm:$0xff] }
 0x112   : > { %v1664_v0 = vld [vmem:[#allocation2 + $0xb0] sm:$0xff] }
 0x118   : > { %v1069_v2 = vpop.f32.mrf.mxu0 }
 0x119   : > { %v1116_v5 = vpop.f32.mrf.mxu1  ;;  %v6700_v9 = vadd.f32 %v1110_v1, %v1069_v2  ;;  %v1772_v1 = vld [vmem:[#allocation2 + $0xc0] sm:$0xff] }
 0x11a   : > { %v5288_v2 = vld [vmem:[%s9330_s4 + $0x140] sm:$0xff] }
 0x120   : > { %v1072_v4 = vpop.f32.mrf.mxu0 }
 0x121   : > { %v6695_v8 = vadd.f32 %v1113_v3, %v1072_v4  ;;  %v5287_v3 = vld [vmem:[%s9330_s4 + $0x138] sm:$0xff] }
 0x122   : > { %v1665_v4 = vld [vmem:[#allocation2 + $0xb8] sm:$0xff] }
 0x128   : > { %v1075_v6 = vpop.f32.mrf.mxu0 }
 0x129   : > { %v6693_v7 = vadd.f32 %v1116_v5, %v1075_v6  ;;  %v1773_v5 = vld [vmem:[#allocation2 + $0xc8] sm:$0xff]  ;;  %v1774_v6 = vld [vmem:[#allocation2 + $0xd0] sm:$0xff] }
 0x12b   : > { %1143 = vmatpush.msra.mxu2 %v6693_v7  ;;  %1204 = vmatpush.msra.mxu3 %v6693_v7 }
 0x12c   : > { %1356 = vmatpush.msra.mxu1 %v6693_v7 }
 0x12d   : > { %1144 = vmatpush.msra.mxu2 %v6695_v8  ;;  %1205 = vmatpush.msra.mxu3 %v6695_v8 }
 0x12e   : > { %1357 = vmatpush.msra.mxu1 %v6695_v8 }
 0x12f   : > { %1145 = vmatpush.msra.mxu2 %v6700_v9  ;;  %1206 = vmatpush.msra.mxu3 %v6700_v9 }
 0x130   : > { %1358 = vmatpush.msra.mxu1 %v6700_v9 }
 0x131   : > { %1146 = vmatpush.msra.mxu2 %v6705_v10  ;;  %1207 = vmatpush.msra.mxu3 %v6705_v10 }
 0x132   : > { %1359 = vmatpush.msra.mxu1 %v6705_v10 }
 0x133   : > { %1147 = vmatpush.msra.mxu2 %v6710_v11  ;;  %1208 = vmatpush.msra.mxu3 %v6710_v11 }
 0x134   : > { %1360 = vmatpush.msra.mxu1 %v6710_v11 }
 0x135   : > { %1148 = vmatpush.msra.mxu2 %v6715_v12  ;;  %1209 = vmatpush.msra.mxu3 %v6715_v12 }
 0x136   : > { %1361 = vmatpush.msra.mxu1 %v6715_v12 }
 0x137   : > { %1149 = vmatpush.msra.mxu2 %v6721_v13  ;;  %1210 = vmatpush.msra.mxu3 %v6721_v13 }
 0x138   : > { %1362 = vmatpush.msra.mxu1 %v6721_v13 }
 0x139   : > { %1150 = vmatpush.msra.mxu2 %v6728_v14  ;;  %1211 = vmatpush.msra.mxu3 %v6728_v14 }
 0x13a   : > { %1363 = vmatpush.msra.mxu1 %v6728_v14  ;;  %5241 = vmatmul.msk.f32.vlgmr.msra.gmra.mxu2 %vm1012_vm0, %v1119_v15  ;;  %v5315_v15 = vld [vmem:[%s9330_s4 + $0x1d0] sm:$0xff] }
 0x13b   : > { %5245 = vmatmul.msk.f32.vlgmr.msra.gmra.mxu3 %vm1012_vm0, %v1180_v16  ;;  %5264 = vmatpush.msk.msrb.mxu2 %vm1254_vm1, %v5263_v20  ;;  %v5280_v16 = vld [vmem:[%s9330_s4 + $0x100] sm:$0xff] }
 0x13c   : > { %5725 = vmatpush.msk.msrb.mxu3 %vm1254_vm1, %v6601_v41  ;;  %v5313_v20 = vld [vmem:[%s9330_s4 + $0x1c0] sm:$0xff] }
 0x13d   : > { %1260 = vmatpush.msrb.mxu2 %v5262_v22  ;;  %v5340_v22 = vld [vmem:[%s9330_s4 + $0x250] sm:$0x3] }
 0x13e   : > { %5726 = vmatpush.msrb.mxu3 %v6610_v43 }
 0x13f   : > { %1261 = vmatpush.msrb.mxu2 %v5261_v23  ;;  %v5311_v23 = vld [vmem:[%s9330_s4 + $0x1b0] sm:$0xff] }
 0x140   : > { %5727 = vmatpush.msrb.mxu3 %v6618_v45  ;;  %v1333_v45 = vld [vmem:[#allocation2 + $0x48] sm:$0xff] }
 0x141   : > { %1262 = vmatpush.msrb.mxu2 %v5260_v24  ;;  %v5310_v24 = vld [vmem:[%s9330_s4 + $0x1a8] sm:$0xff] }
 0x142   : > { %5728 = vmatpush.msrb.mxu3 %v6623_v46  ;;  %5242 = vmatmul.msk.f32.gmra.mxu2 %vm1012_vm0, %v1120_v17  ;;  %v5279_v17 = vld [vmem:[%s9330_s4 + $0xf8] sm:$0xff] }
 0x143   : > { %5246 = vmatmul.msk.f32.gmra.mxu3 %vm1012_vm0, %v1181_v18  ;;  %1263 = vmatpush.msrb.mxu2 %v5259_v25  ;;  %v5314_v18 = vld [vmem:[%s9330_s4 + $0x1c8] sm:$0xff] }
 0x144   : > { %5729 = vmatpush.msrb.mxu3 %v6629_v47  ;;  %v5339_v25 = vld [vmem:[%s9330_s4 + $0x248] sm:$0xff] }
 0x145   : > { %1264 = vmatpush.msrb.mxu2 %v5258_v28  ;;  %v5308_v28 = vld [vmem:[%s9330_s4 + $0x198] sm:$0xff] }
 0x146   : > { %5730 = vmatpush.msrb.mxu3 %v6636_v49  ;;  %v1442_v49 = vld [vmem:[#allocation2 + $0x60] sm:$0xff] }
 0x147   : > { %1265 = vmatpush.msrb.mxu2 %v5257_v29  ;;  %v5337_v29 = vld [vmem:[%s9330_s4 + $0x238] sm:$0xff] }
 0x148   : > { %5731 = vmatpush.msrb.mxu3 %v6642_v51  ;;  %v1443_v51 = vld [vmem:[#allocation2 + $0x68] sm:$0xff] }
 0x149   : > { %1266 = vmatpush.msrb.mxu2 %v5256_v30  ;;  %v5336_v30 = vld [vmem:[%s9330_s4 + $0x230] sm:$0xff] }
 0x14a   : > { %5732 = vmatpush.msrb.mxu3 %v6647_v52  ;;  %5243 = vmatmul.msk.f32.gmra.mxu2 %vm1012_vm0, %v1121_v19  ;;  %v1444_v52 = vld [vmem:[#allocation2 + $0x70] sm:$0xff] }
 0x14b   : > { %5247 = vmatmul.msk.f32.gmra.mxu3 %vm1012_vm0, %v1182_v21  ;;  %1267 = vmatpush.msrb.mxu2 %v5255_v31  ;;  %v5278_v19 = vld [vmem:[%s9330_s4 + $0xf0] sm:$0xff]  ;;  %v5312_v21 = vld [vmem:[%s9330_s4 + $0x1b8] sm:$0xff] }
 0x14c   : > { %5733 = vmatpush.msrb.mxu3 %v6653_v53  ;;  %v1552_v53 = vld [vmem:[#allocation2 + $0x80] sm:$0xff]  ;;  %v5307_v31 = vld [vmem:[%s9330_s4 + $0x190] sm:$0xff] }
 0x14d   : > { %1268 = vmatpush.msrb.mxu2 %v5254_v32  ;;  %v5306_v32 = vld [vmem:[%s9330_s4 + $0x188] sm:$0xff] }
 0x14e   : > { %5734 = vmatpush.msrb.mxu3 %v6660_v55  ;;  %v1553_v55 = vld [vmem:[#allocation2 + $0x88] sm:$0xff] }
 0x14f   : > { %1269 = vmatpush.msrb.mxu2 %v5253_v33  ;;  %v5335_v33 = vld [vmem:[%s9330_s4 + $0x228] sm:$0xff] }
 0x150   : > { %5735 = vmatpush.msrb.mxu3 %v6666_v57  ;;  %v1662_v57 = vld [vmem:[#allocation2 + $0xa0] sm:$0xff] }
 0x151   : > { %1270 = vmatpush.msrb.mxu2 %v5252_v34 }
 0x152   : > { %5736 = vmatpush.msrb.mxu3 %v6671_v58  ;;  %5244 = vmatmul.msk.f32.gmra.mxu2 %vm1012_vm0, %v1122_v26  ;;  %v1555_v58 = vld [vmem:[#allocation2 + $0x98] sm:$0xff]  ;;  %v5309_v26 = vld [vmem:[%s9330_s4 + $0x1a0] sm:$0xff] }
 0x153   : > { %5248 = vmatmul.msk.f32.gmra.mxu3 %vm1012_vm0, %v1183_v27  ;;  %1271 = vmatpush.msrb.mxu2 %v5251_v35  ;;  %v5338_v27 = vld [vmem:[%s9330_s4 + $0x240] sm:$0xff] }
 0x154   : > { %5737 = vmatpush.msrb.mxu3 %v6677_v59  ;;  %v1663_v59 = vld [vmem:[#allocation2 + $0xa8] sm:$0xff]  ;;  %v5305_v35 = vld [vmem:[%s9330_s4 + $0x180] sm:$0xff] }
 0x155   : > { %1272 = vmatpush.msrb.mxu2 %v5250_v36  ;;  %v5334_v36 = vld [vmem:[%s9330_s4 + $0x220] sm:$0xff] }
 0x156   : > { %5738 = vmatpush.msrb.mxu3 %v6684_v60  ;;  %v5292_v60 = vld [vmem:[%s9330_s4 + $0x160] sm:$0x3] }
 0x157   : > { %1273 = vmatpush.msrb.mxu2 %v5249_v37  ;;  %v5304_v37 = vld [vmem:[%s9330_s4 + $0x178] sm:$0xff] }
 0x158   : > { %5739 = vmatpush.msrb.mxu3 %v6690_v63  ;;  %v5289_v63 = vld [vmem:[%s9330_s4 + $0x148] sm:$0xff] }
 0x159   : > { %5293 = vmatpush.msk.msra.mxu2 %vm1254_vm1, %v5292_v60 }
 0x15a   : > { %1466 = vmatpush.msra.mxu3 %v6693_v7 }
 0x15b   : > { %1410 = vmatpush.msra.mxu2 %v5291_v61  ;;  %v5357_v61 = vld [vmem:[%s9330_s4 + $0x290] sm:$0xff] }
 0x15c   : > { %1467 = vmatpush.msra.mxu3 %v6695_v8 }
 0x15d   : > { %1411 = vmatpush.msra.mxu2 %v5290_v62  ;;  %v5386_v62 = vld [vmem:[%s9330_s4 + $0x330] sm:$0xff] }
 0x15e   : > { %1468 = vmatpush.msra.mxu3 %v6700_v9 }
 0x15f   : > { %1412 = vmatpush.msra.mxu2 %v5289_v63  ;;  %v5356_v63 = vld [vmem:[%s9330_s4 + $0x288] sm:$0xff] }
 0x160   : > { %1469 = vmatpush.msra.mxu3 %v6705_v10 }
 0x161   : > { %1413 = vmatpush.msra.mxu2 %v5288_v2  ;;  %v5384_v2 = vld [vmem:[%s9330_s4 + $0x320] sm:$0xff] }
 0x162   : > { %1470 = vmatpush.msra.mxu3 %v6710_v11 }
 0x163   : > { %1414 = vmatpush.msra.mxu2 %v5287_v3 }
 0x164   : > { %1471 = vmatpush.msra.mxu3 %v6715_v12 }
 0x166   : > { %1472 = vmatpush.msra.mxu3 %v6721_v13 }
 0x168   : > { %1473 = vmatpush.msra.mxu3 %v6728_v14 }
 0x1bd   : > { %v1152_v38 = vpop.f32.mrf.mxu2 }
 0x1be   : > { %v1213_v39 = vpop.f32.mrf.mxu3  ;;  %5270 = vmatmul.msk.f32.vlgmr.msrb.gmra.mxu1 %vm1241_vm2, %v1152_v38  ;;  %v5333_v38 = vld [vmem:[%s9330_s4 + $0x218] sm:$0xff] }
 0x1bf   : > { %5265 = vmatmul.msk.f32.vlgmr.msrb.gmra.mxu2 %vm1241_vm2, %v1213_v39  ;;  %1576 = vmatpush.msrb.mxu1 %v6693_v7  ;;  %v5332_v39 = vld [vmem:[%s9330_s4 + $0x210] sm:$0xff] }
 0x1c1   : > { %1577 = vmatpush.msrb.mxu1 %v6695_v8 }
 0x1c3   : > { %1578 = vmatpush.msrb.mxu1 %v6700_v9 }
 0x1c5   : > { %1579 = vmatpush.msrb.mxu1 %v6705_v10  ;;  %v1155_v40 = vpop.f32.mrf.mxu2 }
 0x1c6   : > { %v1216_v41 = vpop.f32.mrf.mxu3  ;;  %5271 = vmatmul.msk.f32.gmra.mxu1 %vm1241_vm2, %v1155_v40  ;;  %v5303_v40 = vld [vmem:[%s9330_s4 + $0x170] sm:$0xff] }
 0x1c7   : > { %5266 = vmatmul.msk.f32.gmra.mxu2 %vm1241_vm2, %v1216_v41  ;;  %1580 = vmatpush.msrb.mxu1 %v6710_v11  ;;  %v5302_v41 = vld [vmem:[%s9330_s4 + $0x168] sm:$0xff] }
 0x1c9   : > { %1581 = vmatpush.msrb.mxu1 %v6715_v12 }
 0x1cb   : > { %1582 = vmatpush.msrb.mxu1 %v6721_v13 }
 0x1cd   : > { %1583 = vmatpush.msrb.mxu1 %v6728_v14  ;;  %v1158_v43 = vpop.f32.mrf.mxu2 }
 0x1ce   : > { %5272 = vmatmul.msk.f32.vlgmr.msrb.gmra.mxu3 %vm1241_vm2, %v1158_v43  ;;  %5274 = vmatmul.msk.f32.vlgmr.msra.gmra.mxu1 %vm1012_vm0, %v1332_v42  ;;  %v1219_v44 = vpop.f32.mrf.mxu3  ;;  %v5331_v42 = vld [vmem:[%s9330_s4 + $0x208] sm:$0xff] }
 0x1cf   : > { %1686 = vmatpush.msrb.mxu3 %v6693_v7  ;;  %1796 = vmatpush.msra.mxu1 %v6693_v7  ;;  %v5286_v7 = vld [vmem:[%s9330_s4 + $0x130] sm:$0xff] }
 0x1d0   : > { %5267 = vmatmul.msk.f32.gmra.mxu2 %vm1241_vm2, %v1219_v44  ;;  %v5330_v44 = vld [vmem:[%s9330_s4 + $0x200] sm:$0xff] }
 0x1d1   : > { %1687 = vmatpush.msrb.mxu3 %v6695_v8  ;;  %1797 = vmatpush.msra.mxu1 %v6695_v8  ;;  %v5285_v8 = vld [vmem:[%s9330_s4 + $0x128] sm:$0xff] }
 0x1d2   : > { %1415 = vmatpush.msra.mxu2 %v5286_v7  ;;  %v5353_v7 = vld [vmem:[%s9330_s4 + $0x270] sm:$0xff] }
 0x1d3   : > { %1688 = vmatpush.msrb.mxu3 %v6700_v9  ;;  %1798 = vmatpush.msra.mxu1 %v6700_v9  ;;  %v5284_v9 = vld [vmem:[%s9330_s4 + $0x120] sm:$0xff] }
 0x1d4   : > { %1416 = vmatpush.msra.mxu2 %v5285_v8  ;;  %v5382_v8 = vld [vmem:[%s9330_s4 + $0x310] sm:$0xff] }
 0x1d5   : > { %1689 = vmatpush.msrb.mxu3 %v6705_v10  ;;  %1799 = vmatpush.msra.mxu1 %v6705_v10  ;;  %v1161_v46 = vpop.f32.mrf.mxu2  ;;  %v5283_v10 = vld [vmem:[%s9330_s4 + $0x118] sm:$0xff] }
 0x1d6   : > { %5273 = vmatmul.msk.f32.gmra.mxu3 %vm1241_vm2, %v1161_v46  ;;  %5275 = vmatmul.msk.f32.gmra.mxu1 %vm1012_vm0, %v1333_v45  ;;  %v1222_v47 = vpop.f32.mrf.mxu3  ;;  %v5329_v45 = vld [vmem:[%s9330_s4 + $0x1f8] sm:$0xff]  ;;  %v5364_v46 = vld [vmem:[%s9330_s4 + $0x2c8] sm:$0x3] }
 0x1d7   : > { %1690 = vmatpush.msrb.mxu3 %v6710_v11  ;;  %1800 = vmatpush.msra.mxu1 %v6710_v11  ;;  %v1775_v11 = vld [vmem:[#allocation2 + $0xd8] sm:$0xff] }
 0x1d8   : > { %5268 = vmatmul.msk.f32.gmra.mxu2 %vm1241_vm2, %v1222_v47  ;;  %v5328_v47 = vld [vmem:[%s9330_s4 + $0x1f0] sm:$0xff] }
 0x1d9   : > { %1691 = vmatpush.msrb.mxu3 %v6715_v12  ;;  %1801 = vmatpush.msra.mxu1 %v6715_v12  ;;  %v5282_v12 = vld [vmem:[%s9330_s4 + $0x110] sm:$0xff] }
 0x1da   : > { %1417 = vmatpush.msra.mxu2 %v5284_v9  ;;  %v5352_v9 = vld [vmem:[%s9330_s4 + $0x268] sm:$0xff] }
 0x1db   : > { %1692 = vmatpush.msrb.mxu3 %v6721_v13  ;;  %1802 = vmatpush.msra.mxu1 %v6721_v13  ;;  %v5316_v13 = vld [vmem:[%s9330_s4 + $0x1d8] sm:$0x3] }
 0x1dc   : > { %1418 = vmatpush.msra.mxu2 %v5283_v10  ;;  %5317 = vmatpush.msk.msrb.mxu0 %vm1254_vm1, %v5316_v13  ;;  %v5381_v10 = vld [vmem:[%s9330_s4 + $0x308] sm:$0xff] }
 0x1dd   : > { %1693 = vmatpush.msrb.mxu3 %v6728_v14  ;;  %1803 = vmatpush.msra.mxu1 %v6728_v14  ;;  %v5281_v14 = vld [vmem:[%s9330_s4 + $0x108] sm:$0xff] }
 0x1de   : > { %5276 = vmatmul.msk.f32.gmra.mxu1 %vm1012_vm0, %v1334_v48  ;;  %5298 = vmatmul.msk.f32.vlgmr.msra.gmra.mxu3 %vm1012_vm0, %v1442_v49  ;;  %v5363_v48 = vld [vmem:[%s9330_s4 + $0x2c0] sm:$0xff]  ;;  %v5327_v49 = vld [vmem:[%s9330_s4 + $0x1e8] sm:$0xff] }
 0x1df   : > { %1419 = vmatpush.msra.mxu2 %v5282_v12  ;;  %1520 = vmatpush.msrb.mxu0 %v5315_v15  ;;  %v5380_v12 = vld [vmem:[%s9330_s4 + $0x300] sm:$0xff]  ;;  %v5379_v15 = vld [vmem:[%s9330_s4 + $0x2f8] sm:$0xff] }
 0x1e1   : > { %1420 = vmatpush.msra.mxu2 %v5281_v14  ;;  %1521 = vmatpush.msrb.mxu0 %v5314_v18  ;;  %v5350_v14 = vld [vmem:[%s9330_s4 + $0x258] sm:$0xff]  ;;  %v5377_v18 = vld [vmem:[%s9330_s4 + $0x2e8] sm:$0xff] }
 0x1e3   : > { %1421 = vmatpush.msra.mxu2 %v5280_v16  ;;  %1522 = vmatpush.msrb.mxu0 %v5313_v20 }
 0x1e5   : > { %1422 = vmatpush.msra.mxu2 %v5279_v17  ;;  %1523 = vmatpush.msrb.mxu0 %v5312_v21  ;;  %v5378_v17 = vld [vmem:[%s9330_s4 + $0x2f0] sm:$0xff]  ;;  %v5375_v21 = vld [vmem:[%s9330_s4 + $0x2d8] sm:$0xff] }
 0x1e6   : > { %5277 = vmatmul.msk.f32.gmra.mxu1 %vm1012_vm0, %v1335_v50  ;;  %5299 = vmatmul.msk.f32.gmra.mxu3 %vm1012_vm0, %v1443_v51  ;;  %v5362_v50 = vld [vmem:[%s9330_s4 + $0x2b8] sm:$0xff] }
 0x1e7   : > { %1423 = vmatpush.msra.mxu2 %v5278_v19  ;;  %1524 = vmatpush.msrb.mxu0 %v5311_v23  ;;  %v5376_v19 = vld [vmem:[%s9330_s4 + $0x2e0] sm:$0xff]  ;;  %v5374_v23 = vld [vmem:[%s9330_s4 + $0x2d0] sm:$0xff] }
 0x1e9   : > { %5341 = vmatpush.msk.msrb.mxu2 %vm1254_vm1, %v5340_v22  ;;  %1525 = vmatpush.msrb.mxu0 %v5310_v24 }
 0x1eb   : > { %1630 = vmatpush.msrb.mxu2 %v5339_v25  ;;  %1526 = vmatpush.msrb.mxu0 %v5309_v26 }
 0x1ed   : > { %1631 = vmatpush.msrb.mxu2 %v5338_v27  ;;  %1527 = vmatpush.msrb.mxu0 %v5308_v28 }
 0x1ee   : > { %5300 = vmatmul.msk.f32.gmra.mxu3 %vm1012_vm0, %v1444_v52  ;;  %5322 = vmatmul.msk.f32.vlgmr.msrb.gmra.mxu1 %vm1012_vm0, %v1552_v53  ;;  %v5326_v52 = vld [vmem:[%s9330_s4 + $0x1e0] sm:$0xff]  ;;  %v5361_v53 = vld [vmem:[%s9330_s4 + $0x2b0] sm:$0xff] }
 0x1ef   : > { %1632 = vmatpush.msrb.mxu2 %v5337_v29  ;;  %1528 = vmatpush.msrb.mxu0 %v5307_v31 }
 0x1f1   : > { %1633 = vmatpush.msrb.mxu2 %v5336_v30  ;;  %1529 = vmatpush.msrb.mxu0 %v5306_v32 }
 0x1f3   : > { %1634 = vmatpush.msrb.mxu2 %v5335_v33  ;;  %1530 = vmatpush.msrb.mxu0 %v5305_v35 }
 0x1f5   : > { %1635 = vmatpush.msrb.mxu2 %v5334_v36  ;;  %1531 = vmatpush.msrb.mxu0 %v5304_v37 }
 0x1f6   : > { %5301 = vmatmul.msk.f32.gmra.mxu3 %vm1012_vm0, %v1445_v54  ;;  %5323 = vmatmul.msk.f32.gmra.mxu1 %vm1012_vm0, %v1553_v55  ;;  %v5360_v54 = vld [vmem:[%s9330_s4 + $0x2a8] sm:$0xff]  ;;  %v5388_v55 = vld [vmem:[%s9330_s4 + $0x340] sm:$0x3] }
 0x1f7   : > { %1636 = vmatpush.msrb.mxu2 %v5333_v38  ;;  %1532 = vmatpush.msrb.mxu0 %v5303_v40 }
 0x1f9   : > { %1637 = vmatpush.msrb.mxu2 %v5332_v39  ;;  %1533 = vmatpush.msrb.mxu0 %v5302_v41 }
 0x1fb   : > { %1638 = vmatpush.msrb.mxu2 %v5331_v42  ;;  %5365 = vmatpush.msk.msra.mxu0 %vm1254_vm1, %v5364_v46  ;;  %v1907_v46 = vld [vmem:[%s9331_s25 + $0x70] sm:$0xff] }
 0x1fd   : > { %1639 = vmatpush.msrb.mxu2 %v5330_v44  ;;  %1740 = vmatpush.msra.mxu0 %v5363_v48  ;;  %v1905_v48 = vld [vmem:[%s9331_s25 + $0x60] sm:$0xff] }
 0x1fe   : > { %5324 = vmatmul.msk.f32.gmra.mxu1 %vm1012_vm0, %v1554_v56  ;;  %5346 = vmatmul.msk.f32.vlgmr.msrb.gmra.mxu3 %vm1012_vm0, %v1662_v57  ;;  %v5359_v56 = vld [vmem:[%s9330_s4 + $0x2a0] sm:$0xff] }
 0x1ff   : > { %1640 = vmatpush.msrb.mxu2 %v5329_v45  ;;  %1741 = vmatpush.msra.mxu0 %v5362_v50  ;;  %v1908_v45 = vld [vmem:[%s9331_s25 + $0x78] sm:$0xff] }
 0x200   : > { %1909 = vmatpush.msra.mxu3 %v1908_v45 }
 0x201   : > { %1641 = vmatpush.msrb.mxu2 %v5328_v47  ;;  %1742 = vmatpush.msra.mxu0 %v5361_v53  ;;  %v1906_v47 = vld [vmem:[%s9331_s25 + $0x68] sm:$0xff] }
 0x202   : > { %1910 = vmatpush.msra.mxu3 %v1907_v46  ;;  %v1902_v53 = vld [vmem:[%s9331_s25 + $0x48] sm:$0xff] }
 0x203   : > { %1642 = vmatpush.msrb.mxu2 %v5327_v49  ;;  %1743 = vmatpush.msra.mxu0 %v5360_v54  ;;  %v1901_v54 = vld [vmem:[%s9331_s25 + $0x40] sm:$0xff] }
 0x204   : > { %1911 = vmatpush.msra.mxu3 %v1906_v47 }
 0x205   : > { %1643 = vmatpush.msrb.mxu2 %v5326_v52  ;;  %1744 = vmatpush.msra.mxu0 %v5359_v56  ;;  %v1903_v52 = vld [vmem:[%s9331_s25 + $0x50] sm:$0xff] }
 0x206   : > { %5325 = vmatmul.msk.f32.gmra.mxu1 %vm1012_vm0, %v1555_v58  ;;  %5347 = vmatmul.msk.f32.gmra.mxu3 %vm1012_vm0, %v1663_v59  ;;  %v5358_v58 = vld [vmem:[%s9330_s4 + $0x298] sm:$0xff] }
 0x207   : > { %v5387_v59 = vld [vmem:[%s9330_s4 + $0x338] sm:$0xff]  ;;  %1745 = vmatpush.msra.mxu0 %v5358_v58  ;;  %1912 = vmatpush.msra.mxu3 %v1905_v48 }
 0x208   : > { %v1900_v58 = vld [vmem:[%s9331_s25 + $0x38] sm:$0xff] }
 0x209   : > { %1746 = vmatpush.msra.mxu0 %v5357_v61  ;;  %v1897_v61 = vld [vmem:[%s9331_s25 + $0x20] sm:$0xff] }
 0x20b   : > { %1747 = vmatpush.msra.mxu0 %v5356_v63  ;;  %v1896_v63 = vld [vmem:[%s9331_s25 + $0x18] sm:$0xff] }
 0x20e   : > { %5348 = vmatmul.msk.f32.gmra.mxu3 %vm1012_vm0, %v1664_v0  ;;  %5370 = vmatmul.msk.f32.vlgmr.msra.gmra.mxu1 %vm1012_vm0, %v1772_v1  ;;  %v5385_v0 = vld [vmem:[%s9330_s4 + $0x328] sm:$0xff]  ;;  %v5355_v1 = vld [vmem:[%s9330_s4 + $0x280] sm:$0xff] }
 0x20f   : > { %1748 = vmatpush.msra.mxu0 %v5355_v1  ;;  %v1895_v1 = vld [vmem:[%s9331_s25 + $0x10] sm:$0xff] }
 0x216   : > { %5349 = vmatmul.msk.f32.gmra.mxu3 %vm1012_vm0, %v1665_v4  ;;  %5371 = vmatmul.msk.f32.gmra.mxu1 %vm1012_vm0, %v1773_v5  ;;  %v5354_v4 = vld [vmem:[%s9330_s4 + $0x278] sm:$0xff] }
 0x217   : > { %v5383_v5 = vld [vmem:[%s9330_s4 + $0x318] sm:$0xff]  ;;  %1749 = vmatpush.msra.mxu0 %v5354_v4  ;;  %v1893_v4 = vld [vmem:[%s9331_s25] sm:$0xff] }
 0x219   : > { %1750 = vmatpush.msra.mxu0 %v5353_v7 }
 0x21b   : > { %1751 = vmatpush.msra.mxu0 %v5352_v9 }
 0x21e   : > { %5372 = vmatmul.msk.f32.gmra.mxu1 %vm1012_vm0, %v1774_v6 }
 0x226   : > { %5373 = vmatmul.msk.f32.gmra.mxu1 %vm1012_vm0, %v1775_v11  ;;  %v5351_v11 = vld [vmem:[%s9330_s4 + $0x260] sm:$0xff] }
 0x227   : > { %1752 = vmatpush.msra.mxu0 %v5351_v11 }
 0x229   : > { %1753 = vmatpush.msra.mxu0 %v5350_v14 }
 0x23b   : > { %v6965_v34 = vpop.f32.mrf.mxu1 }
 0x242   : > { %v1275_v38 = vpop.f32.mrf.mxu2 }
 0x243   : > { %v6991_v43 = vpop.f32.mrf.mxu1  ;;  %v1320_v9 = vadd.f32 %v6965_v34, %v1275_v38 }
 0x24a   : > { %v1278_v39 = vpop.f32.mrf.mxu2 }
 0x24b   : > { %v1365_v51 = vpop.f32.mrf.mxu1  ;;  %v1323_v14 = vadd.f32 %v6991_v43, %v1278_v39 }
 0x24c   : > { %5294 = vmatmul.msk.f32.vlgmr.msra.gmra.mxu2 %vm1241_vm2, %v1365_v51  ;;  %v1904_v51 = vld [vmem:[%s9331_s25 + $0x58] sm:$0xff] }
 0x24d   : > { %5389 = vmatpush.msk.msra.mxu2 %vm1254_vm1, %v5388_v55  ;;  %1913 = vmatpush.msra.mxu3 %v1904_v51  ;;  %v2021_v51 = vld [vmem:[#allocation7 + $0x90] sm:$0xff] }
 0x24f   : > { %1850 = vmatpush.msra.mxu2 %v5387_v59  ;;  %1914 = vmatpush.msra.mxu3 %v1903_v52  ;;  %v1899_v59 = vld [vmem:[%s9331_s25 + $0x30] sm:$0xff]  ;;  %v2020_v52 = vld [vmem:[#allocation7 + $0x88] sm:$0xff] }
 0x251   : > { %v7032_v57 = vpop.f32.mrf.mxu3  ;;  %1851 = vmatpush.msra.mxu2 %v5386_v62  ;;  %1915 = vmatpush.msra.mxu3 %v1902_v53  ;;  %v2019_v53 = vld [vmem:[#allocation7 + $0x80] sm:$0xff] }
 0x253   : > { %v1368_v60 = vpop.f32.mrf.mxu1  ;;  %1852 = vmatpush.msra.mxu2 %v5385_v0  ;;  %v7124_v40 = vpop.f32.mrf.mxu2  ;;  %1916 = vmatpush.msra.mxu3 %v1901_v54  ;;  %v2018_v54 = vld [vmem:[#allocation7 + $0x78] sm:$0xff] }
 0x254   : > { %5295 = vmatmul.msk.f32.gmra.mxu2 %vm1241_vm2, %v1368_v60  ;;  %v1898_v60 = vld [vmem:[%s9331_s25 + $0x28] sm:$0xff] }
 0x255   : > { %1853 = vmatpush.msra.mxu2 %v5384_v2  ;;  %1917 = vmatpush.msra.mxu3 %v1900_v58  ;;  %v1894_v2 = vld [vmem:[%s9331_s25 + $0x8] sm:$0xff]  ;;  %v2015_v58 = vld [vmem:[#allocation7 + $0x60] sm:$0xff] }
 0x257   : > { %1854 = vmatpush.msra.mxu2 %v5383_v5  ;;  %1918 = vmatpush.msra.mxu3 %v1899_v59  ;;  %v2014_v59 = vld [vmem:[#allocation7 + $0x58] sm:$0xff] }
 0x259   : > { %v7059_v3 = vpop.f32.mrf.mxu3  ;;  %1855 = vmatpush.msra.mxu2 %v5382_v8  ;;  %1919 = vmatpush.msra.mxu3 %v1898_v60 }
 0x25b   : > { %v1371_v6 = vpop.f32.mrf.mxu1  ;;  %1856 = vmatpush.msra.mxu2 %v5381_v10  ;;  %v7126_v41 = vpop.f32.mrf.mxu2  ;;  %1920 = vmatpush.msra.mxu3 %v1897_v61 }
 0x25c   : > { %5296 = vmatmul.msk.f32.gmra.mxu2 %vm1241_vm2, %v1371_v6 }
 0x25d   : > { %1857 = vmatpush.msra.mxu2 %v5380_v12  ;;  %1921 = vmatpush.msra.mxu3 %v1896_v63 }
 0x25f   : > { %1858 = vmatpush.msra.mxu2 %v5379_v15  ;;  %1922 = vmatpush.msra.mxu3 %v1895_v1  ;;  %v1979_v1 = vld [vmem:[#allocation7 + $0x48] sm:$0xff] }
 0x261   : > { %v1475_v13 = vpop.f32.mrf.mxu3  ;;  %1859 = vmatpush.msra.mxu2 %v5378_v17  ;;  %1923 = vmatpush.msra.mxu3 %v1894_v2  ;;  %v1978_v2 = vld [vmem:[#allocation7 + $0x40] sm:$0xff] }
 0x262   : > { %5318 = vmatmul.msk.f32.vlgmr.msrb.gmra.mxu0 %vm1241_vm2, %v1475_v13 }
 0x263   : > { %v1374_v16 = vpop.f32.mrf.mxu1  ;;  %1860 = vmatpush.msra.mxu2 %v5377_v18  ;;  %1924 = vmatpush.msra.mxu3 %v1893_v4  ;;  %v1938_v4 = vld [vmem:[#allocation5] sm:$0xff] }
 0x264   : > { %5297 = vmatmul.msk.f32.gmra.mxu2 %vm1241_vm2, %v1374_v16  ;;  %v5863_v16 = vld [vmem:[%s9332_s27] ss:$0 sm:$0xff]  ;;  %s7314_s27 = scalar_lea.vmem [#allocation16], %s5229_s26 }
 0x265   : > { %1861 = vmatpush.msra.mxu2 %v5376_v19 }
 0x267   : > { %1862 = vmatpush.msra.mxu2 %v5375_v21 }
 0x269   : > { %v1478_v20 = vpop.f32.mrf.mxu3  ;;  %1863 = vmatpush.msra.mxu2 %v5374_v23 }
 0x26a   : > { %5319 = vmatmul.msk.f32.gmra.mxu0 %vm1241_vm2, %v1478_v20 }
 0x26b   : > { %v1585_v22 = vpop.f32.mrf.mxu1 }
 0x26c   : > { %5342 = vmatmul.msk.f32.vlgmr.msrb.gmra.mxu2 %vm1241_vm2, %v1585_v22 }
 0x271   : > { %v1481_v24 = vpop.f32.mrf.mxu3 }
 0x272   : > { %5320 = vmatmul.msk.f32.gmra.mxu0 %vm1241_vm2, %v1481_v24  ;;  %v1326_v24 = vadd.f32 %v7032_v57, %v7124_v40 }
 0x273   : > { %v1588_v25 = vpop.f32.mrf.mxu1 }
 0x274   : > { %5343 = vmatmul.msk.f32.gmra.mxu2 %vm1241_vm2, %v1588_v25 }
 0x279   : > { %v1484_v26 = vpop.f32.mrf.mxu3 }
 0x27a   : > { %5321 = vmatmul.msk.f32.gmra.mxu0 %vm1241_vm2, %v1484_v26 }
 0x27b   : > { %v1591_v27 = vpop.f32.mrf.mxu1 }
 0x27c   : > { %5344 = vmatmul.msk.f32.gmra.mxu2 %vm1241_vm2, %v1591_v27 }
 0x281   : > { %v1695_v28 = vpop.f32.mrf.mxu3 }
 0x282   : > { %5366 = vmatmul.msk.f32.vlgmr.msra.gmra.mxu0 %vm1241_vm2, %v1695_v28 }
 0x283   : > { %v1594_v29 = vpop.f32.mrf.mxu1 }
 0x284   : > { %5345 = vmatmul.msk.f32.gmra.mxu2 %vm1241_vm2, %v1594_v29 }
 0x289   : > { %v1698_v30 = vpop.f32.mrf.mxu3 }
 0x28a   : > { %5367 = vmatmul.msk.f32.gmra.mxu0 %vm1241_vm2, %v1698_v30 }
 0x28b   : > { %v1805_v31 = vpop.f32.mrf.mxu1 }
 0x28c   : > { %5390 = vmatmul.msk.f32.vlgmr.msra.gmra.mxu2 %vm1241_vm2, %v1805_v31 }
 0x291   : > { %v1701_v32 = vpop.f32.mrf.mxu3 }
 0x292   : > { %5368 = vmatmul.msk.f32.gmra.mxu0 %vm1241_vm2, %v1701_v32 }
 0x293   : > { %v1808_v33 = vpop.f32.mrf.mxu1 }
 0x294   : > { %5391 = vmatmul.msk.f32.gmra.mxu2 %vm1241_vm2, %v1808_v33  ;;  %v1329_v33 = vadd.f32 %v7059_v3, %v7126_v41  ;;  %v2024_v3 = vld [vmem:[#allocation7 + $0xa8] sm:$0xff]  ;;  %v2023_v41 = vld [vmem:[#allocation7 + $0xa0] sm:$0xff] }
 0x295   : > { %2037 = vmatpush.msrb.mxu1 %v2024_v3  ;;  %v2160_v3 = vld [vmem:[#allocation5 + $0x30] sm:$0xff] }
 0x297   : > { %2038 = vmatpush.msrb.mxu1 %v2023_v41  ;;  %v2161_v41 = vld [vmem:[#allocation5 + $0x38] sm:$0xff] }
 0x299   : > { %v1704_v35 = vpop.f32.mrf.mxu3 }
 0x29a   : > { %5369 = vmatmul.msk.f32.gmra.mxu0 %vm1241_vm2, %v1704_v35 }
 0x29b   : > { %v1811_v36 = vpop.f32.mrf.mxu1 }
 0x29c   : > { %5392 = vmatmul.msk.f32.gmra.mxu2 %vm1241_vm2, %v1811_v36 }
 0x2a3   : > { %v1814_v37 = vpop.f32.mrf.mxu1 }
 0x2a4   : > { %5393 = vmatmul.msk.f32.gmra.mxu2 %vm1241_vm2, %v1814_v37 }
 0x2cf   : > { %v1425_v42 = vpop.f32.mrf.mxu2 }
 0x2d0   : > { %v1437_v11 = vadd.f32 %v1425_v42, %v1320_v9  ;;  %v1939_v9 = vld [vmem:[#allocation5 + $0x8] sm:$0xff] }
 0x2d7   : > { %v1428_v44 = vpop.f32.mrf.mxu2 }
 0x2d8   : > { %v1438_v19 = vadd.f32 %v1428_v44, %v1323_v14  ;;  %v1971_v14 = vld [vmem:[#allocation7 + $0x8] sm:$0xff] }
 0x2df   : > { %v1431_v49 = vpop.f32.mrf.mxu2  ;;  %v1535_v50 = vpop.f32.mrf.mxu0 }
 0x2e0   : > { %v1547_v12 = vadd.f32 %v1535_v50, %v1437_v11  ;;  %v1439_v26 = vadd.f32 %v1431_v49, %v1326_v24  ;;  %v2022_v50 = vld [vmem:[#allocation7 + $0x98] sm:$0xff]  ;;  %v2195_v24 = vld [vmem:[#allocation7 + $0x120] sm:$0xff] }
 0x2e1   : > { %2039 = vmatpush.msrb.mxu1 %v2022_v50  ;;  %v2086_v11 = vld [vmem:[#allocation5 + $0x28] sm:$0xff]  ;;  %v2277_v50 = vld [vmem:[#allocation7 + $0x1b0] sm:$0xff] }
 0x2e3   : > { %2040 = vmatpush.msrb.mxu1 %v2021_v51  ;;  %v2276_v51 = vld [vmem:[#allocation7 + $0x1a8] sm:$0xff] }
 0x2e5   : > { %2041 = vmatpush.msrb.mxu1 %v2020_v52  ;;  %v2352_v52 = vld [vmem:[#allocation7 + $0x208] sm:$0xff] }
 0x2e7   : > { %v1434_v55 = vpop.f32.mrf.mxu2  ;;  %v1538_v56 = vpop.f32.mrf.mxu0  ;;  %2042 = vmatpush.msrb.mxu1 %v2019_v53  ;;  %v2275_v53 = vld [vmem:[#allocation7 + $0x1a0] sm:$0xff] }
 0x2e8   : > { %v1548_v34 = vadd.f32 %v1538_v56, %v1438_v19  ;;  %v1440_v36 = vadd.f32 %v1434_v55, %v1329_v33  ;;  %v2017_v55 = vld [vmem:[#allocation7 + $0x70] sm:$0xff]  ;;  %v2016_v56 = vld [vmem:[#allocation7 + $0x68] sm:$0xff] }
 0x2e9   : > { %2043 = vmatpush.msrb.mxu1 %v2018_v54  ;;  %v2200_v19 = vld [vmem:[#allocation7 + $0x148] sm:$0xff]  ;;  %v2121_v33 = vld [vmem:[#allocation7 + $0xd0] sm:$0xff]  ;;  %v2351_v54 = vld [vmem:[#allocation7 + $0x200] sm:$0xff] }
 0x2eb   : > { %2044 = vmatpush.msrb.mxu1 %v2017_v55 }
 0x2ed   : > { %2045 = vmatpush.msrb.mxu1 %v2016_v56  ;;  %v2274_v56 = vld [vmem:[#allocation7 + $0x198] sm:$0xff] }
 0x2ef   : > { %v1645_v62 = vpop.f32.mrf.mxu2  ;;  %v1541_v0 = vpop.f32.mrf.mxu0  ;;  %2046 = vmatpush.msrb.mxu1 %v2015_v58  ;;  %v2350_v58 = vld [vmem:[#allocation7 + $0x1f8] sm:$0xff] }
 0x2f0   : > { %v1657_v13 = vadd.f32 %v1645_v62, %v1547_v12  ;;  %v1549_v29 = vadd.f32 %v1541_v0, %v1439_v26  ;;  %v1980_v0 = vld [vmem:[#allocation7 + $0x50] sm:$0xff]  ;;  %v1973_v12 = vld [vmem:[#allocation7 + $0x18] sm:$0xff]  ;;  %v2127_v26 = vld [vmem:[#allocation7 + $0x100] sm:$0xff] }
 0x2f1   : > { %2047 = vmatpush.msrb.mxu1 %v2014_v59  ;;  %2066 = vmatpush.msrb.mxu2 %v1980_v0  ;;  %v2273_v59 = vld [vmem:[#allocation7 + $0x190] sm:$0xff]  ;;  %v2347_v0 = vld [vmem:[#allocation7 + $0x1e0] sm:$0xff] }
 0x2f3   : > { %2067 = vmatpush.msrb.mxu2 %v1979_v1 }
 0x2f5   : > { %2068 = vmatpush.msrb.mxu2 %v1978_v2  ;;  %v2270_v2 = vld [vmem:[#allocation7 + $0x178] sm:$0xff] }
 0x2f7   : > { %v1648_v5 = vpop.f32.mrf.mxu2  ;;  %v1544_v6 = vpop.f32.mrf.mxu0 }
 0x2f8   : > { %v1658_v22 = vadd.f32 %v1648_v5, %v1548_v34  ;;  %v1550_v38 = vadd.f32 %v1544_v6, %v1440_v36  ;;  %v2085_v5 = vld [vmem:[#allocation5 + $0x20] sm:$0xff]  ;;  %v1977_v6 = vld [vmem:[#allocation7 + $0x38] sm:$0xff]  ;;  %v2199_v34 = vld [vmem:[#allocation7 + $0x140] sm:$0xff] }
 0x2f9   : > { %2069 = vmatpush.msrb.mxu2 %v1977_v6  ;;  %v2118_v36 = vld [vmem:[#allocation7 + $0xb8] sm:$0xff]  ;;  %v2345_v6 = vld [vmem:[#allocation7 + $0x1d0] sm:$0xff] }
 0x2ff   : > { %v1651_v7 = vpop.f32.mrf.mxu2  ;;  %v1755_v8 = vpop.f32.mrf.mxu0 }
 0x300   : > { %v1767_v15 = vadd.f32 %v1755_v8, %v1657_v13  ;;  %v1659_v31 = vadd.f32 %v1651_v7, %v1549_v29  ;;  %v1976_v7 = vld [vmem:[#allocation7 + $0x30] sm:$0xff]  ;;  %v1975_v8 = vld [vmem:[#allocation7 + $0x28] sm:$0xff] }
 0x301   : > { %2070 = vmatpush.msrb.mxu2 %v1976_v7  ;;  %v1972_v13 = vld [vmem:[#allocation7 + $0x10] sm:$0xff]  ;;  %v2268_v7 = vld [vmem:[#allocation7 + $0x168] sm:$0xff] }
 0x302   : > { %v2125_v29 = vld [vmem:[#allocation7 + $0xf0] sm:$0xff] }
 0x303   : > { %2071 = vmatpush.msrb.mxu2 %v1975_v8  ;;  %v2344_v8 = vld [vmem:[#allocation7 + $0x1c8] sm:$0xff] }
 0x307   : > { %v1654_v10 = vpop.f32.mrf.mxu2  ;;  %v1758_v17 = vpop.f32.mrf.mxu0 }
 0x308   : > { %v1768_v25 = vadd.f32 %v1758_v17, %v1658_v22  ;;  %v1660_v42 = vadd.f32 %v1654_v10, %v1550_v38  ;;  %v1974_v10 = vld [vmem:[#allocation7 + $0x20] sm:$0xff]  ;;  %v2202_v17 = vld [vmem:[#allocation7 + $0x158] sm:$0xff]  ;;  %v2197_v22 = vld [vmem:[#allocation7 + $0x130] sm:$0xff] }
 0x309   : > { %2072 = vmatpush.msrb.mxu2 %v1974_v10  ;;  %v2235_v38 = vld [vmem:[#allocation5 + $0x40] sm:$0xff]  ;;  %v2343_v10 = vld [vmem:[#allocation7 + $0x1c0] sm:$0xff] }
 0x30b   : > { %2073 = vmatpush.msrb.mxu2 %v1973_v12  ;;  %v2342_v12 = vld [vmem:[#allocation7 + $0x1b8] sm:$0xff] }
 0x30d   : > { %2074 = vmatpush.msrb.mxu2 %v1972_v13 }
 0x30f   : > { %v1865_v18 = vpop.f32.mrf.mxu2  ;;  %v1761_v28 = vpop.f32.mrf.mxu0  ;;  %2075 = vmatpush.msrb.mxu2 %v1971_v14 }
 0x310   : > { %v1877_v20 = vadd.f32 %v1865_v18, %v1767_v15  ;;  %v1769_v57 = vadd.f32 %v1761_v28, %v1659_v31  ;;  %v1982_v15 = vld [vmem:[#allocation5 + $0x10] sm:$0xff]  ;;  %v2201_v18 = vld [vmem:[#allocation7 + $0x150] sm:$0xff]  ;;  %v2126_v28 = vld [vmem:[#allocation7 + $0xf8] sm:$0xff] }
 0x311   : > { %v2123_v31 = vld [vmem:[#allocation7 + $0xe0] sm:$0xff] }
 0x312   : > { %v1885_v21 = vadd.f32 %v5863_v16, %v1877_v20  ;;  %v1983_v20 = vld [vmem:[#allocation5 + $0x18] sm:$0xff] }
 0x314   : > { %v1889_v23 = vmax.f32 %v1885_v21, 0.0  ;;  %v2198_v21 = vld [vmem:[#allocation7 + $0x138] sm:$0xff] }
 0x316   : > { %4232 = vst [vmem:[%s7187_s10] sm:$0xff] %v1889_v23  ;;  %1925 = vmatmul.f32.vlgmr.msra.gmra.mxu3 %v1889_v23  ;;  %v2196_v23 = vld [vmem:[#allocation7 + $0x128] sm:$0xff] }
 0x317   : > { %v1868_v43 = vpop.f32.mrf.mxu2  ;;  %v1764_v40 = vpop.f32.mrf.mxu0 }
 0x318   : > { %v1878_v27 = vadd.f32 %v1868_v43, %v1768_v25  ;;  %v1770_v45 = vadd.f32 %v1764_v40, %v1660_v42  ;;  %v2194_v25 = vld [vmem:[#allocation7 + $0x118] sm:$0xff]  ;;  %v2193_v43 = vld [vmem:[#allocation7 + $0x110] sm:$0xff]  ;;  %v2310_v42 = vld [vmem:[#allocation5 + $0x50] sm:$0xff] }
 0x31a   : > { %v1886_v30 = vadd.f32 %v5863_v16, %v1878_v27  ;;  %v2192_v27 = vld [vmem:[#allocation7 + $0x108] sm:$0xff] }
 0x31c   : > { %v1890_v32 = vmax.f32 %v1886_v30, 0.0  ;;  %v2124_v30 = vld [vmem:[#allocation7 + $0xe8] sm:$0xff] }
 0x31e   : > { %1928 = vmatmul.f32.gmra.mxu3 %v1890_v32  ;;  %4233 = vst [vmem:[%s7187_s10 + $0x8] sm:$0xff] %v1890_v32  ;;  %v2122_v32 = vld [vmem:[#allocation7 + $0xd8] sm:$0xff] }
 0x31f   : > { %v1871_v35 = vpop.f32.mrf.mxu2 }
 0x320   : > { %v1879_v37 = vadd.f32 %v1871_v35, %v1769_v57  ;;  %v2120_v57 = vld [vmem:[#allocation7 + $0xc8] sm:$0xff]  ;;  %v2119_v35 = vld [vmem:[#allocation7 + $0xc0] sm:$0xff] }
 0x322   : > { %v1887_v39 = vadd.f32 %v5863_v16, %v1879_v37  ;;  %v2117_v37 = vld [vmem:[#allocation7 + $0xb0] sm:$0xff] }
 0x324   : > { %v1891_v44 = vmax.f32 %v1887_v39, 0.0  ;;  %v2236_v39 = vld [vmem:[#allocation5 + $0x48] sm:$0xff] }
 0x326   : > { %1931 = vmatmul.f32.gmra.mxu3 %v1891_v44  ;;  %4234 = vst [vmem:[%s7187_s10 + $0x10] sm:$0xff] %v1891_v44 }
 0x327   : > { %v1874_v46 = vpop.f32.mrf.mxu2 }
 0x328   : > { %v1880_v47 = vadd.f32 %v1874_v46, %v1770_v45  ;;  %v2311_v46 = vld [vmem:[#allocation5 + $0x58] sm:$0xff] }
 0x32a   : > { %v1888_v48 = vadd.f32 %v5863_v16, %v1880_v47  ;;  %v1970_v16 = vld [vmem:[#allocation7] sm:$0xff] }
 0x32b   : > { %2076 = vmatpush.msrb.mxu2 %v1970_v16  ;;  %v2427_v16 = vld [vmem:[#allocation7 + $0x260] sm:$0xff] }
 0x32c   : > { %v1892_v49 = vmax.f32 %v1888_v48, 0.0 }
 0x32d   : > { %2214 = vmatpush.msra.mxu2 %v2202_v17  ;;  %v2426_v17 = vld [vmem:[#allocation7 + $0x258] sm:$0xff] }
 0x32e   : > { %4235 = vst [vmem:[%s7187_s10 + $0x18] sm:$0xff] %v1892_v49  ;;  %1934 = vmatmul.f32.gmra.mxu3 %v1892_v49 }
 0x32f   : > { %2215 = vmatpush.msra.mxu2 %v2201_v18 }
 0x331   : > { %2216 = vmatpush.msra.mxu2 %v2200_v19 }
 0x333   : > { %2217 = vmatpush.msra.mxu2 %v2199_v34  ;;  %v2386_v34 = vld [vmem:[#allocation5 + $0x68] sm:$0xff] }
 0x335   : > { %2218 = vmatpush.msra.mxu2 %v2198_v21  ;;  %v2425_v21 = vld [vmem:[#allocation7 + $0x250] sm:$0xff] }
 0x337   : > { %2219 = vmatpush.msra.mxu2 %v2197_v22  ;;  %v2424_v22 = vld [vmem:[#allocation7 + $0x248] sm:$0xff] }
 0x339   : > { %2220 = vmatpush.msra.mxu2 %v2196_v23  ;;  %v2423_v23 = vld [vmem:[#allocation7 + $0x240] sm:$0xff] }
 0x33b   : > { %2221 = vmatpush.msra.mxu2 %v2195_v24  ;;  %v2422_v24 = vld [vmem:[#allocation7 + $0x238] sm:$0xff] }
 0x33d   : > { %2222 = vmatpush.msra.mxu2 %v2194_v25  ;;  %v2421_v25 = vld [vmem:[#allocation7 + $0x230] sm:$0xff] }
 0x33f   : > { %2223 = vmatpush.msra.mxu2 %v2193_v43  ;;  %v2420_v43 = vld [vmem:[#allocation7 + $0x228] sm:$0xff] }
 0x341   : > { %2224 = vmatpush.msra.mxu2 %v2192_v27  ;;  %v2418_v27 = vld [vmem:[#allocation7 + $0x218] sm:$0xff] }
 0x399   : > { %v7195_v60 = vpop.f32.mrf.mxu3 }
 0x3a1   : > { %v7197_v61 = vpop.f32.mrf.mxu3 }
 0x3a9   : > { %v7199_v62 = vpop.f32.mrf.mxu3 }
 0x3b1   : > { %v7201_v63 = vpop.f32.mrf.mxu3 }
 0x3b2   : > { %1959 = vmatpush.msrb.mxu0 %v7201_v63  ;;  %2105 = vmatpush.msrb.mxu3 %v7201_v63 }
 0x3b3   : > { %2180 = vmatpush.msra.mxu1 %v7201_v63 }
 0x3b4   : > { %1960 = vmatpush.msrb.mxu0 %v7199_v62  ;;  %2106 = vmatpush.msrb.mxu3 %v7199_v62 }
 0x3b5   : > { %2181 = vmatpush.msra.mxu1 %v7199_v62 }
 0x3b6   : > { %1961 = vmatpush.msrb.mxu0 %v7197_v61  ;;  %2107 = vmatpush.msrb.mxu3 %v7197_v61 }
 0x3b7   : > { %2182 = vmatpush.msra.mxu1 %v7197_v61 }
 0x3b8   : > { %1962 = vmatpush.msrb.mxu0 %v7195_v60  ;;  %2108 = vmatpush.msrb.mxu3 %v7195_v60 }
 0x3b9   : > { %2183 = vmatpush.msra.mxu1 %v7195_v60  ;;  %5394 = vmatmul.msk.f32.vlgmr.msrb.gmra.mxu0 %vm1940_vm3, %v1938_v4  ;;  %v2346_v4 = vld [vmem:[#allocation7 + $0x1d8] sm:$0xff] }
 0x3ba   : > { %2002 = vmatpush.msra.mxu0 %v7201_v63  ;;  %2255 = vmatpush.msra.mxu3 %v7201_v63 }
 0x3bb   : > { %5402 = vmatmul.msk.f32.vlgmr.msrb.gmra.mxu3 %vm1940_vm3, %v2085_v5  ;;  %v2269_v5 = vld [vmem:[#allocation7 + $0x170] sm:$0xff] }
 0x3bc   : > { %2003 = vmatpush.msra.mxu0 %v7199_v62  ;;  %2256 = vmatpush.msra.mxu3 %v7199_v62 }
 0x3be   : > { %2004 = vmatpush.msra.mxu0 %v7197_v61  ;;  %2257 = vmatpush.msra.mxu3 %v7197_v61 }
 0x3c0   : > { %2005 = vmatpush.msra.mxu0 %v7195_v60  ;;  %2258 = vmatpush.msra.mxu3 %v7195_v60 }
 0x3c1   : > { %5395 = vmatmul.msk.f32.gmra.mxu0 %vm1940_vm3, %v1939_v9  ;;  %v2267_v9 = vld [vmem:[#allocation7 + $0x160] sm:$0xff] }
 0x3c2   : > { %2330 = vmatpush.msrb.mxu3 %v7201_v63  ;;  %2139 = vmatpush.msrb.mxu0 %v2127_v26  ;;  %v2419_v26 = vld [vmem:[#allocation7 + $0x220] sm:$0xff] }
 0x3c3   : > { %5403 = vmatmul.msk.f32.gmra.mxu3 %vm1940_vm3, %v2086_v11 }
 0x3c4   : > { %2331 = vmatpush.msrb.mxu3 %v7199_v62  ;;  %2140 = vmatpush.msrb.mxu0 %v2126_v28 }
 0x3c6   : > { %2332 = vmatpush.msrb.mxu3 %v7197_v61  ;;  %2141 = vmatpush.msrb.mxu0 %v2125_v29  ;;  %v2417_v29 = vld [vmem:[#allocation7 + $0x210] sm:$0xff] }
 0x3c8   : > { %2333 = vmatpush.msrb.mxu3 %v7195_v60  ;;  %2142 = vmatpush.msrb.mxu0 %v2124_v30 }
 0x3c9   : > { %5396 = vmatmul.msk.f32.vlgmr.msra.gmra.mxu0 %vm1940_vm3, %v1982_v15 }
 0x3ca   : > { %2143 = vmatpush.msrb.mxu0 %v2123_v31  ;;  %v2482_v31 = vld [vmem:[%s9333_s30 + $0x78] sm:$0xff]  ;;  %s5723_s30 = sshll.u32 %s6403_s3, 5 }
 0x3cb   : > { %5410 = vmatmul.msk.f32.vlgmr.msra.gmra.mxu3 %vm1940_vm3, %v2235_v38  ;;  %v2478_v38 = vld [vmem:[%s9334_s7 + $0x58] sm:$0xff]  ;;  %s4959_s6 = scalar_lea.hbm %s9341_s11, %s5723_s30 }
 0x3cc   : > { %2144 = vmatpush.msrb.mxu0 %v2122_v32  ;;  %2439 = vmatpush.msra.mxu3 %v2427_v16  ;;  %v2481_v32 = vld [vmem:[%s9334_s7 + $0x70] sm:$0xff]  ;;  %s4962_s4 = sshll.u32 %s4959_s6, 4  ;;  %s4963_s4 = int_to_ptr.hbm [resolvable:$true] %s4962_s4 }
 0x3ce   : > { %2145 = vmatpush.msrb.mxu0 %v2121_v33  ;;  %2440 = vmatpush.msra.mxu3 %v2426_v17 }
 0x3d0   : > { %2146 = vmatpush.msrb.mxu0 %v2120_v57  ;;  %2441 = vmatpush.msra.mxu3 %v2425_v21  ;;  %v2480_v57 = vld [vmem:[%s9334_s7 + $0x68] sm:$0xff] }
 0x3d1   : > { %5397 = vmatmul.msk.f32.gmra.mxu0 %vm1940_vm3, %v1983_v20  ;;  %v2385_v20 = vld [vmem:[#allocation5 + $0x60] sm:$0xff] }
 0x3d2   : > { %2147 = vmatpush.msrb.mxu0 %v2119_v35  ;;  %2442 = vmatpush.msra.mxu3 %v2424_v22  ;;  %v2535_v22 = vld [vmem:[#allocation10 + $0x20] sm:$0xff] }
 0x3d3   : > { %5411 = vmatmul.msk.f32.gmra.mxu3 %vm1940_vm3, %v2236_v39 }
 0x3d4   : > { %2148 = vmatpush.msrb.mxu0 %v2118_v36  ;;  %2443 = vmatpush.msra.mxu3 %v2423_v23  ;;  %v2479_v36 = vld [vmem:[%s9334_s7 + $0x60] sm:$0xff]  ;;  %v2534_v23 = vld [vmem:[#allocation10 + $0x18] sm:$0xff] }
 0x3d6   : > { %2149 = vmatpush.msrb.mxu0 %v2117_v37  ;;  %2444 = vmatpush.msra.mxu3 %v2422_v24  ;;  %v2533_v24 = vld [vmem:[#allocation10 + $0x10] sm:$0xff] }
 0x3d8   : > { %2364 = vmatpush.msra.mxu0 %v2352_v52  ;;  %2445 = vmatpush.msra.mxu3 %v2421_v25  ;;  %v2469_v52 = vld [vmem:[%s9334_s7 + $0x10] sm:$0xff]  ;;  %v2532_v25 = vld [vmem:[#allocation10 + $0x8] sm:$0xff] }
 0x3da   : > { %2365 = vmatpush.msra.mxu0 %v2351_v54  ;;  %2446 = vmatpush.msra.mxu3 %v2420_v43  ;;  %v2467_v54 = vld [vmem:[%s9334_s7] sm:$0xff]  ;;  %v2531_v43 = vld [vmem:[#allocation10] sm:$0xff] }
 0x3db   : > { %5414 = vmatmul.msk.f32.vlgmr.msrb.gmra.mxu3 %vm1940_vm3, %v2310_v42  ;;  %v2477_v42 = vld [vmem:[%s9334_s7 + $0x50] sm:$0xff] }
 0x3dc   : > { %2366 = vmatpush.msra.mxu0 %v2350_v58  ;;  %2447 = vmatpush.msra.mxu3 %v2419_v26  ;;  %v2542_v58 = vld [vmem:[#allocation10 + $0x58] sm:$0xff] }
 0x3de   : > { %2448 = vmatpush.msra.mxu3 %v2418_v27 }
 0x3e0   : > { %2449 = vmatpush.msra.mxu3 %v2417_v29  ;;  %v2697_v29 = vld [vmem:[#allocation8 + $0x18] sm:$0xff] }
 0x3e3   : > { %5415 = vmatmul.msk.f32.gmra.mxu3 %vm1940_vm3, %v2311_v46  ;;  %v2474_v46 = vld [vmem:[%s9334_s7 + $0x38] sm:$0xff] }
 0x436   : > { %v1964_v40 = vpop.f32.mrf.mxu0 }
 0x437   : > { %5400 = vmatmul.msk.f32.vlgmr.msrb.gmra.mxu2 %vm2025_vm4, %v1964_v40 }
 0x438   : > { %2405 = vmatpush.msrb.mxu2 %v7201_v63  ;;  %v2271_v63 = vld [vmem:[#allocation7 + $0x180] sm:$0xff] }
 0x43a   : > { %2406 = vmatpush.msrb.mxu2 %v7199_v62  ;;  %v2348_v62 = vld [vmem:[#allocation7 + $0x1e8] sm:$0xff] }
 0x43c   : > { %2407 = vmatpush.msrb.mxu2 %v7197_v61  ;;  %v2272_v61 = vld [vmem:[#allocation7 + $0x188] sm:$0xff] }
 0x43e   : > { %2408 = vmatpush.msrb.mxu2 %v7195_v60  ;;  %v1967_v44 = vpop.f32.mrf.mxu0  ;;  %v2110_v45 = vpop.f32.mrf.mxu3  ;;  %v2349_v60 = vld [vmem:[#allocation7 + $0x1f0] sm:$0xff] }
 0x43f   : > { %5401 = vmatmul.msk.f32.gmra.mxu2 %vm2025_vm4, %v1967_v44  ;;  %5404 = vmatmul.msk.f32.vlgmr.msrb.gmra.mxu0 %vm2025_vm4, %v2110_v45  ;;  %v2476_v44 = vld [vmem:[%s9334_s7 + $0x48] sm:$0xff]  ;;  %v2475_v45 = vld [vmem:[%s9334_s7 + $0x40] sm:$0xff] }
 0x440   : > { %2367 = vmatpush.msra.mxu0 %v2349_v60  ;;  %v2541_v60 = vld [vmem:[#allocation10 + $0x50] sm:$0xff] }
 0x442   : > { %2368 = vmatpush.msra.mxu0 %v2348_v62 }
 0x444   : > { %2369 = vmatpush.msra.mxu0 %v2347_v0 }
 0x446   : > { %v2007_v47 = vpop.f32.mrf.mxu0  ;;  %v2113_v48 = vpop.f32.mrf.mxu3  ;;  %2370 = vmatpush.msra.mxu0 %v2346_v4 }
 0x447   : > { %5398 = vmatmul.msk.f32.vlgmr.msrb.gmra.mxu1 %vm2025_vm4, %v2007_v47  ;;  %5405 = vmatmul.msk.f32.gmra.mxu0 %vm2025_vm4, %v2113_v48  ;;  %v2473_v48 = vld [vmem:[%s9334_s7 + $0x30] sm:$0xff] }
 0x448   : > { %2289 = vmatpush.msrb.mxu1 %v2277_v50  ;;  %2371 = vmatpush.msra.mxu0 %v2345_v6 }
 0x44a   : > { %2290 = vmatpush.msrb.mxu1 %v2276_v51  ;;  %2372 = vmatpush.msra.mxu0 %v2344_v8  ;;  %v2470_v51 = vld [vmem:[%s9334_s7 + $0x18] sm:$0xff] }
 0x44c   : > { %2291 = vmatpush.msrb.mxu1 %v2275_v53  ;;  %2373 = vmatpush.msra.mxu0 %v2343_v10  ;;  %v2468_v53 = vld [vmem:[%s9334_s7 + $0x8] sm:$0xff]  ;;  %v5864_v10 = vld [vmem:[%s9335_s29] ss:$0 sm:$0xff]  ;;  %s9338_s29 = sld [smem:[#allocation48_spill]] }
 0x44e   : > { %v2010_v49 = vpop.f32.mrf.mxu0  ;;  %v2260_v55 = vpop.f32.mrf.mxu3  ;;  %2292 = vmatpush.msrb.mxu1 %v2274_v56  ;;  %2374 = vmatpush.msra.mxu0 %v2342_v12  ;;  %v2543_v56 = vld [vmem:[#allocation10 + $0x60] sm:$0xff] }
 0x44f   : > { %5399 = vmatmul.msk.f32.gmra.mxu1 %vm2025_vm4, %v2010_v49  ;;  %v2472_v49 = vld [vmem:[%s9334_s7 + $0x28] sm:$0xff] }
 0x450   : > { %2293 = vmatpush.msrb.mxu1 %v2273_v59 }
 0x452   : > { %2294 = vmatpush.msrb.mxu1 %v2272_v61  ;;  %v2540_v61 = vld [vmem:[#allocation10 + $0x48] sm:$0xff] }
 0x454   : > { %2295 = vmatpush.msrb.mxu1 %v2271_v63  ;;  %v2539_v63 = vld [vmem:[#allocation10 + $0x40] sm:$0xff] }
 0x456   : > { %v2263_v1 = vpop.f32.mrf.mxu3  ;;  %2296 = vmatpush.msrb.mxu1 %v2270_v2 }
 0x457   : > { %5406 = vmatmul.msk.f32.vlgmr.msra.gmra.mxu1 %vm1940_vm3, %v2160_v3  ;;  %v2471_v3 = vld [vmem:[%s9334_s7 + $0x20] sm:$0xff]  ;;  %s9153_s7 = scalar_lea.sflag [#allocation15], %s4922_s28 }
 0x458   : > { %2297 = vmatpush.msrb.mxu1 %v2269_v5  ;;  %v2537_v5 = vld [vmem:[#allocation10 + $0x30] sm:$0xff] }
 0x45a   : > { %2298 = vmatpush.msrb.mxu1 %v2268_v7  ;;  %v2536_v7 = vld [vmem:[#allocation10 + $0x28] sm:$0xff] }
 0x45c   : > { %2299 = vmatpush.msrb.mxu1 %v2267_v9 }
 0x45e   : > { %v2335_v11 = vpop.f32.mrf.mxu3  ;;  %2483 = vmatpush.msra.mxu1 %v2482_v31  ;;  %v2584_v31 = vld [vmem:[#allocation10 + $0xd8] sm:$0xff] }
 0x45f   : > { %5407 = vmatmul.msk.f32.gmra.mxu1 %vm1940_vm3, %v2161_v41  ;;  %5416 = vmatmul.msk.f32.vlgmr.msra.gmra.mxu0 %vm2025_vm4, %v2335_v11 }
 0x460   : > { %2484 = vmatpush.msra.mxu1 %v2481_v32  ;;  %v2583_v32 = vld [vmem:[#allocation10 + $0xd0] sm:$0xff] }
 0x462   : > { %2485 = vmatpush.msra.mxu1 %v2480_v57  ;;  %v2582_v57 = vld [vmem:[#allocation10 + $0xc8] sm:$0xff] }
 0x464   : > { %2486 = vmatpush.msra.mxu1 %v2479_v36  ;;  %v2580_v36 = vld [vmem:[#allocation10 + $0xb8] sm:$0xff] }
 0x466   : > { %v2338_v14 = vpop.f32.mrf.mxu3  ;;  %2487 = vmatpush.msra.mxu1 %v2478_v38  ;;  %v2578_v38 = vld [vmem:[#allocation10 + $0xa8] sm:$0xff] }
 0x467   : > { %5412 = vmatmul.msk.f32.vlgmr.msrb.gmra.mxu1 %vm2025_vm4, %v2260_v55  ;;  %5417 = vmatmul.msk.f32.gmra.mxu0 %vm2025_vm4, %v2338_v14  ;;  %v2544_v55 = vld [vmem:[#allocation10 + $0x68] sm:$0xff] }
 0x468   : > { %2488 = vmatpush.msra.mxu1 %v2477_v42  ;;  %2614 = vmatpush.msrb.mxu3 %v2544_v55  ;;  %v2575_v42 = vld [vmem:[#allocation10 + $0x90] sm:$0xff]  ;;  %v2667_v55 = vld [vmem:[#allocation10 + $0x128] sm:$0xff] }
 0x46a   : > { %2489 = vmatpush.msra.mxu1 %v2476_v44  ;;  %2615 = vmatpush.msrb.mxu3 %v2543_v56  ;;  %v2574_v44 = vld [vmem:[#allocation10 + $0x88] sm:$0xff]  ;;  %v2730_v56 = vld [vmem:[#allocation10 + $0x190] sm:$0xff] }
 0x46c   : > { %2490 = vmatpush.msra.mxu1 %v2475_v45  ;;  %2616 = vmatpush.msrb.mxu3 %v2542_v58  ;;  %v2573_v45 = vld [vmem:[#allocation10 + $0x80] sm:$0xff] }
 0x46d   : > { %v2666_v58 = vld [vmem:[#allocation10 + $0x120] sm:$0xff] }
 0x46e   : > { %2491 = vmatpush.msra.mxu1 %v2474_v46  ;;  %2617 = vmatpush.msrb.mxu3 %v2541_v60  ;;  %v2572_v46 = vld [vmem:[#allocation10 + $0x78] sm:$0xff] }
 0x46f   : > { %5413 = vmatmul.msk.f32.gmra.mxu1 %vm2025_vm4, %v2263_v1  ;;  %v2538_v1 = vld [vmem:[#allocation10 + $0x38] sm:$0xff] }
 0x470   : > { %2492 = vmatpush.msra.mxu1 %v2473_v48  ;;  %2618 = vmatpush.msrb.mxu3 %v2540_v61  ;;  %v2735_v48 = vld [vmem:[#allocation10 + $0x1b8] sm:$0xff]  ;;  %v2728_v61 = vld [vmem:[#allocation10 + $0x180] sm:$0xff] }
 0x471   : > { %v2665_v60 = vld [vmem:[#allocation10 + $0x118] sm:$0xff] }
 0x472   : > { %2493 = vmatpush.msra.mxu1 %v2472_v49  ;;  %2619 = vmatpush.msrb.mxu3 %v2539_v63  ;;  %v2734_v49 = vld [vmem:[#allocation10 + $0x1b0] sm:$0xff]  ;;  %v2727_v63 = vld [vmem:[#allocation10 + $0x178] sm:$0xff] }
 0x474   : > { %2494 = vmatpush.msra.mxu1 %v2471_v3  ;;  %2620 = vmatpush.msrb.mxu3 %v2538_v1  ;;  %v2671_v3 = vld [vmem:[#allocation10 + $0x148] sm:$0xff]  ;;  %v2726_v1 = vld [vmem:[#allocation10 + $0x170] sm:$0xff] }
 0x476   : > { %2495 = vmatpush.msra.mxu1 %v2470_v51  ;;  %2621 = vmatpush.msrb.mxu3 %v2537_v5  ;;  %v2669_v51 = vld [vmem:[#allocation10 + $0x138] sm:$0xff] }
 0x477   : > { %v2661_v5 = vld [vmem:[#allocation10 + $0xf8] sm:$0xff] }
 0x478   : > { %2496 = vmatpush.msra.mxu1 %v2469_v52  ;;  %2622 = vmatpush.msrb.mxu3 %v2536_v7  ;;  %v2732_v52 = vld [vmem:[#allocation10 + $0x1a0] sm:$0xff]  ;;  %v2660_v7 = vld [vmem:[#allocation10 + $0xf0] sm:$0xff] }
 0x47a   : > { %2497 = vmatpush.msra.mxu1 %v2468_v53  ;;  %2623 = vmatpush.msrb.mxu3 %v2535_v22  ;;  %v2668_v53 = vld [vmem:[#allocation10 + $0x130] sm:$0xff]  ;;  %v2859_v22 = vld [vmem:[#allocation10 + $0x278] sm:$0xff] }
 0x47c   : > { %2498 = vmatpush.msra.mxu1 %v2467_v54  ;;  %2624 = vmatpush.msrb.mxu3 %v2534_v23  ;;  %v2731_v54 = vld [vmem:[#allocation10 + $0x198] sm:$0xff]  ;;  %v2794_v23 = vld [vmem:[#allocation10 + $0x200] sm:$0xff] }
 0x47e   : > { %2625 = vmatpush.msrb.mxu3 %v2533_v24  ;;  %v2793_v24 = vld [vmem:[#allocation10 + $0x1f8] sm:$0xff] }
 0x480   : > { %2626 = vmatpush.msrb.mxu3 %v2532_v25  ;;  %v2792_v25 = vld [vmem:[#allocation10 + $0x1f0] sm:$0xff] }
 0x482   : > { %2627 = vmatpush.msrb.mxu3 %v2531_v43  ;;  %v2761_v43 = vld [vmem:[#allocation8 + $0x20] sm:$0xff] }
 0x4ba   : > { %v2078_v28 = vpop.f32.mrf.mxu2 }
 0x4bc   : > { %v2151_v35 = vpop.f32.mrf.mxu0 }
 0x4c2   : > { %v2081_v30 = vpop.f32.mrf.mxu2 }
 0x4c4   : > { %v2049_v13 = vpop.f32.mrf.mxu1  ;;  %v2154_v59 = vpop.f32.mrf.mxu0 }
 0x4c5   : > { %v2079_v33 = vadd.f32 %v2078_v28, %v2049_v13  ;;  %v2506_v28 = vld [vmem:[#allocation8] sm:$0xff] }
 0x4c7   : > { %v2157_v37 = vadd.f32 %v2151_v35, %v2079_v33  ;;  %v2546_v33 = vld [vmem:[#allocation8 + $0x8] sm:$0xff]  ;;  %v2581_v35 = vld [vmem:[#allocation10 + $0xc0] sm:$0xff] }
 0x4cc   : > { %v7253_v15 = vpop.f32.mrf.mxu1 }
 0x4cd   : > { %v2082_v0 = vadd.f32 %v2081_v30, %v7253_v15  ;;  %v2633_v30 = vld [vmem:[#allocation8 + $0x10] sm:$0xff] }
 0x4cf   : > { %v2158_v6 = vadd.f32 %v2154_v59, %v2082_v0  ;;  %v2729_v59 = vld [vmem:[#allocation10 + $0x188] sm:$0xff] }
 0x4d0   : > { %v2663_v0 = vld [vmem:[#allocation10 + $0x108] sm:$0xff] }
 0x4d4   : > { %v2185_v18 = vpop.f32.mrf.mxu1 }
 0x4d5   : > { %5408 = vmatmul.msk.f32.vlgmr.msra.gmra.mxu2 %vm2025_vm4, %v2185_v18 }
 0x4dc   : > { %v2188_v19 = vpop.f32.mrf.mxu1  ;;  %v2376_v2 = vpop.f32.mrf.mxu0 }
 0x4dd   : > { %5409 = vmatmul.msk.f32.gmra.mxu2 %vm2025_vm4, %v2188_v19 }
 0x4e4   : > { %v2301_v62 = vpop.f32.mrf.mxu1  ;;  %v2379_v16 = vpop.f32.mrf.mxu0 }
 0x4e5   : > { %5418 = vmatmul.msk.f32.vlgmr.msrb.gmra.mxu2 %vm1940_vm3, %v2385_v20 }
 0x4ec   : > { %v2304_v11 = vpop.f32.mrf.mxu1 }
 0x4ed   : > { %5419 = vmatmul.msk.f32.gmra.mxu2 %vm1940_vm3, %v2386_v34 }
 0x558   : > { %v2226_v39 = vpop.f32.mrf.mxu2 }
 0x559   : > { %v2232_v40 = vadd.f32 %v2226_v39, %v2157_v37  ;;  %v2579_v37 = vld [vmem:[#allocation10 + $0xb0] sm:$0xff]  ;;  %v2577_v39 = vld [vmem:[#allocation10 + $0xa0] sm:$0xff] }
 0x55b   : > { %v2307_v4 = vadd.f32 %v2301_v62, %v2232_v40  ;;  %v2576_v40 = vld [vmem:[#allocation10 + $0x98] sm:$0xff]  ;;  %v2664_v62 = vld [vmem:[#allocation10 + $0x110] sm:$0xff] }
 0x55d   : > { %v2382_v8 = vadd.f32 %v2376_v2, %v2307_v4  ;;  %v2662_v2 = vld [vmem:[#allocation10 + $0x100] sm:$0xff]  ;;  %v2725_v4 = vld [vmem:[#allocation10 + $0x168] sm:$0xff] }
 0x560   : > { %v2229_v47 = vpop.f32.mrf.mxu2 }
 0x561   : > { %v2233_v9 = vadd.f32 %v2229_v47, %v2158_v6  ;;  %v2571_v47 = vld [vmem:[#allocation10 + $0x70] sm:$0xff]  ;;  %v2724_v6 = vld [vmem:[#allocation10 + $0x160] sm:$0xff] }
 0x563   : > { %v2308_v14 = vadd.f32 %v2304_v11, %v2233_v9  ;;  %v2659_v9 = vld [vmem:[#allocation10 + $0xe8] sm:$0xff]  ;;  %v2658_v11 = vld [vmem:[#allocation10 + $0xe0] sm:$0xff] }
 0x565   : > { %v2383_v18 = vadd.f32 %v2379_v16, %v2308_v14  ;;  %v2863_v14 = vld [vmem:[#allocation10 + $0x298] sm:$0xff] }
 0x566   : > { %v2797_v16 = vld [vmem:[#allocation10 + $0x218] sm:$0xff] }
 0x568   : > { %v2410_v41 = vpop.f32.mrf.mxu2 }
 0x569   : > { %5420 = vmatmul.msk.f32.vlgmr.msra.gmra.mxu3 %vm2025_vm4, %v2410_v41  ;;  %v2670_v41 = vld [vmem:[#allocation10 + $0x140] sm:$0xff] }
 0x570   : > { %v2413_v50 = vpop.f32.mrf.mxu2 }
 0x571   : > { %5421 = vmatmul.msk.f32.gmra.mxu3 %vm2025_vm4, %v2413_v50  ;;  %v2733_v50 = vld [vmem:[#allocation10 + $0x1a8] sm:$0xff] }
 0x5ec   : > { %v2451_v12 = vpop.f32.mrf.mxu3 }
 0x5ed   : > { %v2457_v13 = vadd.f32 %v2451_v12, %v2382_v8  ;;  %v2723_v8 = vld [vmem:[#allocation10 + $0x158] sm:$0xff]  ;;  %v2799_v12 = vld [vmem:[#allocation10 + $0x228] sm:$0xff] }
 0x5ef   : > { %v2463_v15 = vadd.f32 %v5864_v10, %v2457_v13  ;;  %v2798_v13 = vld [vmem:[#allocation10 + $0x220] sm:$0xff] }
 0x5f1   : > { %v2465_v17 = vmax.f32 %v2463_v15, 0.0 }
 0x5f3   : > { %4236 = vst [vmem:[%s7314_s27] sm:$0xff] %v2465_v17  ;;  %2499 = vmatmul.f32.vlgmr.msra.gmra.mxu1 %v2465_v17  ;;  %v2862_v17 = vld [vmem:[#allocation10 + $0x290] sm:$0xff] }
 0x5f4   : > { %v2454_v19 = vpop.f32.mrf.mxu3 }
 0x5f5   : > { %v2458_v20 = vadd.f32 %v2454_v19, %v2383_v18  ;;  %v2861_v18 = vld [vmem:[#allocation10 + $0x288] sm:$0xff]  ;;  %v2796_v19 = vld [vmem:[#allocation10 + $0x210] sm:$0xff] }
 0x5f7   : > { %v2464_v34 = vadd.f32 %v5864_v10, %v2458_v20  ;;  %v2722_v10 = vld [vmem:[#allocation10 + $0x150] sm:$0xff]  ;;  %v2860_v20 = vld [vmem:[#allocation10 + $0x280] sm:$0xff] }
 0x5f9   : > { %v2466_v21 = vmax.f32 %v2464_v34, 0.0  ;;  %v2795_v34 = vld [vmem:[#allocation10 + $0x208] sm:$0xff] }
 0x5fb   : > { %4237 = vst [vmem:[%s7314_s27 + $0x8] sm:$0xff] %v2466_v21  ;;  %2502 = vmatmul.f32.gmra.mxu1 %v2466_v21 }
 0x670   : > { %v7318_v26 = vpop.f32.mrf.mxu1 }
 0x678   : > { %v7320_v27 = vpop.f32.mrf.mxu1 }
 0x679   : > { %2525 = vmatpush.msra.mxu2 %v7320_v27  ;;  %2651 = vmatpush.msrb.mxu0 %v7320_v27 }
 0x67a   : > { %2715 = vmatpush.msrb.mxu1 %v7320_v27  ;;  %2779 = vmatpush.msra.mxu3 %v7320_v27 }
 0x67b   : > { %2526 = vmatpush.msra.mxu2 %v7318_v26  ;;  %2652 = vmatpush.msrb.mxu0 %v7318_v26 }
 0x67c   : > { %2716 = vmatpush.msrb.mxu1 %v7318_v26  ;;  %2780 = vmatpush.msra.mxu3 %v7318_v26 }
 0x67d   : > { %5422 = vmatmul.msk.f32.vlgmr.msra.gmra.mxu2 %vm2507_vm5, %v2506_v28  ;;  %5428 = vmatmul.msk.f32.vlgmr.msrb.gmra.mxu1 %vm2507_vm5, %v2697_v29  ;;  %v2791_v28 = vld [vmem:[#allocation10 + $0x1e8] sm:$0xff] }
 0x67e   : > { %2564 = vmatpush.msrb.mxu2 %v7320_v27  ;;  %5426 = vmatmul.msk.f32.vlgmr.msrb.gmra.mxu0 %vm2507_vm5, %v2633_v30  ;;  %v2825_v30 = vld [vmem:[#allocation8 + $0x28] sm:$0xff] }
 0x67f   : > { %2677 = vmatpush.msra.mxu0 %v2671_v3  ;;  %2805 = vmatpush.msra.mxu1 %v2799_v12  ;;  %v2921_v3 = vld [vmem:[#allocation10 + $0x2d8] sm:$0xff] }
 0x680   : > { %2565 = vmatpush.msrb.mxu2 %v7318_v26  ;;  %v2979_v12 = vld [vmem:[%s9336_s14 + $0xa8] sm:$0xff] }
 0x681   : > { %2678 = vmatpush.msra.mxu0 %v2670_v41  ;;  %2806 = vmatpush.msra.mxu1 %v2798_v13  ;;  %v2852_v41 = vld [vmem:[#allocation10 + $0x240] sm:$0xff] }
 0x682   : > { %2591 = vmatpush.msra.mxu2 %v2584_v31  ;;  %v2976_v13 = vld [vmem:[%s9336_s14 + $0x90] sm:$0xff] }
 0x683   : > { %2679 = vmatpush.msra.mxu0 %v2669_v51  ;;  %2807 = vmatpush.msra.mxu1 %v2797_v16  ;;  %v2851_v51 = vld [vmem:[#allocation10 + $0x238] sm:$0xff] }
 0x684   : > { %2592 = vmatpush.msra.mxu2 %v2583_v32  ;;  %v2927_v32 = vld [vmem:[#allocation10 + $0x308] sm:$0xff]  ;;  %v2975_v16 = vld [vmem:[%s9336_s14 + $0x88] sm:$0xff] }
 0x685   : > { %5423 = vmatmul.msk.f32.vlgmr.msrb.gmra.mxu2 %vm2507_vm5, %v2546_v33  ;;  %2680 = vmatpush.msra.mxu0 %v2668_v53  ;;  %v2889_v33 = vld [vmem:[#allocation8 + $0x30] sm:$0xff]  ;;  %v2850_v53 = vld [vmem:[#allocation10 + $0x230] sm:$0xff] }
 0x686   : > { %2593 = vmatpush.msra.mxu2 %v2582_v57  ;;  %2808 = vmatpush.msra.mxu1 %v2796_v19  ;;  %v2790_v57 = vld [vmem:[#allocation10 + $0x1e0] sm:$0xff]  ;;  %v2970_v19 = vld [vmem:[%s9336_s14 + $0x60] sm:$0xff] }
 0x687   : > { %2681 = vmatpush.msra.mxu0 %v2667_v55  ;;  %v2917_v55 = vld [vmem:[#allocation10 + $0x2b8] sm:$0xff] }
 0x688   : > { %2594 = vmatpush.msra.mxu2 %v2581_v35  ;;  %2809 = vmatpush.msra.mxu1 %v2795_v34  ;;  %v2858_v35 = vld [vmem:[#allocation10 + $0x270] sm:$0xff]  ;;  %v2968_v34 = vld [vmem:[%s9336_s14 + $0x50] sm:$0xff] }
 0x689   : > { %2682 = vmatpush.msra.mxu0 %v2666_v58  ;;  %v2915_v58 = vld [vmem:[#allocation10 + $0x2a8] sm:$0xff] }
 0x68a   : > { %2595 = vmatpush.msra.mxu2 %v2580_v36  ;;  %2810 = vmatpush.msra.mxu1 %v2794_v23  ;;  %v2926_v36 = vld [vmem:[#allocation10 + $0x300] sm:$0xff]  ;;  %v2967_v23 = vld [vmem:[%s9336_s14 + $0x48] sm:$0xff] }
 0x68b   : > { %2683 = vmatpush.msra.mxu0 %v2665_v60  ;;  %v2988_v60 = vld [vmem:[%s9336_s14 + $0xf0] sm:$0xff] }
 0x68c   : > { %2596 = vmatpush.msra.mxu2 %v2579_v37  ;;  %2811 = vmatpush.msra.mxu1 %v2793_v24  ;;  %v2857_v37 = vld [vmem:[#allocation10 + $0x268] sm:$0xff]  ;;  %v2964_v24 = vld [vmem:[%s9336_s14 + $0x30] sm:$0xff] }
 0x68d   : > { %2684 = vmatpush.msra.mxu0 %v2664_v62 }
 0x68e   : > { %2597 = vmatpush.msra.mxu2 %v2578_v38  ;;  %2812 = vmatpush.msra.mxu1 %v2792_v25  ;;  %v2925_v38 = vld [vmem:[#allocation10 + $0x2f8] sm:$0xff]  ;;  %v2965_v25 = vld [vmem:[%s9336_s14 + $0x38] sm:$0xff] }
 0x68f   : > { %2685 = vmatpush.msra.mxu0 %v2663_v0 }
 0x690   : > { %2598 = vmatpush.msra.mxu2 %v2577_v39  ;;  %2813 = vmatpush.msra.mxu1 %v2791_v28  ;;  %v2856_v39 = vld [vmem:[#allocation10 + $0x260] sm:$0xff]  ;;  %v2963_v28 = vld [vmem:[%s9336_s14 + $0x28] sm:$0xff] }
 0x691   : > { %2686 = vmatpush.msra.mxu0 %v2662_v2  ;;  %v2986_v2 = vld [vmem:[%s9336_s14 + $0xe0] sm:$0xff] }
 0x692   : > { %2599 = vmatpush.msra.mxu2 %v2576_v40  ;;  %2814 = vmatpush.msra.mxu1 %v2790_v57  ;;  %v2924_v40 = vld [vmem:[#allocation10 + $0x2f0] sm:$0xff]  ;;  %v5469_v57 = vld [vmem:[%s9251_s15 + $0x228] sm:$0xff] }
 0x693   : > { %2687 = vmatpush.msra.mxu0 %v2661_v5  ;;  %v2984_v5 = vld [vmem:[%s9336_s14 + $0xd0] sm:$0xff] }
 0x694   : > { %2600 = vmatpush.msra.mxu2 %v2575_v42  ;;  %v2787_v42 = vld [vmem:[#allocation10 + $0x1c8] sm:$0xff] }
 0x695   : > { %2688 = vmatpush.msra.mxu0 %v2660_v7  ;;  %v2982_v7 = vld [vmem:[%s9336_s14 + $0xc0] sm:$0xff] }
 0x696   : > { %2601 = vmatpush.msra.mxu2 %v2574_v44  ;;  %v2855_v44 = vld [vmem:[#allocation10 + $0x258] sm:$0xff] }
 0x697   : > { %2689 = vmatpush.msra.mxu0 %v2659_v9  ;;  %v2980_v9 = vld [vmem:[%s9336_s14 + $0xb0] sm:$0xff] }
 0x698   : > { %2602 = vmatpush.msra.mxu2 %v2573_v45  ;;  %v2923_v45 = vld [vmem:[#allocation10 + $0x2e8] sm:$0xff] }
 0x699   : > { %2690 = vmatpush.msra.mxu0 %v2658_v11  ;;  %v2978_v11 = vld [vmem:[%s9336_s14 + $0xa0] sm:$0xff] }
 0x69a   : > { %2603 = vmatpush.msra.mxu2 %v2572_v46  ;;  %v2786_v46 = vld [vmem:[#allocation10 + $0x1c0] sm:$0xff] }
 0x69b   : > { %2869 = vmatpush.msrb.mxu0 %v2863_v14  ;;  %v2977_v14 = vld [vmem:[%s9336_s14 + $0x98] sm:$0xff] }
 0x69c   : > { %2604 = vmatpush.msra.mxu2 %v2571_v47  ;;  %v2854_v47 = vld [vmem:[#allocation10 + $0x250] sm:$0xff] }
 0x69d   : > { %2870 = vmatpush.msrb.mxu0 %v2862_v17  ;;  %v2972_v17 = vld [vmem:[%s9336_s14 + $0x70] sm:$0xff] }
 0x69e   : > { %2741 = vmatpush.msrb.mxu2 %v2735_v48  ;;  %v2922_v48 = vld [vmem:[#allocation10 + $0x2e0] sm:$0xff] }
 0x69f   : > { %2871 = vmatpush.msrb.mxu0 %v2861_v18  ;;  %v2973_v18 = vld [vmem:[%s9336_s14 + $0x78] sm:$0xff] }
 0x6a0   : > { %2742 = vmatpush.msrb.mxu2 %v2734_v49  ;;  %v2853_v49 = vld [vmem:[#allocation10 + $0x248] sm:$0xff] }
 0x6a1   : > { %2872 = vmatpush.msrb.mxu0 %v2860_v20  ;;  %v2971_v20 = vld [vmem:[%s9336_s14 + $0x68] sm:$0xff] }
 0x6a2   : > { %2743 = vmatpush.msrb.mxu2 %v2733_v50  ;;  %v2920_v50 = vld [vmem:[#allocation10 + $0x2d0] sm:$0xff] }
 0x6a3   : > { %2873 = vmatpush.msrb.mxu0 %v2859_v22  ;;  %v2966_v22 = vld [vmem:[%s9336_s14 + $0x40] sm:$0xff] }
 0x6a4   : > { %2744 = vmatpush.msrb.mxu2 %v2732_v52  ;;  %v2919_v52 = vld [vmem:[#allocation10 + $0x2c8] sm:$0xff] }
 0x6a5   : > { %2874 = vmatpush.msrb.mxu0 %v2858_v35  ;;  %v5467_v35 = vld [vmem:[%s9251_s15 + $0x218] sm:$0xff] }
 0x6a6   : > { %2745 = vmatpush.msrb.mxu2 %v2731_v54  ;;  %v2918_v54 = vld [vmem:[#allocation10 + $0x2c0] sm:$0xff] }
 0x6a7   : > { %2875 = vmatpush.msrb.mxu0 %v2857_v37 }
 0x6a8   : > { %2746 = vmatpush.msrb.mxu2 %v2730_v56  ;;  %v2916_v56 = vld [vmem:[#allocation10 + $0x2b0] sm:$0xff] }
 0x6a9   : > { %2876 = vmatpush.msrb.mxu0 %v2856_v39  ;;  %v5457_v39 = vld [vmem:[%s9251_s15 + $0x1c8] sm:$0xff] }
 0x6aa   : > { %2747 = vmatpush.msrb.mxu2 %v2729_v59  ;;  %v2914_v59 = vld [vmem:[#allocation10 + $0x2a0] sm:$0xff] }
 0x6ab   : > { %2877 = vmatpush.msrb.mxu0 %v2855_v44  ;;  %v5455_v44 = vld [vmem:[%s9251_s15 + $0x1b8] sm:$0xff] }
 0x6ac   : > { %2748 = vmatpush.msrb.mxu2 %v2728_v61  ;;  %v2989_v61 = vld [vmem:[%s9336_s14 + $0xf8] sm:$0xff] }
 0x6ad   : > { %2878 = vmatpush.msrb.mxu0 %v2854_v47 }
 0x6ae   : > { %2749 = vmatpush.msrb.mxu2 %v2727_v63 }
 0x6af   : > { %2879 = vmatpush.msrb.mxu0 %v2853_v49 }
 0x6b0   : > { %2750 = vmatpush.msrb.mxu2 %v2726_v1 }
 0x6b1   : > { %2880 = vmatpush.msrb.mxu0 %v2852_v41  ;;  %v5449_v41 = vld [vmem:[%s9251_s15 + $0x188] sm:$0xff] }
 0x6b2   : > { %2751 = vmatpush.msrb.mxu2 %v2725_v4  ;;  %v2987_v4 = vld [vmem:[%s9336_s14 + $0xe8] sm:$0xff] }
 0x6b3   : > { %2881 = vmatpush.msrb.mxu0 %v2851_v51 }
 0x6b4   : > { %2752 = vmatpush.msrb.mxu2 %v2724_v6  ;;  %v2985_v6 = vld [vmem:[%s9336_s14 + $0xd8] sm:$0xff] }
 0x6b5   : > { %2882 = vmatpush.msrb.mxu0 %v2850_v53  ;;  %v5865_v53 = vld [vmem:[%s9337_s0] ss:$0 sm:$0xff]  ;;  %s9339_s0 = sld [smem:[#allocation49_spill]] }
 0x6b6   : > { %2753 = vmatpush.msrb.mxu2 %v2723_v8  ;;  %v2983_v8 = vld [vmem:[%s9336_s14 + $0xc8] sm:$0xff] }
 0x6b8   : > { %2754 = vmatpush.msrb.mxu2 %v2722_v10  ;;  %v2981_v10 = vld [vmem:[%s9336_s14 + $0xb8] sm:$0xff] }
 0x6fa   : > { %v2718_v31 = vpop.f32.mrf.mxu1 }
 0x6fb   : > { %v2654_v15 = vpop.f32.mrf.mxu0 }
 0x6fc   : > { %5427 = vmatmul.msk.f32.vlgmr.msra.gmra.mxu0 %vm2585_vm6, %v2654_v15  ;;  %v2974_v15 = vld [vmem:[%s9336_s14 + $0x80] sm:$0xff] }
 0x700   : > { %v2528_v21 = vpop.f32.mrf.mxu2 }
 0x701   : > { %5425 = vmatmul.msk.f32.vlgmr.msrb.gmra.mxu3 %vm2585_vm6, %v2528_v21  ;;  %v2969_v21 = vld [vmem:[%s9336_s14 + $0x58] sm:$0xff] }
 0x702   : > { %2843 = vmatpush.msrb.mxu3 %v7320_v27 }
 0x704   : > { %2844 = vmatpush.msrb.mxu3 %v7318_v26 }
 0x708   : > { %v2567_v29 = vpop.f32.mrf.mxu2 }
 0x709   : > { %5430 = vmatmul.msk.f32.vlgmr.msra.gmra.mxu3 %vm2507_vm5, %v2761_v43  ;;  %5424 = vmatmul.msk.f32.vlgmr.msra.gmra.mxu2 %vm2585_vm6, %v2567_v29  ;;  %v2962_v43 = vld [vmem:[%s9336_s14 + $0x20] sm:$0xff]  ;;  %v2960_v29 = vld [vmem:[%s9336_s14 + $0x10] sm:$0xff] }
 0x70a   : > { %2907 = vmatpush.msra.mxu3 %v7320_v27  ;;  %v2789_v27 = vld [vmem:[#allocation10 + $0x1d8] sm:$0xff]  ;;  %2990 = vmatpush.msra.mxu2 %v2988_v60 }
 0x70b   : > { %2815 = vmatpush.msra.mxu1 %v2789_v27  ;;  %v5463_v27 = vld [vmem:[%s9251_s15 + $0x1f8] sm:$0xff]  ;;  %v5445_v60 = vld [vmem:[%s9251_s15 + $0x168] sm:$0xff] }
 0x70c   : > { %2908 = vmatpush.msra.mxu3 %v7318_v26  ;;  %v2788_v26 = vld [vmem:[#allocation10 + $0x1d0] sm:$0xff]  ;;  %2991 = vmatpush.msra.mxu2 %v2986_v2 }
 0x70d   : > { %2816 = vmatpush.msra.mxu1 %v2788_v26  ;;  %v5459_v26 = vld [vmem:[%s9251_s15 + $0x1d8] sm:$0xff]  ;;  %v5464_v2 = vld [vmem:[%s9251_s15 + $0x200] sm:$0xff] }
 0x70e   : > { %2992 = vmatpush.msra.mxu2 %v2984_v5  ;;  %v5460_v5 = vld [vmem:[%s9251_s15 + $0x1e0] sm:$0xff] }
 0x70f   : > { %2817 = vmatpush.msra.mxu1 %v2787_v42 }
 0x710   : > { %2993 = vmatpush.msra.mxu2 %v2982_v7  ;;  %v3030_v7 = vld [vmem:[#allocation11] sm:$0xf] }
 0x711   : > { %5432 = vmatmul.msk.f32.vlgmr.msrb.gmra.mxu3 %vm2507_vm5, %v2825_v30  ;;  %5429 = vmatmul.msk.f32.vlgmr.msrb.gmra.mxu2 %vm2585_vm6, %v2718_v31  ;;  %v2961_v30 = vld [vmem:[%s9336_s14 + $0x18] sm:$0xff]  ;;  %v2958_v31 = vld [vmem:[%s9336_s14] sm:$0xff] }
 0x712   : > { %2933 = vmatpush.msrb.mxu3 %v2927_v32  ;;  %2818 = vmatpush.msra.mxu1 %v2786_v46  ;;  %v2959_v32 = vld [vmem:[%s9336_s14 + $0x8] sm:$0xff] }
 0x713   : > { %2994 = vmatpush.msra.mxu2 %v2980_v9  ;;  %v3116_v9 = vld [vmem:[#allocation11 + $0x4] sm:$0xf] }
 0x714   : > { %2934 = vmatpush.msrb.mxu3 %v2926_v36  ;;  %3010 = vmatpush.msrb.mxu1 %v2989_v61  ;;  %v5465_v36 = vld [vmem:[%s9251_s15 + $0x208] sm:$0xff]  ;;  %v5443_v61 = vld [vmem:[%s9251_s15 + $0x158] sm:$0xff] }
 0x715   : > { %2995 = vmatpush.msra.mxu2 %v2978_v11 }
 0x716   : > { %2935 = vmatpush.msrb.mxu3 %v2925_v38  ;;  %3011 = vmatpush.msrb.mxu1 %v2987_v4  ;;  %v5461_v38 = vld [vmem:[%s9251_s15 + $0x1e8] sm:$0xff]  ;;  %v5462_v4 = vld [vmem:[%s9251_s15 + $0x1f0] sm:$0xff] }
 0x717   : > { %2996 = vmatpush.msra.mxu2 %v2976_v13  ;;  %v5454_v13 = vld [vmem:[%s9251_s15 + $0x1b0] sm:$0xff] }
 0x718   : > { %2936 = vmatpush.msrb.mxu3 %v2924_v40  ;;  %3012 = vmatpush.msrb.mxu1 %v2985_v6  ;;  %v5458_v6 = vld [vmem:[%s9251_s15 + $0x1d0] sm:$0xff] }
 0x719   : > { %5434 = vmatmul.msk.f32.vlgmr.msra.gmra.mxu3 %vm2507_vm5, %v2889_v33  ;;  %2997 = vmatpush.msra.mxu2 %v2974_v15  ;;  %v5471_v33 = vld [vmem:[%s9251_s15 + $0x238] sm:$0xff]  ;;  %v5452_v15 = vld [vmem:[%s9251_s15 + $0x1a0] sm:$0xff] }
 0x71a   : > { %2937 = vmatpush.msrb.mxu3 %v2923_v45  ;;  %3013 = vmatpush.msrb.mxu1 %v2983_v8  ;;  %v5453_v45 = vld [vmem:[%s9251_s15 + $0x1a8] sm:$0xff] }
 0x71b   : > { %2998 = vmatpush.msra.mxu2 %v2972_v17  ;;  %v5450_v17 = vld [vmem:[%s9251_s15 + $0x190] sm:$0xff] }
 0x71c   : > { %2938 = vmatpush.msrb.mxu3 %v2922_v48  ;;  %3014 = vmatpush.msrb.mxu1 %v2981_v10  ;;  %v5451_v48 = vld [vmem:[%s9251_s15 + $0x198] sm:$0xff]  ;;  %v5456_v10 = vld [vmem:[%s9251_s15 + $0x1c0] sm:$0xff] }
 0x71d   : > { %2999 = vmatpush.msra.mxu2 %v2970_v19  ;;  %v5446_v19 = vld [vmem:[%s9251_s15 + $0x170] sm:$0xff] }
 0x71e   : > { %2939 = vmatpush.msrb.mxu3 %v2921_v3  ;;  %3015 = vmatpush.msrb.mxu1 %v2979_v12  ;;  %v5478_v12 = vld [vmem:[%s9251_s15 + $0x270] sm:$0xff] }
 0x71f   : > { %3000 = vmatpush.msra.mxu2 %v2968_v34  ;;  %v5442_v34 = vld [vmem:[%s9251_s15 + $0x150] sm:$0xff] }
 0x720   : > { %2940 = vmatpush.msrb.mxu3 %v2920_v50  ;;  %3016 = vmatpush.msrb.mxu1 %v2977_v14  ;;  %v5476_v14 = vld [vmem:[%s9251_s15 + $0x260] sm:$0xff] }
 0x721   : > { %3001 = vmatpush.msra.mxu2 %v2966_v22  ;;  %v5472_v22 = vld [vmem:[%s9251_s15 + $0x240] sm:$0xff] }
 0x722   : > { %2941 = vmatpush.msrb.mxu3 %v2919_v52  ;;  %3017 = vmatpush.msrb.mxu1 %v2975_v16  ;;  %v5474_v16 = vld [vmem:[%s9251_s15 + $0x250] sm:$0xff] }
 0x723   : > { %3002 = vmatpush.msra.mxu2 %v2964_v24  ;;  %v3103_v24 = vld [vmem:[%s9251_s15 + $0xe0] sm:$0xff] }
 0x724   : > { %2942 = vmatpush.msrb.mxu3 %v2918_v54  ;;  %3018 = vmatpush.msrb.mxu1 %v2973_v18  ;;  %v5448_v18 = vld [vmem:[%s9251_s15 + $0x180] sm:$0xff] }
 0x725   : > { %3003 = vmatpush.msra.mxu2 %v2962_v43  ;;  %v3114_v43 = vld [vmem:[%s9251_s15 + $0x138] sm:$0xff] }
 0x726   : > { %2943 = vmatpush.msrb.mxu3 %v2917_v55  ;;  %3019 = vmatpush.msrb.mxu1 %v2971_v20  ;;  %v5444_v20 = vld [vmem:[%s9251_s15 + $0x160] sm:$0xff] }
 0x727   : > { %3004 = vmatpush.msra.mxu2 %v2960_v29  ;;  %v5479_v29 = vld [vmem:[%s9251_s15 + $0x278] sm:$0xff] }
 0x728   : > { %2944 = vmatpush.msrb.mxu3 %v2916_v56  ;;  %3020 = vmatpush.msrb.mxu1 %v2969_v21  ;;  %v5440_v21 = vld [vmem:[%s9251_s15 + $0x140] sm:$0xff] }
 0x729   : > { %3005 = vmatpush.msra.mxu2 %v2958_v31  ;;  %v3099_v31 = vld [vmem:[%s9251_s15 + $0xc0] sm:$0xff] }
 0x72a   : > { %2945 = vmatpush.msrb.mxu3 %v2915_v58  ;;  %3021 = vmatpush.msrb.mxu1 %v2967_v23  ;;  %v3105_v23 = vld [vmem:[%s9251_s15 + $0xf0] sm:$0xff] }
 0x72c   : > { %2946 = vmatpush.msrb.mxu3 %v2914_v59  ;;  %3022 = vmatpush.msrb.mxu1 %v2965_v25  ;;  %v5447_v59 = vld [vmem:[%s9251_s15 + $0x178] sm:$0xff]  ;;  %v3101_v25 = vld [vmem:[%s9251_s15 + $0xd0] sm:$0xff] }
 0x72e   : > { %3023 = vmatpush.msrb.mxu1 %v2963_v28  ;;  %v3112_v28 = vld [vmem:[%s9251_s15 + $0x128] sm:$0xff] }
 0x730   : > { %3024 = vmatpush.msrb.mxu1 %v2961_v30  ;;  %v5477_v30 = vld [vmem:[%s9251_s15 + $0x268] sm:$0xff] }
 0x732   : > { %3025 = vmatpush.msrb.mxu1 %v2959_v32  ;;  %v3110_v32 = vld [vmem:[%s9251_s15 + $0x118] sm:$0xff] }
 0x779   : > { %v2692_v40 = vpop.f32.mrf.mxu0 }
 0x784   : > { %v7353_v62 = vpop.f32.mrf.mxu3 }
 0x78c   : > { %v2782_v63 = vpop.f32.mrf.mxu3  ;;  %v2606_v37 = vpop.f32.mrf.mxu2 }
 0x78d   : > { %5431 = vmatmul.msk.f32.vlgmr.msra.gmra.mxu1 %vm2585_vm6, %v2782_v63  ;;  %v2630_v42 = vadd.f32 %v7353_v62, %v2606_v37  ;;  %v5441_v62 = vld [vmem:[%s9251_s15 + $0x148] sm:$0xff]  ;;  %v5470_v63 = vld [vmem:[%s9251_s15 + $0x230] sm:$0xff] }
 0x78e   : > { %3244 = vmatpush.msra.mxu1 %v5471_v33  ;;  %3204 = vmatpush.msrb.mxu2 %v5470_v63  ;;  %v3097_v33 = vld [vmem:[%s9251_s15 + $0xb0] sm:$0xff]  ;;  %v5473_v37 = vld [vmem:[%s9251_s15 + $0x248] sm:$0xff] }
 0x78f   : > { %v2695_v47 = vadd.f32 %v2692_v40, %v2630_v42  ;;  %v3089_v40 = vld [vmem:[%s9251_s15 + $0x70] sm:$0xff]  ;;  %v3100_v63 = vld [vmem:[%s9251_s15 + $0xc8] sm:$0xff] }
 0x790   : > { %3245 = vmatpush.msra.mxu1 %v5469_v57  ;;  %v3095_v57 = vld [vmem:[%s9251_s15 + $0xa0] sm:$0xff]  ;;  %v3109_v42 = vld [vmem:[%s9251_s15 + $0x110] sm:$0xff] }
 0x792   : > { %3246 = vmatpush.msra.mxu1 %v5467_v35  ;;  %v3108_v35 = vld [vmem:[%s9251_s15 + $0x108] sm:$0xff] }
 0x794   : > { %v2846_v0 = vpop.f32.mrf.mxu3  ;;  %3247 = vmatpush.msra.mxu1 %v5465_v36  ;;  %v2756_v46 = vpop.f32.mrf.mxu2  ;;  %v5475_v36 = vld [vmem:[%s9251_s15 + $0x258] sm:$0xff] }
 0x795   : > { %5433 = vmatmul.msk.f32.vlgmr.msrb.gmra.mxu0 %vm2585_vm6, %v2846_v0  ;;  %v2759_v3 = vadd.f32 %v2756_v46, %v2695_v47  ;;  %v5468_v0 = vld [vmem:[%s9251_s15 + $0x220] sm:$0xff] }
 0x796   : > { %3248 = vmatpush.msra.mxu1 %v5463_v27  ;;  %3205 = vmatpush.msrb.mxu2 %v5468_v0  ;;  %v3093_v27 = vld [vmem:[%s9251_s15 + $0x90] sm:$0xff]  ;;  %v3107_v46 = vld [vmem:[%s9251_s15 + $0x100] sm:$0xff]  ;;  %v5509_v0 = vld [vmem:[%s9251_s15 + $0x338] sm:$0xff] }
 0x797   : > { %v3083_v47 = vld [vmem:[%s9251_s15 + $0x40] sm:$0xff] }
 0x798   : > { %3249 = vmatpush.msra.mxu1 %v5461_v38  ;;  %v3113_v38 = vld [vmem:[%s9251_s15 + $0x130] sm:$0xff] }
 0x79a   : > { %3250 = vmatpush.msra.mxu1 %v5459_v26  ;;  %v3111_v26 = vld [vmem:[%s9251_s15 + $0x120] sm:$0xff] }
 0x79c   : > { %v2910_v1 = vpop.f32.mrf.mxu3  ;;  %3251 = vmatpush.msra.mxu1 %v5457_v39  ;;  %v3091_v39 = vld [vmem:[%s9251_s15 + $0x80] sm:$0xff] }
 0x79d   : > { %5435 = vmatmul.msk.f32.vlgmr.msrb.gmra.mxu3 %vm2585_vm6, %v2910_v1  ;;  %v5466_v1 = vld [vmem:[%s9251_s15 + $0x210] sm:$0xff] }
 0x79e   : > { %3252 = vmatpush.msra.mxu1 %v5455_v44  ;;  %3206 = vmatpush.msrb.mxu2 %v5466_v1  ;;  %v3087_v44 = vld [vmem:[%s9251_s15 + $0x60] sm:$0xff]  ;;  %v3098_v1 = vld [vmem:[%s9251_s15 + $0xb8] sm:$0xff] }
 0x7a0   : > { %3253 = vmatpush.msra.mxu1 %v5453_v45  ;;  %3207 = vmatpush.msrb.mxu2 %v5464_v2  ;;  %v3085_v45 = vld [vmem:[%s9251_s15 + $0x50] sm:$0xff]  ;;  %v5507_v2 = vld [vmem:[%s9251_s15 + $0x328] sm:$0xff] }
 0x7a2   : > { %3254 = vmatpush.msra.mxu1 %v5451_v48  ;;  %3208 = vmatpush.msrb.mxu2 %v5462_v4  ;;  %v3081_v48 = vld [vmem:[%s9251_s15 + $0x30] sm:$0xff]  ;;  %v3096_v4 = vld [vmem:[%s9251_s15 + $0xa8] sm:$0xff] }
 0x7a4   : > { %3255 = vmatpush.msra.mxu1 %v5449_v41  ;;  %3209 = vmatpush.msrb.mxu2 %v5460_v5  ;;  %v3075_v41 = vld [vmem:[%s9251_s15] sm:$0xff]  ;;  %v5516_v5 = vld [vmem:[%s9251_s15 + $0x370] sm:$0xff] }
 0x7a6   : > { %3256 = vmatpush.msra.mxu1 %v5447_v59  ;;  %3210 = vmatpush.msrb.mxu2 %v5458_v6  ;;  %v3104_v59 = vld [vmem:[%s9251_s15 + $0xe8] sm:$0xff]  ;;  %v5505_v6 = vld [vmem:[%s9251_s15 + $0x318] sm:$0xff] }
 0x7a8   : > { %3257 = vmatpush.msra.mxu1 %v5445_v60  ;;  %3211 = vmatpush.msrb.mxu2 %v5456_v10  ;;  %v5513_v60 = vld [vmem:[%s9251_s15 + $0x358] sm:$0xff]  ;;  %v5503_v10 = vld [vmem:[%s9251_s15 + $0x308] sm:$0xff] }
 0x7aa   : > { %3258 = vmatpush.msra.mxu1 %v5443_v61  ;;  %3212 = vmatpush.msrb.mxu2 %v5454_v13  ;;  %v3102_v61 = vld [vmem:[%s9251_s15 + $0xd8] sm:$0xff]  ;;  %v3092_v13 = vld [vmem:[%s9251_s15 + $0x88] sm:$0xff] }
 0x7ac   : > { %3259 = vmatpush.msra.mxu1 %v5441_v62  ;;  %3213 = vmatpush.msrb.mxu2 %v5452_v15  ;;  %v5511_v62 = vld [vmem:[%s9251_s15 + $0x348] sm:$0xff]  ;;  %v5510_v15 = vld [vmem:[%s9251_s15 + $0x340] sm:$0xff] }
 0x7ae   : > { %3214 = vmatpush.msrb.mxu2 %v5450_v17  ;;  %v5499_v17 = vld [vmem:[%s9251_s15 + $0x2e8] sm:$0xff] }
 0x7b0   : > { %3215 = vmatpush.msrb.mxu2 %v5448_v18  ;;  %v5508_v18 = vld [vmem:[%s9251_s15 + $0x330] sm:$0xff] }
 0x7b2   : > { %3216 = vmatpush.msrb.mxu2 %v5446_v19  ;;  %v3088_v19 = vld [vmem:[%s9251_s15 + $0x68] sm:$0xff] }
 0x7b4   : > { %3217 = vmatpush.msrb.mxu2 %v5444_v20  ;;  %v5497_v20 = vld [vmem:[%s9251_s15 + $0x2d8] sm:$0xff] }
 0x7b6   : > { %3218 = vmatpush.msrb.mxu2 %v5442_v34  ;;  %v5506_v34 = vld [vmem:[%s9251_s15 + $0x320] sm:$0xff] }
 0x7b8   : > { %3219 = vmatpush.msrb.mxu2 %v5440_v21  ;;  %v3086_v21 = vld [vmem:[%s9251_s15 + $0x58] sm:$0xff] }
 0x80a   : > { %v2820_v49 = vpop.f32.mrf.mxu1 }
 0x80b   : > { %v2823_v51 = vadd.f32 %v2820_v49, %v2759_v3  ;;  %v3079_v49 = vld [vmem:[%s9251_s15 + $0x20] sm:$0xff]  ;;  %v3077_v3 = vld [vmem:[%s9251_s15 + $0x10] sm:$0xff] }
 0x812   : > { %v2884_v50 = vpop.f32.mrf.mxu0 }
 0x813   : > { %v2887_v52 = vadd.f32 %v2884_v50, %v2823_v51 }
 0x820   : > { %v2948_v54 = vpop.f32.mrf.mxu3 }
 0x821   : > { %v2951_v55 = vadd.f32 %v2948_v54, %v2887_v52  ;;  %v5517_v54 = vld [vmem:[%s9251_s15 + $0x378] sm:$0xff] }
 0x823   : > { %v2956_v56 = vadd.f32 %v5865_v53, %v2951_v55  ;;  %v3368_v53 = vld [vmem:[#allocation11 + $0x8] sm:$0xf]  ;;  %v3106_v55 = vld [vmem:[%s9251_s15 + $0xf8] sm:$0xff] }
 0x825   : > { %v2957_v58 = vmax.f32 %v2956_v56, 0.0 }
 0x827   : > { %3006 = vmatmul.f32.vlgmr.msra.gmra.mxu2 %v2957_v58  ;;  %3026 = vmatmul.f32.vlgmr.msrb.gmra.mxu1 %v2957_v58  ;;  %4238 = vst [vmem:[%s7489_s2] sm:$0xff] %v2957_v58  ;;  %v5515_v58 = vld [vmem:[%s9251_s15 + $0x368] sm:$0xff] }
 0x828   : > { %3359 = vmatpush.msra.mxu2 %v3114_v43  ;;  %v5502_v43 = vld [vmem:[%s9251_s15 + $0x300] sm:$0xff] }
 0x82a   : > { %3360 = vmatpush.msra.mxu2 %v3112_v28  ;;  %v3082_v28 = vld [vmem:[%s9251_s15 + $0x38] sm:$0xff] }
 0x82c   : > { %3361 = vmatpush.msra.mxu2 %v3110_v32  ;;  %v5489_v32 = vld [vmem:[%s9251_s15 + $0x298] sm:$0xff] }
 0x82e   : > { %3362 = vmatpush.msra.mxu2 %v3108_v35  ;;  %v5487_v35 = vld [vmem:[%s9251_s15 + $0x288] sm:$0xff] }
 0x8a4   : > { %v7532_v11 = vpop.f32.mrf.mxu1 }
 0x8aa   : > { %v7525_v8 = vpop.f32.mrf.mxu2 }
 0x8ab   : > { %3050 = vmatpush.msra.mxu0 %v7525_v8  ;;  %3135 = vmatpush.msra.mxu3 %v7525_v8 }
 0x8ac   : > { %3387 = vmatpush.msrb.mxu1 %v7525_v8  ;;  %5436 = vmatmul.msk.f32.vlgmr.msra.gmra.mxu0 %vm3031_vm7, %v3030_v7 }
 0x8ad   : > { %3070 = vmatpush.msrb.mxu0 %v7532_v11  ;;  %5438 = vmatmul.msk.f32.vlgmr.msra.gmra.mxu3 %vm3031_vm7, %v3116_v9 }
 0x8ae   : > { %3236 = vmatpush.msrb.mxu3 %v5478_v12  ;;  %v5512_v12 = vld [vmem:[%s9251_s15 + $0x350] sm:$0xff] }
 0x8af   : > { %3155 = vmatpush.msra.mxu0 %v7532_v11 }
 0x8b0   : > { %3237 = vmatpush.msrb.mxu3 %v5476_v14  ;;  %v5501_v14 = vld [vmem:[%s9251_s15 + $0x2f8] sm:$0xff] }
 0x8b2   : > { %3238 = vmatpush.msrb.mxu3 %v5474_v16  ;;  %v3090_v16 = vld [vmem:[%s9251_s15 + $0x78] sm:$0xff] }
 0x8b4   : > { %5437 = vmatmul.msk.f32.vlgmr.msrb.gmra.mxu0 %vm3031_vm7, %v3030_v7  ;;  %3239 = vmatpush.msrb.mxu3 %v5472_v22  ;;  %v5514_v7 = vld [vmem:[%s9251_s15 + $0x360] sm:$0xff]  ;;  %v5495_v22 = vld [vmem:[%s9251_s15 + $0x2c8] sm:$0xff] }
 0x8b5   : > { %3276 = vmatpush.msrb.mxu0 %v5479_v29  ;;  %v5491_v29 = vld [vmem:[%s9251_s15 + $0x2a8] sm:$0xff] }
 0x8b6   : > { %3287 = vmatpush.msra.mxu3 %v3105_v23  ;;  %v5504_v23 = vld [vmem:[%s9251_s15 + $0x310] sm:$0xff] }
 0x8b7   : > { %3277 = vmatpush.msrb.mxu0 %v5477_v30  ;;  %v5500_v30 = vld [vmem:[%s9251_s15 + $0x2f0] sm:$0xff] }
 0x8b8   : > { %3288 = vmatpush.msra.mxu3 %v3103_v24  ;;  %v3084_v24 = vld [vmem:[%s9251_s15 + $0x48] sm:$0xff] }
 0x8b9   : > { %3278 = vmatpush.msrb.mxu0 %v5475_v36  ;;  %v5496_v36 = vld [vmem:[%s9251_s15 + $0x2d0] sm:$0xff] }
 0x8ba   : > { %3289 = vmatpush.msra.mxu3 %v3101_v25  ;;  %v5493_v25 = vld [vmem:[%s9251_s15 + $0x2b8] sm:$0xff] }
 0x8bb   : > { %3279 = vmatpush.msrb.mxu0 %v5473_v37  ;;  %v5494_v37 = vld [vmem:[%s9251_s15 + $0x2c0] sm:$0xff] }
 0x8bc   : > { %5439 = vmatmul.msk.f32.vlgmr.msra.gmra.mxu0 %vm3031_vm7, %v3116_v9  ;;  %3290 = vmatpush.msra.mxu3 %v3099_v31  ;;  %v3094_v9 = vld [vmem:[%s9251_s15 + $0x98] sm:$0xff]  ;;  %v3080_v31 = vld [vmem:[%s9251_s15 + $0x28] sm:$0xff] }
 0x8bd   : > { %3319 = vmatpush.msra.mxu0 %v3113_v38  ;;  %v5492_v38 = vld [vmem:[%s9251_s15 + $0x2b0] sm:$0xff] }
 0x8be   : > { %3291 = vmatpush.msra.mxu3 %v3097_v33  ;;  %v5498_v33 = vld [vmem:[%s9251_s15 + $0x2e0] sm:$0xff] }
 0x8bf   : > { %3320 = vmatpush.msra.mxu0 %v3111_v26  ;;  %v5560_v26 = vld [vmem:[%s9251_s15 + $0x4b0] sm:$0xff] }
 0x8c0   : > { %3292 = vmatpush.msra.mxu3 %v3095_v57  ;;  %v3078_v57 = vld [vmem:[%s9251_s15 + $0x18] sm:$0xff] }
 0x8c1   : > { %3321 = vmatpush.msra.mxu0 %v3109_v42  ;;  %v5488_v42 = vld [vmem:[%s9251_s15 + $0x290] sm:$0xff] }
 0x8c2   : > { %3293 = vmatpush.msra.mxu3 %v3093_v27  ;;  %v3076_v27 = vld [vmem:[%s9251_s15 + $0x8] sm:$0xff] }
 0x8c3   : > { %3322 = vmatpush.msra.mxu0 %v3107_v46  ;;  %v5486_v46 = vld [vmem:[%s9251_s15 + $0x280] sm:$0xff] }
 0x8c4   : > { %3294 = vmatpush.msra.mxu3 %v3091_v39  ;;  %v5490_v39 = vld [vmem:[%s9251_s15 + $0x2a0] sm:$0xff] }
 0x8c6   : > { %3295 = vmatpush.msra.mxu3 %v3089_v40  ;;  %v5558_v40 = vld [vmem:[%s9251_s15 + $0x4a0] sm:$0xff] }
 0x8c8   : > { %3296 = vmatpush.msra.mxu3 %v3087_v44  ;;  %v5556_v44 = vld [vmem:[%s9251_s15 + $0x490] sm:$0xff] }
 0x8ca   : > { %3297 = vmatpush.msra.mxu3 %v3085_v45  ;;  %v7824_v45 = vld [vmem:[#allocation11 + $0xc] sm:$0xf] }
 0x8cc   : > { %3298 = vmatpush.msra.mxu3 %v3083_v47  ;;  %v5561_v47 = vld [vmem:[%s9251_s15 + $0x4b8] sm:$0xff] }
 0x8ce   : > { %3299 = vmatpush.msra.mxu3 %v3081_v48  ;;  %v5554_v48 = vld [vmem:[%s9251_s15 + $0x480] sm:$0xff] }
 0x8d0   : > { %3300 = vmatpush.msra.mxu3 %v3079_v49  ;;  %v5559_v49 = vld [vmem:[%s9251_s15 + $0x4a8] sm:$0xff] }
 0x8d2   : > { %3301 = vmatpush.msra.mxu3 %v3077_v3  ;;  %v5552_v3 = vld [vmem:[%s9251_s15 + $0x470] sm:$0xff] }
 0x8d4   : > { %3302 = vmatpush.msra.mxu3 %v3075_v41  ;;  %v5557_v41 = vld [vmem:[%s9251_s15 + $0x498] sm:$0xff] }
 0x929   : > { %v7661_v50 = vpop.f32.mrf.mxu0 }
 0x930   : > { %v3137_v51 = vpop.f32.mrf.mxu3 }
 0x931   : > { %3220 = vmatmul.f32.vlgmr.msrb.gmra.mxu2 %v3137_v51  ;;  %3260 = vmatmul.f32.vlgmr.msra.gmra.mxu1 %v3137_v51  ;;  %v3072_v52 = vpop.f32.mrf.mxu0  ;;  %v5555_v51 = vld [vmem:[%s9251_s15 + $0x488] sm:$0xff] }
 0x932   : > { %3407 = vmatpush.msrb.mxu2 %v7532_v11 }
 0x939   : > { %5483 = vmatmul.msk.f32.vlgmr.msra.gmra.mxu2 %vm1940_vm3, %v3072_v52  ;;  %5484 = vmatmul.msk.f32.vlgmr.msrb.gmra.mxu1 %vm3031_vm7, %v3368_v53  ;;  %v3157_v56 = vpop.f32.mrf.mxu0 }
 0x93a   : > { %3496 = vmatpush.msra.mxu2 %v5517_v54  ;;  %5481 = vmatmul.msk.f32.vlgmr.msrb.gmra.mxu0 %vm1940_vm3, %v3157_v56  ;;  %v5549_v54 = vld [vmem:[%s9251_s15 + $0x458] sm:$0xff] }
 0x93b   : > { %3327 = vmatpush.msrb.mxu0 %v3106_v55  ;;  %5480 = vmatmul.msk.f32.vlgmr.msrb.gmra.mxu3 %vm1940_vm3, %v3157_v56  ;;  %v5547_v55 = vld [vmem:[%s9251_s15 + $0x448] sm:$0xff]  ;;  %v5545_v56 = vld [vmem:[%s9251_s15 + $0x438] sm:$0xff] }
 0x93c   : > { %3497 = vmatpush.msra.mxu2 %v5515_v58  ;;  %3456 = vmatpush.msrb.mxu3 %v5516_v5  ;;  %v5543_v58 = vld [vmem:[%s9251_s15 + $0x428] sm:$0xff]  ;;  %v5540_v5 = vld [vmem:[%s9251_s15 + $0x410] sm:$0xff] }
 0x93d   : > { %3328 = vmatpush.msrb.mxu0 %v3104_v59  ;;  %v5541_v59 = vld [vmem:[%s9251_s15 + $0x418] sm:$0xff] }
 0x93e   : > { %3498 = vmatpush.msra.mxu2 %v5513_v60  ;;  %3457 = vmatpush.msrb.mxu3 %v5514_v7  ;;  %v5548_v60 = vld [vmem:[%s9251_s15 + $0x450] sm:$0xff] }
 0x93f   : > { %3329 = vmatpush.msrb.mxu0 %v3102_v61  ;;  %v5539_v61 = vld [vmem:[%s9251_s15 + $0x408] sm:$0xff]  ;;  %v5524_v7 = vld [vmem:[%s9251_s15 + $0x3b0] sm:$0xff] }
 0x940   : > { %3499 = vmatpush.msra.mxu2 %v5511_v62  ;;  %3458 = vmatpush.msrb.mxu3 %v5512_v12  ;;  %v5546_v62 = vld [vmem:[%s9251_s15 + $0x440] sm:$0xff]  ;;  %v5536_v12 = vld [vmem:[%s9251_s15 + $0x3f0] sm:$0xff] }
 0x941   : > { %3330 = vmatpush.msrb.mxu0 %v3100_v63  ;;  %5485 = vmatmul.msk.f32.vlgmr.msrb.gmra.mxu2 %vm3031_vm7, %v3368_v53  ;;  %v5551_v53 = vld [vmem:[%s9251_s15 + $0x468] sm:$0xff]  ;;  %v5537_v63 = vld [vmem:[%s9251_s15 + $0x3f8] sm:$0xff] }
 0x942   : > { %3500 = vmatpush.msra.mxu2 %v5509_v0  ;;  %5482 = vmatmul.msk.f32.vlgmr.msra.gmra.mxu0 %vm1940_vm3, %v3072_v52  ;;  %v5553_v52 = vld [vmem:[%s9251_s15 + $0x478] sm:$0xff]  ;;  %v5544_v0 = vld [vmem:[%s9251_s15 + $0x430] sm:$0xff] }
 0x943   : > { %3331 = vmatpush.msrb.mxu0 %v3098_v1  ;;  %3303 = vmatmul.f32.vlgmr.msra.gmra.mxu3 %v7661_v50  ;;  %v5535_v1 = vld [vmem:[%s9251_s15 + $0x3e8] sm:$0xff] }
 0x944   : > { %3501 = vmatpush.msra.mxu2 %v5507_v2  ;;  %3459 = vmatpush.msrb.mxu3 %v5510_v15  ;;  %v5542_v2 = vld [vmem:[%s9251_s15 + $0x420] sm:$0xff] }
 0x945   : > { %3332 = vmatpush.msrb.mxu0 %v3096_v4  ;;  %v5533_v4 = vld [vmem:[%s9251_s15 + $0x3d8] sm:$0xff]  ;;  %3488 = vmatpush.msra.mxu1 %v5524_v7  ;;  %v5518_v15 = vld [vmem:[%s9251_s15 + $0x380] sm:$0xff] }
 0x946   : > { %3502 = vmatpush.msra.mxu2 %v5505_v6  ;;  %3460 = vmatpush.msrb.mxu3 %v5508_v18  ;;  %v5531_v6 = vld [vmem:[%s9251_s15 + $0x3c8] sm:$0xff]  ;;  %v5649_v7 = vld [vmem:[%s9251_s15 + $0x738] sm:$0xff] }
 0x947   : > { %3333 = vmatpush.msrb.mxu0 %v3094_v9  ;;  %v5538_v9 = vld [vmem:[%s9251_s15 + $0x400] sm:$0xff]  ;;  %v5523_v18 = vld [vmem:[%s9251_s15 + $0x3a8] sm:$0xff] }
 0x948   : > { %3503 = vmatpush.msra.mxu2 %v5503_v10  ;;  %3461 = vmatpush.msrb.mxu3 %v5506_v34  ;;  %v5522_v10 = vld [vmem:[%s9251_s15 + $0x3a0] sm:$0xff]  ;;  %v5521_v34 = vld [vmem:[%s9251_s15 + $0x398] sm:$0xff] }
 0x949   : > { %3334 = vmatpush.msrb.mxu0 %v3092_v13  ;;  %v5520_v13 = vld [vmem:[%s9251_s15 + $0x390] sm:$0xff]  ;;  %3489 = vmatpush.msra.mxu1 %v5522_v10  ;;  %v5647_v10 = vld [vmem:[%s9251_s15 + $0x728] sm:$0xff] }
 0x94a   : > { %3504 = vmatpush.msra.mxu2 %v5501_v14  ;;  %3462 = vmatpush.msrb.mxu3 %v5504_v23  ;;  %v5534_v14 = vld [vmem:[%s9251_s15 + $0x3e0] sm:$0xff]  ;;  %v5601_v23 = vld [vmem:[%s9251_s15 + $0x5d8] sm:$0xff] }
 0x94b   : > { %3335 = vmatpush.msrb.mxu0 %v3090_v16  ;;  %3490 = vmatpush.msra.mxu1 %v5520_v13  ;;  %v5525_v16 = vld [vmem:[%s9251_s15 + $0x3b8] sm:$0xff]  ;;  %v5643_v13 = vld [vmem:[%s9251_s15 + $0x708] sm:$0xff] }
 0x94c   : > { %3505 = vmatpush.msra.mxu2 %v5499_v17  ;;  %3463 = vmatpush.msrb.mxu3 %v5502_v43  ;;  %v5532_v17 = vld [vmem:[%s9251_s15 + $0x3d0] sm:$0xff]  ;;  %v5595_v43 = vld [vmem:[%s9251_s15 + $0x5a8] sm:$0xff] }
 0x94d   : > { %3336 = vmatpush.msrb.mxu0 %v3088_v19  ;;  %3491 = vmatpush.msra.mxu1 %v5518_v15  ;;  %v5530_v19 = vld [vmem:[%s9251_s15 + $0x3c0] sm:$0xff]  ;;  %v5637_v15 = vld [vmem:[%s9251_s15 + $0x6d8] sm:$0xff] }
 0x94e   : > { %3506 = vmatpush.msra.mxu2 %v5497_v20  ;;  %3464 = vmatpush.msrb.mxu3 %v5500_v30  ;;  %v5605_v20 = vld [vmem:[%s9251_s15 + $0x5f8] sm:$0xff] }
 0x94f   : > { %3337 = vmatpush.msrb.mxu0 %v3086_v21  ;;  %3528 = vmatpush.msrb.mxu1 %v5525_v16  ;;  %v5603_v21 = vld [vmem:[%s9251_s15 + $0x5e8] sm:$0xff] }
 0x950   : > { %3507 = vmatpush.msra.mxu2 %v5495_v22  ;;  %3465 = vmatpush.msrb.mxu3 %v5498_v33  ;;  %v5519_v22 = vld [vmem:[%s9251_s15 + $0x388] sm:$0xff] }
 0x951   : > { %3338 = vmatpush.msrb.mxu0 %v3084_v24  ;;  %3529 = vmatpush.msrb.mxu1 %v5523_v18  ;;  %v5599_v24 = vld [vmem:[%s9251_s15 + $0x5c8] sm:$0xff] }
 0x952   : > { %3508 = vmatpush.msra.mxu2 %v5493_v25  ;;  %3466 = vmatpush.msrb.mxu3 %v5496_v36  ;;  %v5597_v25 = vld [vmem:[%s9251_s15 + $0x5b8] sm:$0xff]  ;;  %v5635_v16 = vld [vmem:[%s9251_s15 + $0x6c8] sm:$0xff] }
 0x953   : > { %3339 = vmatpush.msrb.mxu0 %v3082_v28  ;;  %3530 = vmatpush.msrb.mxu1 %v5521_v34  ;;  %v5593_v28 = vld [vmem:[%s9251_s15 + $0x598] sm:$0xff]  ;;  %v5631_v18 = vld [vmem:[%s9251_s15 + $0x6a8] sm:$0xff] }
 0x954   : > { %3509 = vmatpush.msra.mxu2 %v5491_v29  ;;  %3467 = vmatpush.msrb.mxu3 %v5494_v37  ;;  %v5591_v29 = vld [vmem:[%s9251_s15 + $0x588] sm:$0xff]  ;;  %v5625_v34 = vld [vmem:[%s9251_s15 + $0x678] sm:$0xff] }
 0x955   : > { %3340 = vmatpush.msrb.mxu0 %v3080_v31  ;;  %3531 = vmatpush.msrb.mxu1 %v5519_v22  ;;  %v5589_v31 = vld [vmem:[%s9251_s15 + $0x578] sm:$0xff] }
 0x956   : > { %3510 = vmatpush.msra.mxu2 %v5489_v32  ;;  %3468 = vmatpush.msrb.mxu3 %v5492_v38  ;;  %v5587_v32 = vld [vmem:[%s9251_s15 + $0x568] sm:$0xff]  ;;  %v5581_v38 = vld [vmem:[%s9251_s15 + $0x538] sm:$0xff] }
 0x957   : > { %3341 = vmatpush.msrb.mxu0 %v3078_v57  ;;  %v5585_v57 = vld [vmem:[%s9251_s15 + $0x558] sm:$0xff] }
 0x958   : > { %3511 = vmatpush.msra.mxu2 %v5487_v35  ;;  %3469 = vmatpush.msrb.mxu3 %v5490_v39  ;;  %v5577_v39 = vld [vmem:[%s9251_s15 + $0x518] sm:$0xff] }
 0x959   : > { %3342 = vmatpush.msrb.mxu0 %v3076_v27  ;;  %v5583_v27 = vld [vmem:[%s9251_s15 + $0x548] sm:$0xff]  ;;  %v5621_v22 = vld [vmem:[%s9251_s15 + $0x658] sm:$0xff] }
 0x95a   : > { %3729 = vmatpush.msrb.mxu2 %v7525_v8  ;;  %3343 = vmatmul.f32.vlgmr.msrb.gmra.mxu0 %v7661_v50  ;;  %v5550_v50 = vld [vmem:[%s9251_s15 + $0x460] sm:$0xff] }
 0x95b   : > { %3558 = vmatpush.msra.mxu0 %v7525_v8  ;;  %3470 = vmatpush.msrb.mxu3 %v5488_v42  ;;  %v7988_v42 = vld [vmem:[#allocation11 + $0x10] sm:$0xf] }
 0x95d   : > { %3627 = vmatpush.msrb.mxu0 %v5560_v26  ;;  %3471 = vmatpush.msrb.mxu3 %v5486_v46  ;;  %v5579_v26 = vld [vmem:[%s9251_s15 + $0x528] sm:$0xff] }
 0x95f   : > { %3628 = vmatpush.msrb.mxu0 %v5558_v40  ;;  %3667 = vmatpush.msra.mxu3 %v5561_v47  ;;  %v5575_v47 = vld [vmem:[%s9251_s15 + $0x508] sm:$0xff] }
 0x961   : > { %3629 = vmatpush.msrb.mxu0 %v5556_v44  ;;  %3668 = vmatpush.msra.mxu3 %v5559_v49  ;;  %v5602_v49 = vld [vmem:[%s9251_s15 + $0x5e0] sm:$0xff] }
 0x962   : > { %5528 = vmatmul.msk.f32.vlgmr.msra.gmra.mxu0 %vm3031_vm7, %v7824_v45 }
 0x963   : > { %3630 = vmatpush.msrb.mxu0 %v5554_v48  ;;  %3669 = vmatpush.msra.mxu3 %v5557_v41  ;;  %v5604_v48 = vld [vmem:[%s9251_s15 + $0x5f0] sm:$0xff] }
 0x965   : > { %3631 = vmatpush.msrb.mxu0 %v5552_v3  ;;  %3670 = vmatpush.msra.mxu3 %v5555_v51  ;;  %v5600_v3 = vld [vmem:[%s9251_s15 + $0x5d0] sm:$0xff] }
 0x967   : > { %3632 = vmatpush.msrb.mxu0 %v5550_v50  ;;  %3671 = vmatpush.msra.mxu3 %v5553_v52  ;;  %v5598_v50 = vld [vmem:[%s9251_s15 + $0x5c0] sm:$0xff] }
 0x969   : > { %3672 = vmatpush.msra.mxu3 %v5551_v53  ;;  %3633 = vmatpush.msrb.mxu0 %v5548_v60  ;;  %v5596_v53 = vld [vmem:[%s9251_s15 + $0x5b0] sm:$0xff] }
 0x96a   : > { %v5588_v60 = vld [vmem:[%s9251_s15 + $0x570] sm:$0xff] }
 0x96b   : > { %3673 = vmatpush.msra.mxu3 %v5549_v54  ;;  %3634 = vmatpush.msrb.mxu0 %v5546_v62  ;;  %v5584_v62 = vld [vmem:[%s9251_s15 + $0x550] sm:$0xff] }
 0x96d   : > { %3674 = vmatpush.msra.mxu3 %v5547_v55  ;;  %3635 = vmatpush.msrb.mxu0 %v5544_v0 }
 0x96f   : > { %3675 = vmatpush.msra.mxu3 %v5545_v56  ;;  %3636 = vmatpush.msrb.mxu0 %v5542_v2  ;;  %v5594_v56 = vld [vmem:[%s9251_s15 + $0x5a0] sm:$0xff] }
 0x971   : > { %3676 = vmatpush.msra.mxu3 %v5543_v58  ;;  %3637 = vmatpush.msrb.mxu0 %v5540_v5  ;;  %v5592_v58 = vld [vmem:[%s9251_s15 + $0x590] sm:$0xff] }
 0x973   : > { %3677 = vmatpush.msra.mxu3 %v5541_v59  ;;  %3638 = vmatpush.msrb.mxu0 %v5538_v9  ;;  %v5590_v59 = vld [vmem:[%s9251_s15 + $0x580] sm:$0xff] }
 0x975   : > { %3678 = vmatpush.msra.mxu3 %v5539_v61  ;;  %3639 = vmatpush.msrb.mxu0 %v5536_v12  ;;  %v5586_v61 = vld [vmem:[%s9251_s15 + $0x560] sm:$0xff]  ;;  %v5645_v12 = vld [vmem:[%s9251_s15 + $0x718] sm:$0xff] }
 0x977   : > { %3679 = vmatpush.msra.mxu3 %v5537_v63  ;;  %3640 = vmatpush.msrb.mxu0 %v5534_v14  ;;  %v5582_v63 = vld [vmem:[%s9251_s15 + $0x540] sm:$0xff]  ;;  %v5641_v14 = vld [vmem:[%s9251_s15 + $0x6f8] sm:$0xff] }
 0x979   : > { %3680 = vmatpush.msra.mxu3 %v5535_v1  ;;  %3641 = vmatpush.msrb.mxu0 %v5532_v17  ;;  %v5580_v1 = vld [vmem:[%s9251_s15 + $0x530] sm:$0xff]  ;;  %v5633_v17 = vld [vmem:[%s9251_s15 + $0x6b8] sm:$0xff] }
 0x97b   : > { %3681 = vmatpush.msra.mxu3 %v5533_v4  ;;  %3642 = vmatpush.msrb.mxu0 %v5530_v19  ;;  %v5578_v4 = vld [vmem:[%s9251_s15 + $0x520] sm:$0xff]  ;;  %v5629_v19 = vld [vmem:[%s9251_s15 + $0x698] sm:$0xff] }
 0x97d   : > { %3682 = vmatpush.msra.mxu3 %v5531_v6  ;;  %3838 = vmatpush.msra.mxu0 %v5605_v20  ;;  %v5574_v6 = vld [vmem:[%s9251_s15 + $0x500] sm:$0xff]  ;;  %v5627_v20 = vld [vmem:[%s9251_s15 + $0x688] sm:$0xff] }
 0x97f   : > { %3839 = vmatpush.msra.mxu0 %v5603_v21  ;;  %v5623_v21 = vld [vmem:[%s9251_s15 + $0x668] sm:$0xff] }
 0x981   : > { %3840 = vmatpush.msra.mxu0 %v5601_v23  ;;  %v5619_v23 = vld [vmem:[%s9251_s15 + $0x648] sm:$0xff] }
 0x983   : > { %3841 = vmatpush.msra.mxu0 %v5599_v24  ;;  %v5568_v24 = vld [vmem:[%s9251_s15 + $0x4f0] sm:$0xff] }
 0x985   : > { %3842 = vmatpush.msra.mxu0 %v5597_v25  ;;  %v5566_v25 = vld [vmem:[%s9251_s15 + $0x4e0] sm:$0xff] }
 0x987   : > { %3843 = vmatpush.msra.mxu0 %v5595_v43  ;;  %v5564_v43 = vld [vmem:[%s9251_s15 + $0x4d0] sm:$0xff] }
 0x989   : > { %3844 = vmatpush.msra.mxu0 %v5593_v28  ;;  %v5562_v28 = vld [vmem:[%s9251_s15 + $0x4c0] sm:$0xff] }
 0x98b   : > { %3845 = vmatpush.msra.mxu0 %v5591_v29  ;;  %v5569_v29 = vld [vmem:[%s9251_s15 + $0x4f8] sm:$0xff] }
 0x98d   : > { %3846 = vmatpush.msra.mxu0 %v5589_v31  ;;  %v5565_v31 = vld [vmem:[%s9251_s15 + $0x4d8] sm:$0xff] }
 0x98f   : > { %3847 = vmatpush.msra.mxu0 %v5587_v32  ;;  %v5563_v32 = vld [vmem:[%s9251_s15 + $0x4c8] sm:$0xff] }
 0x991   : > { %3848 = vmatpush.msra.mxu0 %v5585_v57 }
 0x993   : > { %3849 = vmatpush.msra.mxu0 %v5583_v27 }
 0x995   : > { %3850 = vmatpush.msra.mxu0 %v5581_v38  ;;  %v5690_v38 = vld [vmem:[%s9251_s15 + $0x860] sm:$0xff] }
 0x997   : > { %3851 = vmatpush.msra.mxu0 %v5579_v26  ;;  %v5866_v26 = vld [vmem:[%s7187_s10 + $0x18] sm:$0xff] }
 0x999   : > { %3852 = vmatpush.msra.mxu0 %v5577_v39 }
 0x99b   : > { %3853 = vmatpush.msra.mxu0 %v5575_v47  ;;  %v5868_v47 = vld [vmem:[%s7187_s10 + $0x8] sm:$0xff] }
 0x9ae   : > { %v3261_v30 = vpop.f32.mrf.mxu1 }
 0x9b4   : > { %v3221_v33 = vpop.f32.mrf.mxu2 }
 0x9b6   : > { %v3389_v35 = vpop.f32.mrf.mxu1 }
 0x9b7   : > { %3472 = vmatmul.f32.vlgmr.msrb.gmra.mxu3 %v3389_v35  ;;  %3512 = vmatmul.f32.vlgmr.msra.gmra.mxu2 %v3389_v35  ;;  %v3281_v36 = vpop.f32.mrf.mxu0 }
 0x9b8   : > { %3900 = vmatpush.msrb.mxu3 %v7525_v8  ;;  %v3282_v37 = vadd.f32 %v3281_v36, %v3261_v30  ;;  %3798 = vmatpush.msra.mxu2 %v5604_v48  ;;  %v5567_v30 = vld [vmem:[%s9251_s15 + $0x4e8] sm:$0xff]  ;;  %v8143_v48 = vld [vmem:[#allocation11 + $0x18] sm:$0xf] }
 0x9ba   : > { %3799 = vmatpush.msra.mxu2 %v5602_v49  ;;  %v5684_v49 = vld [vmem:[%s9251_s15 + $0x830] sm:$0xff] }
 0x9bc   : > { %v3364_v40 = vpop.f32.mrf.mxu2  ;;  %3800 = vmatpush.msra.mxu2 %v5600_v3  ;;  %v5869_v3 = vld [vmem:[%s7187_s10] sm:$0xff] }
 0x9be   : > { %v3241_v44 = vpop.f32.mrf.mxu3  ;;  %3801 = vmatpush.msra.mxu2 %v5598_v50 }
 0x9bf   : > { %5572 = vmatmul.msk.f32.vlgmr.msrb.gmra.mxu2 %vm3031_vm7, %v7988_v42  ;;  %v3242_v46 = vadd.f32 %v3241_v44, %v3221_v33  ;;  %v3324_v54 = vpop.f32.mrf.mxu0  ;;  %v5867_v44 = vld [vmem:[%s7187_s10 + $0x10] sm:$0xff] }
 0x9c0   : > { %3802 = vmatpush.msra.mxu2 %v5596_v53  ;;  %v5680_v53 = vld [vmem:[%s9251_s15 + $0x810] sm:$0xff] }
 0x9c2   : > { %3803 = vmatpush.msra.mxu2 %v5594_v56 }
 0x9c4   : > { %v3409_v41 = vpop.f32.mrf.mxu2  ;;  %3804 = vmatpush.msra.mxu2 %v5592_v58  ;;  %v5674_v58 = vld [vmem:[%s9251_s15 + $0x7e0] sm:$0xff] }
 0x9c5   : > { %5526 = vmatmul.msk.f32.vlgmr.msra.gmra.mxu1 %vm1940_vm3, %v3409_v41 }
 0x9c6   : > { %3578 = vmatpush.msra.mxu1 %v7532_v11  ;;  %v3304_v51 = vpop.f32.mrf.mxu3  ;;  %3805 = vmatpush.msra.mxu2 %v5590_v59  ;;  %v5672_v59 = vld [vmem:[%s9251_s15 + $0x7d0] sm:$0xff] }
 0x9c7   : > { %v3305_v52 = vadd.f32 %v3304_v51, %v3242_v46  ;;  %v5686_v46 = vld [vmem:[%s9251_s15 + $0x840] sm:$0xff] }
 0x9c8   : > { %3806 = vmatpush.msra.mxu2 %v5588_v60  ;;  %v5682_v51 = vld [vmem:[%s9251_s15 + $0x820] sm:$0xff] }
 0x9c9   : > { %v8012_v55 = vadd.f32 %v3324_v54, %v3305_v52  ;;  %v5678_v54 = vld [vmem:[%s9251_s15 + $0x800] sm:$0xff] }
 0x9ca   : > { %3807 = vmatpush.msra.mxu2 %v5586_v61  ;;  %v5670_v60 = vld [vmem:[%s9251_s15 + $0x7c0] sm:$0xff]  ;;  %v5668_v61 = vld [vmem:[%s9251_s15 + $0x7b0] sm:$0xff] }
 0x9cc   : > { %3808 = vmatpush.msra.mxu2 %v5584_v62  ;;  %v5666_v62 = vld [vmem:[%s9251_s15 + $0x7a0] sm:$0xff] }
 0x9cd   : > { %5527 = vmatmul.msk.f32.vlgmr.msrb.gmra.mxu1 %vm1940_vm3, %v3409_v41 }
 0x9ce   : > { %3809 = vmatpush.msra.mxu2 %v5582_v63  ;;  %3659 = vmatpush.msrb.mxu1 %v5568_v24  ;;  %v5664_v63 = vld [vmem:[%s9251_s15 + $0x790] sm:$0xff] }
 0x9d0   : > { %3810 = vmatpush.msra.mxu2 %v5580_v1  ;;  %3660 = vmatpush.msrb.mxu1 %v5566_v25  ;;  %v4359_v1 = vld [vmem:[%s9256_s20 + $0x178] sm:$0xff]  ;;  %v5607_v25 = vld [vmem:[%s9251_s15 + $0x608] sm:$0xff] }
 0x9d2   : > { %3811 = vmatpush.msra.mxu2 %v5578_v4  ;;  %3661 = vmatpush.msrb.mxu1 %v5564_v43  ;;  %v4353_v4 = vld [vmem:[%s9256_s20 + $0x148] sm:$0xff]  ;;  %v3881_v43 = vld [vmem:[#allocation11 + $0x14] sm:$0xf] }
 0x9d4   : > { %3662 = vmatpush.msrb.mxu1 %v5562_v28 }
 0x9d5   : > { %5529 = vmatmul.msk.f32.vlgmr.msra.gmra.mxu1 %vm3031_vm7, %v7824_v45  ;;  %v5576_v45 = vld [vmem:[%s9251_s15 + $0x510] sm:$0xff] }
 0x9d6   : > { %3812 = vmatpush.msra.mxu2 %v5576_v45  ;;  %3699 = vmatpush.msra.mxu1 %v5569_v29  ;;  %v4347_v45 = vld [vmem:[%s9256_s20 + $0x118] sm:$0xff] }
 0x9d7   : > { %v3344_v0 = vpop.f32.mrf.mxu0  ;;  %v5870_v29 = vld [vmem:[%s7489_s2] sm:$0xff] }
 0x9d8   : > { %v3345_v2 = vadd.f32 %v3344_v0, %v3282_v37  ;;  %3813 = vmatpush.msra.mxu2 %v5574_v6  ;;  %3700 = vmatpush.msra.mxu1 %v5567_v30  ;;  %v5692_v37 = vld [vmem:[%s9251_s15 + $0x870] sm:$0xff]  ;;  %v5662_v0 = vld [vmem:[%s9251_s15 + $0x780] sm:$0xff]  ;;  %v4341_v6 = vld [vmem:[%s9256_s20 + $0xe8] sm:$0xff] }
 0x9da   : > { %v8044_v5 = vadd.f32 %v3364_v40, %v3345_v2  ;;  %4009 = vmatpush.msrb.mxu2 %v5649_v7  ;;  %3701 = vmatpush.msra.mxu1 %v5565_v31  ;;  %v5688_v40 = vld [vmem:[%s9251_s15 + $0x850] sm:$0xff]  ;;  %v4356_v2 = vld [vmem:[%s9256_s20 + $0x160] sm:$0xff] }
 0x9db   : > { %v4338_v7 = vld [vmem:[%s9256_s20 + $0xd0] sm:$0xff] }
 0x9dc   : > { %4010 = vmatpush.msrb.mxu2 %v5647_v10  ;;  %3702 = vmatpush.msra.mxu1 %v5563_v32  ;;  %v4332_v10 = vld [vmem:[%s9256_s20 + $0xa0] sm:$0xff]  ;;  %v5648_v32 = vld [vmem:[%s9251_s15 + $0x730] sm:$0xff] }
 0x9de   : > { %4011 = vmatpush.msrb.mxu2 %v5645_v12  ;;  %v4329_v12 = vld [vmem:[%s9256_s20 + $0x88] sm:$0xff] }
 0x9df   : > { %v3560_v9 = vpop.f32.mrf.mxu0 }
 0x9e0   : > { %3643 = vmatmul.f32.vlgmr.msrb.gmra.mxu0 %v3560_v9  ;;  %3683 = vmatmul.f32.vlgmr.msra.gmra.mxu3 %v3560_v9  ;;  %v4335_v9 = vld [vmem:[%s9256_s20 + $0xb8] sm:$0xff] }
 0x9e1   : > { %4071 = vmatpush.msrb.mxu0 %v7525_v8  ;;  %4012 = vmatpush.msrb.mxu2 %v5643_v13  ;;  %v5639_v8 = vld [vmem:[%s9251_s15 + $0x6e8] sm:$0xff]  ;;  %v4326_v13 = vld [vmem:[%s9256_s20 + $0x70] sm:$0xff] }
 0x9e2   : > { %3969 = vmatpush.msra.mxu3 %v5648_v32  ;;  %v4239_v32 = vld [vmem:[%s9253_s17] sm:$0xf] }
 0x9e3   : > { %4013 = vmatpush.msrb.mxu2 %v5641_v14  ;;  %v4323_v14 = vld [vmem:[%s9256_s20 + $0x58] sm:$0xff] }
 0x9e5   : > { %4014 = vmatpush.msrb.mxu2 %v5639_v8  ;;  %v4320_v8 = vld [vmem:[%s9256_s20 + $0x40] sm:$0xff] }
 0x9e7   : > { %4015 = vmatpush.msrb.mxu2 %v5637_v15  ;;  %v4317_v15 = vld [vmem:[%s9256_s20 + $0x28] sm:$0xff] }
 0x9e8   : > { %5616 = vmatmul.msk.f32.vlgmr.msrb.gmra.mxu3 %vm3031_vm7, %v3881_v43 }
 0x9e9   : > { %4016 = vmatpush.msrb.mxu2 %v5635_v16  ;;  %v4314_v16 = vld [vmem:[%s9256_s20 + $0x10] sm:$0xff] }
 0x9eb   : > { %4017 = vmatpush.msrb.mxu2 %v5633_v17  ;;  %v5612_v17 = vld [vmem:[%s9251_s15 + $0x630] sm:$0xff] }
 0x9ed   : > { %4018 = vmatpush.msrb.mxu2 %v5631_v18  ;;  %v5610_v18 = vld [vmem:[%s9251_s15 + $0x620] sm:$0xff] }
 0x9ef   : > { %4019 = vmatpush.msrb.mxu2 %v5629_v19  ;;  %v5608_v19 = vld [vmem:[%s9251_s15 + $0x610] sm:$0xff] }
 0x9f1   : > { %4020 = vmatpush.msrb.mxu2 %v5627_v20 }
 0x9f3   : > { %4021 = vmatpush.msrb.mxu2 %v5625_v34  ;;  %v5606_v34 = vld [vmem:[%s9251_s15 + $0x600] sm:$0xff] }
 0x9f5   : > { %4022 = vmatpush.msrb.mxu2 %v5623_v21  ;;  %v5613_v21 = vld [vmem:[%s9251_s15 + $0x638] sm:$0xff] }
 0x9f7   : > { %4023 = vmatpush.msrb.mxu2 %v5621_v22  ;;  %v5611_v22 = vld [vmem:[%s9251_s15 + $0x628] sm:$0xff] }
 0x9f9   : > { %4024 = vmatpush.msrb.mxu2 %v5619_v23  ;;  %v5609_v23 = vld [vmem:[%s9251_s15 + $0x618] sm:$0xff] }
 0xa3a   : > { %v3513_v33 = vpop.f32.mrf.mxu2  ;;  %v3473_v57 = vpop.f32.mrf.mxu3 }
 0xa42   : > { %v3493_v35 = vpop.f32.mrf.mxu1  ;;  %v3731_v36 = vpop.f32.mrf.mxu2 }
 0xa43   : > { %v3494_v27 = vadd.f32 %v3493_v35, %v3473_v57  ;;  %3814 = vmatmul.f32.vlgmr.msra.gmra.mxu2 %v3731_v36  ;;  %3854 = vmatmul.f32.vlgmr.msra.gmra.mxu0 %v3731_v36  ;;  %v5644_v35 = vld [vmem:[%s9251_s15 + $0x710] sm:$0xff]  ;;  %v5642_v36 = vld [vmem:[%s9251_s15 + $0x700] sm:$0xff] }
 0xa44   : > { %4303 = vmatpush.msra.mxu2 %v5866_v26  ;;  %4140 = vmatpush.msra.mxu0 %v5692_v37  ;;  %v5640_v37 = vld [vmem:[%s9251_s15 + $0x6f0] sm:$0xff] }
 0xa45   : > { %v8133_v39 = vadd.f32 %v3494_v27, %v8012_v55  ;;  %v5676_v55 = vld [vmem:[%s9251_s15 + $0x7f0] sm:$0xff] }
 0xa46   : > { %4304 = vmatpush.msra.mxu2 %v5867_v44  ;;  %4141 = vmatpush.msra.mxu0 %v5690_v38  ;;  %v5636_v44 = vld [vmem:[%s9251_s15 + $0x6d0] sm:$0xff] }
 0xa48   : > { %4305 = vmatpush.msra.mxu2 %v5868_v47  ;;  %4142 = vmatpush.msra.mxu0 %v5688_v40  ;;  %v5632_v47 = vld [vmem:[%s9251_s15 + $0x6b0] sm:$0xff] }
 0xa4a   : > { %4306 = vmatpush.msra.mxu2 %v5869_v3  ;;  %v3533_v41 = vpop.f32.mrf.mxu1  ;;  %4143 = vmatpush.msra.mxu0 %v5686_v46  ;;  %v5634_v46 = vld [vmem:[%s9251_s15 + $0x6c0] sm:$0xff] }
 0xa4b   : > { %v3534_v50 = vadd.f32 %v3533_v41, %v3513_v33  ;;  %5660 = vmatmul.msk.f32.vlgmr.msrb.gmra.mxu0 %vm3031_vm7, %v8143_v48  ;;  %v5646_v33 = vld [vmem:[%s9251_s15 + $0x720] sm:$0xff]  ;;  %v5628_v41 = vld [vmem:[%s9251_s15 + $0x690] sm:$0xff] }
 0xa4c   : > { %4144 = vmatpush.msra.mxu0 %v5684_v49  ;;  %3970 = vmatpush.msra.mxu3 %v5646_v33  ;;  %v5630_v3 = vld [vmem:[%s9251_s15 + $0x6a0] sm:$0xff] }
 0xa4d   : > { %v8155_v52 = vadd.f32 %v3534_v50, %v8044_v5  ;;  %v4350_v5 = vld [vmem:[%s9256_s20 + $0x130] sm:$0xff]  ;;  %v5626_v50 = vld [vmem:[%s9251_s15 + $0x680] sm:$0xff] }
 0xa4e   : > { %4145 = vmatpush.msra.mxu0 %v5682_v51  ;;  %3971 = vmatpush.msra.mxu3 %v5644_v35  ;;  %v5656_v51 = vld [vmem:[%s9251_s15 + $0x770] sm:$0xff] }
 0xa50   : > { %4146 = vmatpush.msra.mxu0 %v5680_v53  ;;  %3972 = vmatpush.msra.mxu3 %v5642_v36  ;;  %v5654_v53 = vld [vmem:[%s9251_s15 + $0x760] sm:$0xff] }
 0xa52   : > { %v3580_v56 = vpop.f32.mrf.mxu1  ;;  %4147 = vmatpush.msra.mxu0 %v5678_v54  ;;  %3973 = vmatpush.msra.mxu3 %v5640_v37  ;;  %v5622_v54 = vld [vmem:[%s9251_s15 + $0x660] sm:$0xff] }
 0xa53   : > { %5570 = vmatmul.msk.f32.vlgmr.msrb.gmra.mxu1 %vm1940_vm3, %v3580_v56 }
 0xa54   : > { %3749 = vmatpush.msrb.mxu1 %v7532_v11  ;;  %4148 = vmatpush.msra.mxu0 %v5676_v55  ;;  %v5652_v55 = vld [vmem:[%s9251_s15 + $0x750] sm:$0xff] }
 0xa56   : > { %4149 = vmatpush.msra.mxu0 %v5674_v58  ;;  %v5650_v58 = vld [vmem:[%s9251_s15 + $0x740] sm:$0xff] }
 0xa58   : > { %4150 = vmatpush.msra.mxu0 %v5672_v59  ;;  %v5618_v59 = vld [vmem:[%s9251_s15 + $0x640] sm:$0xff] }
 0xa5a   : > { %4151 = vmatpush.msra.mxu0 %v5670_v60  ;;  %v5657_v60 = vld [vmem:[%s9251_s15 + $0x778] sm:$0xff] }
 0xa5b   : > { %5571 = vmatmul.msk.f32.vlgmr.msra.gmra.mxu1 %vm1940_vm3, %v3580_v56  ;;  %v5620_v56 = vld [vmem:[%s9251_s15 + $0x650] sm:$0xff] }
 0xa5c   : > { %4152 = vmatpush.msra.mxu0 %v5668_v61  ;;  %3830 = vmatpush.msra.mxu1 %v5612_v17  ;;  %v5700_v17 = vld [vmem:[%s9251_s15 + $0x8b0] sm:$0xff] }
 0xa5d   : > { %v3644_v20 = vpop.f32.mrf.mxu0 }
 0xa5e   : > { %4153 = vmatpush.msra.mxu0 %v5666_v62  ;;  %3831 = vmatpush.msra.mxu1 %v5610_v18  ;;  %v5655_v62 = vld [vmem:[%s9251_s15 + $0x768] sm:$0xff] }
 0xa5f   : > { %v5675_v18 = vld [vmem:[%s9251_s15 + $0x7e8] sm:$0xff] }
 0xa60   : > { %4154 = vmatpush.msra.mxu0 %v5664_v63  ;;  %3832 = vmatpush.msra.mxu1 %v5608_v19  ;;  %v5653_v63 = vld [vmem:[%s9251_s15 + $0x758] sm:$0xff]  ;;  %v5696_v19 = vld [vmem:[%s9251_s15 + $0x890] sm:$0xff] }
 0xa62   : > { %4155 = vmatpush.msra.mxu0 %v5662_v0  ;;  %3833 = vmatpush.msra.mxu1 %v5606_v34  ;;  %v5651_v0 = vld [vmem:[%s9251_s15 + $0x748] sm:$0xff]  ;;  %v5694_v34 = vld [vmem:[%s9251_s15 + $0x880] sm:$0xff] }
 0xa63   : > { %5573 = vmatmul.msk.f32.vlgmr.msrb.gmra.mxu1 %vm3031_vm7, %v7988_v42  ;;  %v4344_v42 = vld [vmem:[%s9256_s20 + $0x100] sm:$0xff]  ;;  %v3684_v27 = vpop.f32.mrf.mxu3 }
 0xa64   : > { %4423 = vmatpush.msrb.mxu0 %v4359_v1  ;;  %3870 = vmatpush.msrb.mxu1 %v5613_v21  ;;  %v5671_v21 = vld [vmem:[%s9251_s15 + $0x7c8] sm:$0xff] }
 0xa66   : > { %4424 = vmatpush.msrb.mxu0 %v4356_v2  ;;  %3871 = vmatpush.msrb.mxu1 %v5611_v22  ;;  %v5701_v22 = vld [vmem:[%s9251_s15 + $0x8b8] sm:$0xff] }
 0xa68   : > { %4425 = vmatpush.msrb.mxu0 %v4353_v4  ;;  %3872 = vmatpush.msrb.mxu1 %v5609_v23  ;;  %v5669_v23 = vld [vmem:[%s9251_s15 + $0x7b8] sm:$0xff] }
 0xa6a   : > { %4426 = vmatpush.msrb.mxu0 %v4350_v5  ;;  %3873 = vmatpush.msrb.mxu1 %v5607_v25  ;;  %v5693_v5 = vld [vmem:[%s9251_s15 + $0x878] sm:$0xff]  ;;  %v5667_v25 = vld [vmem:[%s9251_s15 + $0x7a8] sm:$0xff] }
 0xa6b   : > { %v3902_v61 = vpop.f32.mrf.mxu3 }
 0xa6c   : > { %4427 = vmatpush.msrb.mxu0 %v4347_v45  ;;  %4025 = vmatmul.f32.vlgmr.msrb.gmra.mxu2 %v3902_v61  ;;  %v5691_v45 = vld [vmem:[%s9251_s15 + $0x868] sm:$0xff] }
 0xa6e   : > { %4428 = vmatpush.msrb.mxu0 %v4344_v42 }
 0xa70   : > { %4429 = vmatpush.msrb.mxu0 %v4341_v6  ;;  %v5689_v6 = vld [vmem:[%s9251_s15 + $0x858] sm:$0xff] }
 0xa72   : > { %4430 = vmatpush.msrb.mxu0 %v4338_v7  ;;  %v5687_v7 = vld [vmem:[%s9251_s15 + $0x848] sm:$0xff] }
 0xa74   : > { %4431 = vmatpush.msrb.mxu0 %v4335_v9  ;;  %v5685_v9 = vld [vmem:[%s9251_s15 + $0x838] sm:$0xff]  ;;  %5704 = vmatmul.msk.f32.vlgmr.msra.gmra.mxu2 %vm1940_vm3, %v4239_v32  ;;  %v4264_v32 = vld [vmem:[%s9254_s18 + $0xc0] sm:$0xff] }
 0xa76   : > { %4432 = vmatpush.msrb.mxu0 %v4332_v10 }
 0xa78   : > { %4433 = vmatpush.msrb.mxu0 %v4329_v12 }
 0xa7a   : > { %4434 = vmatpush.msrb.mxu0 %v4326_v13  ;;  %v5683_v13 = vld [vmem:[%s9251_s15 + $0x828] sm:$0xff] }
 0xa7c   : > { %4435 = vmatpush.msrb.mxu0 %v4323_v14 }
 0xa7e   : > { %4436 = vmatpush.msrb.mxu0 %v4320_v8 }
 0xa80   : > { %4437 = vmatpush.msrb.mxu0 %v4317_v15  ;;  %v5681_v15 = vld [vmem:[%s9251_s15 + $0x818] sm:$0xff] }
 0xa82   : > { %4438 = vmatpush.msrb.mxu0 %v4314_v16  ;;  %v5679_v16 = vld [vmem:[%s9251_s15 + $0x808] sm:$0xff] }
 0xac0   : > { %v8261_v24 = vpop.f32.mrf.mxu0 }
 0xac6   : > { %v3815_v1 = vpop.f32.mrf.mxu2 }
 0xac8   : > { %v8267_v28 = vpop.f32.mrf.mxu0 }
 0xac9   : > { %4156 = vmatmul.f32.vlgmr.msra.gmra.mxu0 %v8267_v28 }
 0xaca   : > { %4570 = vmatpush.msra.mxu0 %v5870_v29  ;;  %v5665_v29 = vld [vmem:[%s9251_s15 + $0x798] sm:$0xff] }
 0xad0   : > { %v3664_v30 = vpop.f32.mrf.mxu1 }
 0xad1   : > { %v3665_v31 = vadd.f32 %v3664_v30, %v3644_v20  ;;  %v5673_v20 = vld [vmem:[%s9251_s15 + $0x7d8] sm:$0xff]  ;;  %v5695_v30 = vld [vmem:[%s9251_s15 + $0x888] sm:$0xff] }
 0xad3   : > { %v8278_v57 = vadd.f32 %v3665_v31, %v8133_v39  ;;  %v5638_v39 = vld [vmem:[%s9251_s15 + $0x6e0] sm:$0xff]  ;;  %v5663_v31 = vld [vmem:[%s9251_s15 + $0x788] sm:$0xff] }
 0xad4   : > { %3974 = vmatpush.msra.mxu3 %v5638_v39  ;;  %v4354_v39 = vld [vmem:[%s9256_s20 + $0x150] sm:$0xff] }
 0xad6   : > { %3975 = vmatpush.msra.mxu3 %v5636_v44  ;;  %v4351_v44 = vld [vmem:[%s9256_s20 + $0x138] sm:$0xff] }
 0xad8   : > { %v3704_v38 = vpop.f32.mrf.mxu1  ;;  %3976 = vmatpush.msra.mxu3 %v5634_v46  ;;  %v5871_v46 = vld [vmem:[%s7314_s27 + $0x8] sm:$0xff] }
 0xad9   : > { %v3705_v26 = vadd.f32 %v3704_v38, %v3684_v27 }
 0xada   : > { %3977 = vmatpush.msra.mxu3 %v5632_v47  ;;  %v4348_v47 = vld [vmem:[%s9256_s20 + $0x120] sm:$0xff] }
 0xadb   : > { %v8293_v40 = vadd.f32 %v3705_v26, %v8155_v52  ;;  %v5624_v52 = vld [vmem:[%s9251_s15 + $0x670] sm:$0xff] }
 0xadc   : > { %3978 = vmatpush.msra.mxu3 %v5630_v3  ;;  %v4345_v3 = vld [vmem:[%s9256_s20 + $0x108] sm:$0xff] }
 0xade   : > { %3979 = vmatpush.msra.mxu3 %v5628_v41  ;;  %v4342_v41 = vld [vmem:[%s9256_s20 + $0xf0] sm:$0xff] }
 0xae0   : > { %v3751_v49 = vpop.f32.mrf.mxu1  ;;  %3980 = vmatpush.msra.mxu3 %v5626_v50  ;;  %v4358_v50 = vld [vmem:[%s9256_s20 + $0x170] sm:$0xff] }
 0xae1   : > { %5614 = vmatmul.msk.f32.vlgmr.msra.gmra.mxu1 %vm1940_vm3, %v3751_v49 }
 0xae2   : > { %3920 = vmatpush.msra.mxu1 %v7532_v11  ;;  %3981 = vmatpush.msra.mxu3 %v5624_v52  ;;  %v4355_v52 = vld [vmem:[%s9256_s20 + $0x158] sm:$0xff] }
 0xae4   : > { %3982 = vmatpush.msra.mxu3 %v5622_v54  ;;  %v4352_v54 = vld [vmem:[%s9256_s20 + $0x140] sm:$0xff] }
 0xae6   : > { %3983 = vmatpush.msra.mxu3 %v5620_v56  ;;  %v4349_v56 = vld [vmem:[%s9256_s20 + $0x128] sm:$0xff] }
 0xae8   : > { %3984 = vmatpush.msra.mxu3 %v5618_v59  ;;  %v4311_v59 = vld [vmem:[%s9255_s19] sm:$0xf] }
 0xae9   : > { %5615 = vmatmul.msk.f32.vlgmr.msrb.gmra.mxu1 %vm1940_vm3, %v3751_v49  ;;  %3985 = vmatmul.f32.vlgmr.msra.gmra.mxu3 %v3902_v61  ;;  %v5872_v49 = vld [vmem:[%s7314_s27] sm:$0xff] }
 0xaea   : > { %4001 = vmatpush.msrb.mxu1 %v5656_v51  ;;  %4180 = vmatpush.msrb.mxu3 %v5693_v5  ;;  %v4339_v51 = vld [vmem:[%s9256_s20 + $0xd8] sm:$0xff] }
 0xaeb   : > { %v4327_v61 = vld [vmem:[%s9256_s20 + $0x78] sm:$0xff] }
 0xaec   : > { %4002 = vmatpush.msrb.mxu1 %v5654_v53  ;;  %4181 = vmatpush.msrb.mxu3 %v5691_v45  ;;  %v4336_v53 = vld [vmem:[%s9256_s20 + $0xc0] sm:$0xff]  ;;  %v4331_v5 = vld [vmem:[%s9256_s20 + $0x98] sm:$0xff] }
 0xaed   : > { %v4328_v45 = vld [vmem:[%s9256_s20 + $0x80] sm:$0xff] }
 0xaee   : > { %4003 = vmatpush.msrb.mxu1 %v5652_v55  ;;  %4182 = vmatpush.msrb.mxu3 %v5689_v6  ;;  %v4333_v55 = vld [vmem:[%s9256_s20 + $0xa8] sm:$0xff]  ;;  %v4322_v6 = vld [vmem:[%s9256_s20 + $0x50] sm:$0xff] }
 0xaef   : > { %v4026_v27 = vpop.f32.mrf.mxu2 }
 0xaf0   : > { %4004 = vmatpush.msrb.mxu1 %v5650_v58  ;;  %4183 = vmatpush.msrb.mxu3 %v5687_v7  ;;  %v4330_v58 = vld [vmem:[%s9256_s20 + $0x90] sm:$0xff]  ;;  %v4319_v7 = vld [vmem:[%s9256_s20 + $0x38] sm:$0xff] }
 0xaf1   : > { %5617 = vmatmul.msk.f32.vlgmr.msra.gmra.mxu1 %vm3031_vm7, %v3881_v43  ;;  %v5697_v43 = vld [vmem:[%s9251_s15 + $0x898] sm:$0xff] }
 0xaf2   : > { %4041 = vmatpush.msra.mxu1 %v5657_v60  ;;  %4184 = vmatpush.msrb.mxu3 %v5685_v9  ;;  %v4346_v60 = vld [vmem:[%s9256_s20 + $0x110] sm:$0xff]  ;;  %v4316_v9 = vld [vmem:[%s9256_s20 + $0x20] sm:$0xff] }
 0xaf4   : > { %4042 = vmatpush.msra.mxu1 %v5655_v62  ;;  %4185 = vmatpush.msrb.mxu3 %v5683_v13  ;;  %v4343_v62 = vld [vmem:[%s9256_s20 + $0xf8] sm:$0xff]  ;;  %v4284_v13 = vld [vmem:[%s9254_s18 + $0x160] sm:$0xff] }
 0xaf6   : > { %4043 = vmatpush.msra.mxu1 %v5653_v63  ;;  %4186 = vmatpush.msrb.mxu3 %v5681_v15  ;;  %v4324_v63 = vld [vmem:[%s9256_s20 + $0x60] sm:$0xff]  ;;  %v4275_v15 = vld [vmem:[%s9254_s18 + $0x118] sm:$0xff] }
 0xaf8   : > { %4044 = vmatpush.msra.mxu1 %v5651_v0  ;;  %4187 = vmatpush.msrb.mxu3 %v5679_v16  ;;  %v4340_v0 = vld [vmem:[%s9256_s20 + $0xe0] sm:$0xff] }
 0xaf9   : > { %v4272_v16 = vld [vmem:[%s9254_s18 + $0x100] sm:$0xff] }
 0xb5e   : > { %v3835_v2 = vpop.f32.mrf.mxu1 }
 0xb5f   : > { %v3836_v4 = vadd.f32 %v3835_v2, %v3815_v1  ;;  %v4321_v1 = vld [vmem:[%s9256_s20 + $0x48] sm:$0xff] }
 0xb60   : > { %v4337_v2 = vld [vmem:[%s9256_s20 + $0xc8] sm:$0xff] }
 0xb61   : > { %v3878_v42 = vadd.f32 %v3836_v4, %v8278_v57  ;;  %v4334_v4 = vld [vmem:[%s9256_s20 + $0xb0] sm:$0xff] }
 0xb66   : > { %v3875_v10 = vpop.f32.mrf.mxu1 }
 0xb67   : > { %v3876_v12 = vadd.f32 %v3875_v10, %v8261_v24  ;;  %v5699_v24 = vld [vmem:[%s9251_s15 + $0x8a8] sm:$0xff] }
 0xb68   : > { %v4313_v10 = vld [vmem:[%s9256_s20 + $0x8] sm:$0xff] }
 0xb69   : > { %v3879_v14 = vadd.f32 %v3876_v12, %v8293_v40  ;;  %v4287_v12 = vld [vmem:[%s9254_s18 + $0x178] sm:$0xff] }
 0xb6c   : > { %v3986_v33 = vpop.f32.mrf.mxu3 }
 0xb6e   : > { %v3922_v8 = vpop.f32.mrf.mxu1 }
 0xb6f   : > { %5658 = vmatmul.msk.f32.vlgmr.msrb.gmra.mxu1 %vm1940_vm3, %v3922_v8 }
 0xb70   : > { %4091 = vmatpush.msrb.mxu1 %v7532_v11  ;;  %v5677_v11 = vld [vmem:[%s9251_s15 + $0x7f8] sm:$0xff] }
 0xb71   : > { %4188 = vmatpush.msrb.mxu3 %v5677_v11  ;;  %v4285_v11 = vld [vmem:[%s9254_s18 + $0x168] sm:$0xff] }
 0xb73   : > { %4189 = vmatpush.msrb.mxu3 %v5675_v18  ;;  %v4318_v18 = vld [vmem:[%s9256_s20 + $0x30] sm:$0xff] }
 0xb75   : > { %4190 = vmatpush.msrb.mxu3 %v5673_v20  ;;  %v4315_v20 = vld [vmem:[%s9256_s20 + $0x18] sm:$0xff] }
 0xb77   : > { %5659 = vmatmul.msk.f32.vlgmr.msra.gmra.mxu1 %vm1940_vm3, %v3922_v8  ;;  %4191 = vmatpush.msrb.mxu3 %v5671_v21  ;;  %v4278_v8 = vld [vmem:[%s9254_s18 + $0x130] sm:$0xff]  ;;  %v4312_v21 = vld [vmem:[%s9256_s20] sm:$0xff] }
 0xb78   : > { %4172 = vmatpush.msra.mxu1 %v5700_v17  ;;  %v4269_v17 = vld [vmem:[%s9254_s18 + $0xe8] sm:$0xff] }
 0xb79   : > { %4192 = vmatpush.msrb.mxu3 %v5669_v23  ;;  %v4273_v23 = vld [vmem:[%s9254_s18 + $0x108] sm:$0xff] }
 0xb7b   : > { %4193 = vmatpush.msrb.mxu3 %v5667_v25  ;;  %v4270_v25 = vld [vmem:[%s9254_s18 + $0xf0] sm:$0xff] }
 0xb7d   : > { %4194 = vmatpush.msrb.mxu3 %v5665_v29  ;;  %v4267_v29 = vld [vmem:[%s9254_s18 + $0xd8] sm:$0xff] }
 0xb7f   : > { %5661 = vmatmul.msk.f32.vlgmr.msrb.gmra.mxu1 %vm3031_vm7, %v8143_v48  ;;  %v5698_v48 = vld [vmem:[%s9251_s15 + $0x8a0] sm:$0xff]  ;;  %4195 = vmatpush.msrb.mxu3 %v5663_v31  ;;  %v4277_v31 = vld [vmem:[%s9254_s18 + $0x128] sm:$0xff] }
 0xb80   : > { %4173 = vmatpush.msra.mxu1 %v5698_v48  ;;  %4196 = vmatmul.f32.vlgmr.msrb.gmra.mxu3 %v8267_v28  ;;  %v4357_v28 = vld [vmem:[%s9256_s20 + $0x168] sm:$0xff]  ;;  %v4282_v48 = vld [vmem:[%s9254_s18 + $0x150] sm:$0xff] }
 0xb81   : > { %4383 = vmatpush.msrb.mxu2 %v4357_v28  ;;  %4443 = vmatpush.msra.mxu3 %v4285_v11  ;;  %v4257_v28 = vld [vmem:[%s9254_s18 + $0x88] sm:$0xff] }
 0xb82   : > { %4174 = vmatpush.msra.mxu1 %v5696_v19  ;;  %v4279_v19 = vld [vmem:[%s9254_s18 + $0x138] sm:$0xff]  ;;  %v4549_v11 = vld [vmem:[%s9258_s22 + $0x168] sm:$0xff] }
 0xb83   : > { %4384 = vmatpush.msrb.mxu2 %v4354_v39  ;;  %4444 = vmatpush.msra.mxu3 %v4282_v48  ;;  %v4268_v39 = vld [vmem:[%s9254_s18 + $0xe0] sm:$0xff]  ;;  %v4538_v48 = vld [vmem:[%s9258_s22 + $0x110] sm:$0xff] }
 0xb84   : > { %4175 = vmatpush.msra.mxu1 %v5694_v34  ;;  %v4276_v34 = vld [vmem:[%s9254_s18 + $0x120] sm:$0xff] }
 0xb85   : > { %4385 = vmatpush.msrb.mxu2 %v4351_v44  ;;  %4445 = vmatpush.msra.mxu3 %v4279_v19  ;;  %v4254_v44 = vld [vmem:[%s9254_s18 + $0x70] sm:$0xff]  ;;  %v4535_v19 = vld [vmem:[%s9258_s22 + $0xf8] sm:$0xff] }
 0xb86   : > { %4212 = vmatpush.msrb.mxu1 %v5701_v22  ;;  %v4286_v22 = vld [vmem:[%s9254_s18 + $0x170] sm:$0xff] }
 0xb87   : > { %4386 = vmatpush.msrb.mxu2 %v4348_v47  ;;  %4446 = vmatpush.msra.mxu3 %v4276_v34  ;;  %v4252_v47 = vld [vmem:[%s9254_s18 + $0x60] sm:$0xff] }
 0xb88   : > { %4213 = vmatpush.msrb.mxu1 %v5699_v24  ;;  %v4283_v24 = vld [vmem:[%s9254_s18 + $0x158] sm:$0xff] }
 0xb89   : > { %4387 = vmatpush.msrb.mxu2 %v4345_v3  ;;  %4447 = vmatpush.msra.mxu3 %v4273_v23  ;;  %v4262_v3 = vld [vmem:[%s9254_s18 + $0xb0] sm:$0xff]  ;;  %v4545_v23 = vld [vmem:[%s9258_s22 + $0x148] sm:$0xff] }
 0xb8a   : > { %4214 = vmatpush.msrb.mxu1 %v5697_v43  ;;  %v4280_v43 = vld [vmem:[%s9254_s18 + $0x140] sm:$0xff] }
 0xb8b   : > { %4388 = vmatpush.msrb.mxu2 %v4342_v41  ;;  %4448 = vmatpush.msra.mxu3 %v4270_v25  ;;  %v4249_v41 = vld [vmem:[%s9254_s18 + $0x48] sm:$0xff] }
 0xb8c   : > { %4215 = vmatpush.msrb.mxu1 %v5695_v30  ;;  %v4266_v30 = vld [vmem:[%s9254_s18 + $0xd0] sm:$0xff] }
 0xb8d   : > { %4389 = vmatpush.msrb.mxu2 %v4339_v51  ;;  %4449 = vmatpush.msra.mxu3 %v4267_v29  ;;  %v4259_v51 = vld [vmem:[%s9254_s18 + $0x98] sm:$0xff]  ;;  %v4529_v29 = vld [vmem:[%s9258_s22 + $0xc8] sm:$0xff] }
 0xb8f   : > { %4390 = vmatpush.msrb.mxu2 %v4336_v53  ;;  %4450 = vmatpush.msra.mxu3 %v4264_v32  ;;  %v4245_v53 = vld [vmem:[%s9254_s18 + $0x28] sm:$0xff]  ;;  %v4526_v32 = vld [vmem:[%s9258_s22 + $0xb0] sm:$0xff] }
 0xb91   : > { %4391 = vmatpush.msrb.mxu2 %v4333_v55  ;;  %v4243_v55 = vld [vmem:[%s9254_s18 + $0x18] sm:$0xff] }
 0xb93   : > { %4392 = vmatpush.msrb.mxu2 %v4330_v58  ;;  %v4253_v58 = vld [vmem:[%s9254_s18 + $0x68] sm:$0xff] }
 0xb95   : > { %4393 = vmatpush.msrb.mxu2 %v4327_v61  ;;  %v4250_v61 = vld [vmem:[%s9254_s18 + $0x50] sm:$0xff] }
 0xb97   : > { %4394 = vmatpush.msrb.mxu2 %v4324_v63  ;;  %v4244_v63 = vld [vmem:[%s9254_s18 + $0x20] sm:$0xff] }
 0xb99   : > { %4395 = vmatpush.msrb.mxu2 %v4321_v1 }
 0xb9b   : > { %4396 = vmatpush.msrb.mxu2 %v4318_v18  ;;  %v4551_v18 = vld [vmem:[%s9258_s22 + $0x178] sm:$0xff] }
 0xb9d   : > { %4397 = vmatpush.msrb.mxu2 %v4315_v20  ;;  %v4548_v20 = vld [vmem:[%s9258_s22 + $0x160] sm:$0xff] }
 0xb9f   : > { %4398 = vmatpush.msrb.mxu2 %v4312_v21  ;;  %v4543_v21 = vld [vmem:[%s9258_s22 + $0x138] sm:$0xff] }
 0xba1   : > { %4463 = vmatpush.msra.mxu2 %v4286_v22  ;;  %v4532_v22 = vld [vmem:[%s9258_s22 + $0xe0] sm:$0xff] }
 0xba3   : > { %4464 = vmatpush.msra.mxu2 %v4283_v24  ;;  %v4503_v24 = vld [vmem:[%s9257_s21] sm:$0xf] }
 0xba5   : > { %4465 = vmatpush.msra.mxu2 %v4280_v43  ;;  %v4540_v43 = vld [vmem:[%s9258_s22 + $0x120] sm:$0xff] }
 0xba7   : > { %4466 = vmatpush.msra.mxu2 %v4277_v31  ;;  %v4537_v31 = vld [vmem:[%s9258_s22 + $0x108] sm:$0xff] }
 0xbec   : > { %v4006_v57 = vpop.f32.mrf.mxu1 }
 0xbed   : > { %v4007_v35 = vadd.f32 %v4006_v57, %v3986_v33  ;;  %v4263_v33 = vld [vmem:[%s9254_s18 + $0xb8] sm:$0xff]  ;;  %v4274_v57 = vld [vmem:[%s9254_s18 + $0x110] sm:$0xff] }
 0xbee   : > { %4467 = vmatpush.msra.mxu2 %v4274_v57  ;;  %v4534_v57 = vld [vmem:[%s9258_s22 + $0xf0] sm:$0xff] }
 0xbef   : > { %v8438_v36 = vadd.f32 %v4007_v35, %v3878_v42  ;;  %v4325_v42 = vld [vmem:[%s9256_s20 + $0x68] sm:$0xff] }
 0xbf0   : > { %v4261_v35 = vld [vmem:[%s9254_s18 + $0xa8] sm:$0xff] }
 0xbf1   : > { %4451 = vmatpush.msra.mxu3 %v4261_v35  ;;  %v4523_v35 = vld [vmem:[%s9258_s22 + $0x98] sm:$0xff] }
 0xbf4   : > { %v4046_v37 = vpop.f32.mrf.mxu1 }
 0xbf5   : > { %v4047_v38 = vadd.f32 %v4046_v37, %v4026_v27  ;;  %v4260_v27 = vld [vmem:[%s9254_s18 + $0xa0] sm:$0xff]  ;;  %v4271_v37 = vld [vmem:[%s9254_s18 + $0xf8] sm:$0xff] }
 0xbf6   : > { %4468 = vmatpush.msra.mxu2 %v4271_v37  ;;  %v4638_v37 = vld [vmem:[%s9338_s29] sm:$0xf]  ;;  %s6067_s29 = sshra.s32 %s4963_s4, 4  ;;  %s6068_s29 = int_to_ptr.hbm [resolvable:$true] %s6067_s29 }
 0xbf7   : > { %v8440_v26 = vadd.f32 %v4047_v38, %v3879_v14  ;;  %v4281_v14 = vld [vmem:[%s9254_s18 + $0x148] sm:$0xff]  ;;  %v4258_v38 = vld [vmem:[%s9254_s18 + $0x90] sm:$0xff]  ;;  %s6069_s26 = scalar_lea.hbm %s6068_s29, 32  ;;  %p6074_p3 = scmp.lt.s32.totalorder %s6068_s29, %s9341_s11 }
 0xbf8   : > { %4452 = vmatpush.msra.mxu3 %v4258_v38  ;;  %4469 = vmatpush.msra.mxu2 %v4268_v39  ;;  %v4531_v38 = vld [vmem:[%s9258_s22 + $0xd8] sm:$0xff]  ;;  %v4533_v39 = vld [vmem:[%s9258_s22 + $0xe8] sm:$0xff]  ;;  %p6070_p0 = scmp.ne.s32.totalorder %s6068_s29, %s6069_s26  ;;  %p6075_p4 = scmp.lt.s32.totalorder %s6073_s12, %s6069_s26 }
 0xbfa   : > { %p6071_p1 = pnand %p6070_p0, %p6422_p5  ;;  %p6076_p7 = por %p6075_p4, %p6074_p3 }
 0xbfc   : > { %v4093_v40 = vpop.f32.mrf.mxu1  ;;  %p6072_p2 = pneg %p6071_p1 }
 0xbfd   : > { %5702 = vmatmul.msk.f32.vlgmr.msra.gmra.mxu1 %vm1940_vm3, %v4093_v40 }
 0xbfe   : > { %4377 = vmatpush.msra.mxu1 %v5871_v46  ;;  %v4265_v46 = vld [vmem:[%s9254_s18 + $0xc8] sm:$0xff]  ;;  %p6077_p8 = pnand %p6076_p7, %p6072_p2 }
 0xbff   : > { %4470 = vmatpush.msra.mxu2 %v4265_v46  ;;  %v4530_v46 = vld [vmem:[%s9258_s22 + $0xd0] sm:$0xff] }
 0xc00   : > { %4378 = vmatpush.msra.mxu1 %v5872_v49  ;;  %v4251_v49 = vld [vmem:[%s9254_s18 + $0x58] sm:$0xff] }
 0xc01   : > { %4471 = vmatpush.msra.mxu2 %v4262_v3  ;;  %v4527_v3 = vld [vmem:[%s9258_s22 + $0xb8] sm:$0xff] }
 0xc03   : > { %4472 = vmatpush.msra.mxu2 %v4259_v51  ;;  %v4524_v51 = vld [vmem:[%s9258_s22 + $0xa0] sm:$0xff] }
 0xc05   : > { %5703 = vmatmul.msk.f32.vlgmr.msrb.gmra.mxu1 %vm1940_vm3, %v4093_v40  ;;  %v4255_v40 = vld [vmem:[%s9254_s18 + $0x78] sm:$0xff] }
 0xc06   : > { %4403 = vmatpush.msrb.mxu1 %v4358_v50  ;;  %4453 = vmatpush.msra.mxu3 %v4255_v40  ;;  %v4248_v50 = vld [vmem:[%s9254_s18 + $0x40] sm:$0xff] }
 0xc07   : > { %v4528_v40 = vld [vmem:[%s9258_s22 + $0xc0] sm:$0xff] }
 0xc08   : > { %4404 = vmatpush.msrb.mxu1 %v4355_v52  ;;  %4454 = vmatpush.msra.mxu3 %v4252_v47  ;;  %v4246_v52 = vld [vmem:[%s9254_s18 + $0x30] sm:$0xff]  ;;  %v4525_v47 = vld [vmem:[%s9258_s22 + $0xa8] sm:$0xff] }
 0xc0a   : > { %4405 = vmatpush.msrb.mxu1 %v4352_v54  ;;  %4455 = vmatpush.msra.mxu3 %v4249_v41  ;;  %v4256_v54 = vld [vmem:[%s9254_s18 + $0x80] sm:$0xff]  ;;  %v4522_v41 = vld [vmem:[%s9258_s22 + $0x90] sm:$0xff] }
 0xc0b   : > { %4473 = vmatpush.msra.mxu2 %v4256_v54  ;;  %v4521_v54 = vld [vmem:[%s9258_s22 + $0x88] sm:$0xff] }
 0xc0c   : > { %4406 = vmatpush.msrb.mxu1 %v4349_v56  ;;  %4456 = vmatpush.msra.mxu3 %v4246_v52  ;;  %v4242_v56 = vld [vmem:[%s9254_s18 + $0x10] sm:$0xff]  ;;  %v4519_v52 = vld [vmem:[%s9258_s22 + $0x78] sm:$0xff] }
 0xc0d   : > { %5705 = vmatmul.msk.f32.vlgmr.msra.gmra.mxu1 %vm2507_vm5, %v4311_v59  ;;  %v4240_v59 = vld [vmem:[%s9254_s18] sm:$0xff]  ;;  %4474 = vmatpush.msra.mxu2 %v4253_v58  ;;  %v4518_v58 = vld [vmem:[%s9258_s22 + $0x70] sm:$0xff] }
 0xc0e   : > { %4407 = vmatpush.msrb.mxu1 %v4346_v60  ;;  %4457 = vmatpush.msra.mxu3 %v4243_v55  ;;  %v8678_v60 = vpop.f32.mrf.mxu2  ;;  %v4516_v55 = vld [vmem:[%s9258_s22 + $0x60] sm:$0xff] }
 0xc0f   : > { %4475 = vmatpush.msra.mxu2 %v4250_v61  ;;  %v4515_v61 = vld [vmem:[%s9258_s22 + $0x58] sm:$0xff] }
 0xc10   : > { %4408 = vmatpush.msrb.mxu1 %v4343_v62  ;;  %4458 = vmatpush.msra.mxu3 %v4240_v59  ;;  %v4247_v62 = vld [vmem:[%s9254_s18 + $0x38] sm:$0xff]  ;;  %v4513_v59 = vld [vmem:[%s9258_s22 + $0x48] sm:$0xff] }
 0xc11   : > { %4459 = vmatmul.f32.vlgmr.msra.gmra.mxu3 %v8678_v60  ;;  %4476 = vmatpush.msra.mxu2 %v4247_v62  ;;  %v4510_v62 = vld [vmem:[%s9258_s22 + $0x30] sm:$0xff] }
 0xc12   : > { %4409 = vmatpush.msrb.mxu1 %v4340_v0  ;;  %v4241_v0 = vld [vmem:[%s9254_s18 + $0x8] sm:$0xff] }
 0xc13   : > { %4477 = vmatpush.msra.mxu2 %v4244_v63  ;;  %v4729_v63 = vld [vmem:[%s9339_s0 + $0x2d0] sm:$0xff] }
 0xc14   : > { %4410 = vmatpush.msrb.mxu1 %v4337_v2  ;;  %v4157_v2 = vpop.f32.mrf.mxu0 }
 0xc15   : > { %4478 = vmatpush.msra.mxu2 %v4241_v0  ;;  %v4512_v0 = vld [vmem:[%s9258_s22 + $0x40] sm:$0xff] }
 0xc16   : > { %4411 = vmatpush.msrb.mxu1 %v4334_v4 }
 0xc18   : > { %4412 = vmatpush.msrb.mxu1 %v4331_v5  ;;  %v4222_v5 = vld [vmem:[%s9252_s16] sm:$0x3] }
 0xc1a   : > { %4413 = vmatpush.msrb.mxu1 %v4328_v45 }
 0xc1c   : > { %4414 = vmatpush.msrb.mxu1 %v4325_v42  ;;  %v4224_v42 = vperm.slane %v4222_v5, 0 }
 0xc1e   : > { %4415 = vmatpush.msrb.mxu1 %v4322_v6 }
 0xc20   : > { %4416 = vmatpush.msrb.mxu1 %v4319_v7  ;;  %v4197_v7 = vpop.f32.mrf.mxu3 }
 0xc22   : > { %4417 = vmatpush.msrb.mxu1 %v4316_v9  ;;  %v4550_v9 = vld [vmem:[%s9258_s22 + $0x170] sm:$0xff] }
 0xc23   : > { %4595 = vmatpush.msrb.mxu3 %v4550_v9  ;;  %v4733_v9 = vld [vmem:[%s9339_s0 + $0x2f0] sm:$0xff] }
 0xc24   : > { %4418 = vmatpush.msrb.mxu1 %v4313_v10  ;;  %v4547_v10 = vld [vmem:[%s9258_s22 + $0x158] sm:$0xff] }
 0xc25   : > { %4596 = vmatpush.msrb.mxu3 %v4547_v10  ;;  %v4681_v10 = vld [vmem:[%s9339_s0 + $0x150] sm:$0xff] }
 0xc26   : > { %4483 = vmatpush.msra.mxu1 %v4287_v12  ;;  %v4544_v12 = vld [vmem:[%s9258_s22 + $0x140] sm:$0xff] }
 0xc27   : > { %4597 = vmatpush.msrb.mxu3 %v4544_v12  ;;  %v4717_v12 = vld [vmem:[%s9339_s0 + $0x270] sm:$0xff] }
 0xc28   : > { %4484 = vmatpush.msra.mxu1 %v4284_v13 }
 0xc2a   : > { %4485 = vmatpush.msra.mxu1 %v4281_v14 }
 0xc2c   : > { %4486 = vmatpush.msra.mxu1 %v4278_v8 }
 0xc2e   : > { %4487 = vmatpush.msra.mxu1 %v4275_v15 }
 0xc30   : > { %4488 = vmatpush.msra.mxu1 %v4272_v16  ;;  %v4225_v16 = vperm.slane %v4222_v5, 1  ;;  %v4504_v5 = vld [vmem:[%s9258_s22] sm:$0xff] }
 0xc32   : > { %4489 = vmatpush.msra.mxu1 %v4269_v17 }
 0xc34   : > { %4490 = vmatpush.msra.mxu1 %v4266_v30  ;;  %v4542_v30 = vld [vmem:[%s9258_s22 + $0x130] sm:$0xff] }
 0xc36   : > { %4491 = vmatpush.msra.mxu1 %v4263_v33  ;;  %v4539_v33 = vld [vmem:[%s9258_s22 + $0x118] sm:$0xff] }
 0xc38   : > { %4492 = vmatpush.msra.mxu1 %v4260_v27  ;;  %v4536_v27 = vld [vmem:[%s9258_s22 + $0x100] sm:$0xff] }
 0xc3a   : > { %4493 = vmatpush.msra.mxu1 %v4257_v28  ;;  %v4520_v28 = vld [vmem:[%s9258_s22 + $0x80] sm:$0xff] }
 0xc3c   : > { %4494 = vmatpush.msra.mxu1 %v4254_v44  ;;  %v4517_v44 = vld [vmem:[%s9258_s22 + $0x68] sm:$0xff] }
 0xc3e   : > { %4495 = vmatpush.msra.mxu1 %v4251_v49  ;;  %v4514_v49 = vld [vmem:[%s9258_s22 + $0x50] sm:$0xff] }
 0xc40   : > { %4496 = vmatpush.msra.mxu1 %v4248_v50  ;;  %v4511_v50 = vld [vmem:[%s9258_s22 + $0x38] sm:$0xff] }
 0xc42   : > { %4497 = vmatpush.msra.mxu1 %v4245_v53  ;;  %v4508_v53 = vld [vmem:[%s9258_s22 + $0x20] sm:$0xff] }
 0xc44   : > { %4498 = vmatpush.msra.mxu1 %v4242_v56  ;;  %v4505_v56 = vld [vmem:[%s9258_s22 + $0x8] sm:$0xff] }
 0xc7a   : > { %v4177_v1 = vpop.f32.mrf.mxu1 }
 0xc7b   : > { %v4178_v4 = vadd.f32 %v4177_v1, %v4157_v2  ;;  %v4507_v1 = vld [vmem:[%s9258_s22 + $0x18] sm:$0xff] }
 0xc7c   : > { %v4726_v2 = vld [vmem:[%s9339_s0 + $0x2b8] sm:$0xff] }
 0xc7d   : > { %v4220_v45 = vadd.f32 %v4178_v4, %v8438_v36  ;;  %v4541_v36 = vld [vmem:[%s9258_s22 + $0x128] sm:$0xff] }
 0xc7e   : > { %4598 = vmatpush.msrb.mxu3 %v4541_v36  ;;  %v4509_v4 = vld [vmem:[%s9258_s22 + $0x28] sm:$0xff]  ;;  %v4714_v36 = vld [vmem:[%s9339_s0 + $0x258] sm:$0xff] }
 0xc7f   : > { %v4228_v13 = vadd.f32 %v4224_v42, %v4220_v45  ;;  %v4723_v45 = vld [vmem:[%s9339_s0 + $0x2a0] sm:$0xff]  ;;  %v4684_v42 = vld [vmem:[%s9339_s0 + $0x168] sm:$0xff] }
 0xc80   : > { %4599 = vmatpush.msrb.mxu3 %v4538_v48  ;;  %v4669_v48 = vld [vmem:[%s9339_s0 + $0xf0] sm:$0xff] }
 0xc81   : > { %v4230_v8 = vmax.f32 %v4228_v13, 0.0  ;;  %v4730_v13 = vld [vmem:[%s9339_s0 + $0x2d8] sm:$0xff] }
 0xc82   : > { %v4217_v6 = vpop.f32.mrf.mxu1  ;;  %4600 = vmatpush.msrb.mxu3 %v4535_v19  ;;  %v4702_v19 = vld [vmem:[%s9339_s0 + $0x1f8] sm:$0xff] }
 0xc83   : > { %v4218_v14 = vadd.f32 %v4217_v6, %v4197_v7  ;;  %v4506_v6 = vld [vmem:[%s9258_s22 + $0x10] sm:$0xff]  ;;  %v4720_v7 = vld [vmem:[%s9339_s0 + $0x288] sm:$0xff] }
 0xc84   : > { %4601 = vmatpush.msrb.mxu3 %v4532_v22  ;;  %v4682_v22 = vld [vmem:[%s9339_s0 + $0x158] sm:$0xff] }
 0xc85   : > { %v4221_v15 = vadd.f32 %v4218_v14, %v8440_v26  ;;  %v4546_v26 = vld [vmem:[%s9258_s22 + $0x150] sm:$0xff]  ;;  %v4678_v14 = vld [vmem:[%s9339_s0 + $0x138] sm:$0xff] }
 0xc86   : > { %4602 = vmatpush.msrb.mxu3 %v4529_v29  ;;  %v4699_v29 = vld [vmem:[%s9339_s0 + $0x1e0] sm:$0xff] }
 0xc87   : > { %v4229_v34 = vadd.f32 %v4225_v16, %v4221_v15  ;;  %v4675_v15 = vld [vmem:[%s9339_s0 + $0x120] sm:$0xff] }
 0xc88   : > { %4603 = vmatpush.msrb.mxu3 %v4526_v32  ;;  %v4711_v16 = vld [vmem:[%s9339_s0 + $0x240] sm:$0xff]  ;;  %v4721_v32 = vld [vmem:[%s9339_s0 + $0x290] sm:$0xff] }
 0xc89   : > { %v4231_v25 = vmax.f32 %v4229_v34, 0.0  ;;  %v4685_v34 = vld [vmem:[%s9339_s0 + $0x170] sm:$0xff] }
 0xc8a   : > { %v4380_v17 = vpop.f32.mrf.mxu1  ;;  %4604 = vmatpush.msrb.mxu3 %v4523_v35  ;;  %v4651_v35 = vld [vmem:[%s9339_s0 + $0x60] sm:$0xff] }
 0xc8b   : > { %4419 = vmatmul.f32.vlgmr.msrb.gmra.mxu1 %v4380_v17  ;;  %4439 = vmatmul.f32.vlgmr.msrb.gmra.mxu0 %v4380_v17 }
 0xc8c   : > { %5707 = vmatpush.msk.msrb.mxu1 %vm4739_vm8, %v4230_v8  ;;  %4399 = vmatmul.f32.vlgmr.msrb.gmra.mxu2 %v4380_v17  ;;  %v4727_v8 = vld [vmem:[%s9339_s0 + $0x2c0] sm:$0xff]  ;;  %v4672_v17 = vld [vmem:[%s9339_s0 + $0x108] sm:$0xff] }
 0xc8d   : > { %4575 = vmatpush.msrb.mxu0 %v4549_v11  ;;  %4615 = vmatpush.msrb.mxu2 %v4551_v18  ;;  %v4708_v11 = vld [vmem:[%s9339_s0 + $0x228] sm:$0xff]  ;;  %v4705_v18 = vld [vmem:[%s9339_s0 + $0x210] sm:$0xff] }
 0xc8e   : > { %4605 = vmatpush.msrb.mxu3 %v4520_v28  ;;  %v4690_v28 = vld [vmem:[%s9339_s0 + $0x198] sm:$0xff] }
 0xc8f   : > { %4576 = vmatpush.msrb.mxu0 %v4546_v26  ;;  %4616 = vmatpush.msrb.mxu2 %v4548_v20  ;;  %v4666_v26 = vld [vmem:[%s9339_s0 + $0xd8] sm:$0xff]  ;;  %v4663_v20 = vld [vmem:[%s9339_s0 + $0xc0] sm:$0xff] }
 0xc90   : > { %4606 = vmatpush.msrb.mxu3 %v4517_v44  ;;  %v4667_v44 = vld [vmem:[%s9339_s0 + $0xe0] sm:$0xff] }
 0xc91   : > { %4577 = vmatpush.msrb.mxu0 %v4543_v21  ;;  %4617 = vmatpush.msrb.mxu2 %v4545_v23  ;;  %v4660_v21 = vld [vmem:[%s9339_s0 + $0xa8] sm:$0xff]  ;;  %v4657_v23 = vld [vmem:[%s9339_s0 + $0x90] sm:$0xff] }
 0xc92   : > { %4607 = vmatpush.msrb.mxu3 %v4514_v49  ;;  %v4687_v49 = vld [vmem:[%s9339_s0 + $0x180] sm:$0xff] }
 0xc93   : > { %4499 = vmatmul.f32.vlgmr.msra.gmra.mxu1 %v8678_v60  ;;  %5706 = vmatmul.msk.f32.vlgmr.msra.gmra.mxu0 %vm3031_vm7, %v4503_v24  ;;  %v4679_v24 = vld [vmem:[%s9339_s0 + $0x140] sm:$0xff] }
 0xc94   : > { %5709 = vmatpush.msk.msra.mxu1 %vm4739_vm8, %v4231_v25  ;;  %4479 = vmatmul.f32.vlgmr.msra.gmra.mxu2 %v8678_v60  ;;  %v4732_v60 = vld [vmem:[%s9339_s0 + $0x2e8] sm:$0xff]  ;;  %v4654_v25 = vld [vmem:[%s9339_s0 + $0x78] sm:$0xff] }
 0xc95   : > { %4578 = vmatpush.msrb.mxu0 %v4540_v43  ;;  %4618 = vmatpush.msrb.mxu2 %v4542_v30  ;;  %v4676_v43 = vld [vmem:[%s9339_s0 + $0x128] sm:$0xff] }
 0xc96   : > { %4608 = vmatpush.msrb.mxu3 %v4511_v50  ;;  %v4724_v30 = vld [vmem:[%s9339_s0 + $0x2a8] sm:$0xff]  ;;  %v4709_v50 = vld [vmem:[%s9339_s0 + $0x230] sm:$0xff] }
 0xc97   : > { %4579 = vmatpush.msrb.mxu0 %v4537_v31  ;;  %4619 = vmatpush.msrb.mxu2 %v4539_v33  ;;  %v4696_v31 = vld [vmem:[%s9339_s0 + $0x1c8] sm:$0xff]  ;;  %v4693_v33 = vld [vmem:[%s9339_s0 + $0x1b0] sm:$0xff] }
 0xc98   : > { %4609 = vmatpush.msrb.mxu3 %v4508_v53  ;;  %v4658_v53 = vld [vmem:[%s9339_s0 + $0x98] sm:$0xff] }
 0xc99   : > { %4580 = vmatpush.msrb.mxu0 %v4534_v57  ;;  %4620 = vmatpush.msrb.mxu2 %v4536_v27  ;;  %v4718_v57 = vld [vmem:[%s9339_s0 + $0x278] sm:$0xff]  ;;  %v4648_v27 = vld [vmem:[%s9339_s0 + $0x48] sm:$0xff] }
 0xc9a   : > { %4610 = vmatpush.msrb.mxu3 %v4505_v56  ;;  %v4700_v56 = vld [vmem:[%s9339_s0 + $0x1e8] sm:$0xff] }
 0xc9b   : > { %5708 = vmatmul.msk.f32.vlgmr.msrb.gmra.mxu1 %vm4735_vm9, %v4638_v37  ;;  %4581 = vmatpush.msrb.mxu0 %v4531_v38  ;;  %v4670_v38 = vld [vmem:[%s9339_s0 + $0xf8] sm:$0xff] }
 0xc9c   : > { %4621 = vmatpush.msrb.mxu2 %v4533_v39  ;;  %4806 = vmatpush.msra.mxu3 %v4732_v60  ;;  %v4715_v39 = vld [vmem:[%s9339_s0 + $0x260] sm:$0xff]  ;;  %v4649_v60 = vld [vmem:[%s9339_s0 + $0x50] sm:$0xff] }
 0xc9d   : > { %4582 = vmatpush.msrb.mxu0 %v4528_v40  ;;  %4826 = vmatpush.msrb.mxu1 %v4685_v34  ;;  %v4645_v40 = vld [vmem:[%s9339_s0 + $0x30] sm:$0xff] }
 0xc9e   : > { %4622 = vmatpush.msrb.mxu2 %v4530_v46  ;;  %4807 = vmatpush.msra.mxu3 %v4729_v63  ;;  %v4642_v46 = vld [vmem:[%s9339_s0 + $0x18] sm:$0xff]  ;;  %v4691_v63 = vld [vmem:[%s9339_s0 + $0x1a0] sm:$0xff]  ;;  %v4665_v34 = vld [vmem:[%s9339_s0 + $0xd0] sm:$0xff] }
 0xc9f   : > { %4583 = vmatpush.msrb.mxu0 %v4525_v47  ;;  %4827 = vmatpush.msrb.mxu1 %v4682_v22  ;;  %v4664_v47 = vld [vmem:[%s9339_s0 + $0xc8] sm:$0xff]  ;;  %v4707_v22 = vld [vmem:[%s9339_s0 + $0x220] sm:$0xff] }
 0xca0   : > { %4623 = vmatpush.msrb.mxu2 %v4527_v3  ;;  %4808 = vmatpush.msra.mxu3 %v4726_v2  ;;  %v4712_v3 = vld [vmem:[%s9339_s0 + $0x248] sm:$0xff] }
 0xca1   : > { %4584 = vmatpush.msrb.mxu0 %v4522_v41  ;;  %4828 = vmatpush.msrb.mxu1 %v4679_v24  ;;  %v4639_v41 = vld [vmem:[%s9339_s0] sm:$0xff]  ;;  %v4640_v2 = vld [vmem:[%s9339_s0 + $0x8] sm:$0xff] }
 0xca2   : > { %4624 = vmatpush.msrb.mxu2 %v4524_v51  ;;  %4809 = vmatpush.msra.mxu3 %v4723_v45  ;;  %v4661_v51 = vld [vmem:[%s9339_s0 + $0xb0] sm:$0xff]  ;;  %v4734_v45 = vld [vmem:[%s9339_s0 + $0x2f8] sm:$0xff]  ;;  %v4704_v24 = vld [vmem:[%s9339_s0 + $0x208] sm:$0xff] }
 0xca3   : > { %5710 = vmatmul.msk.f32.vlgmr.msra.gmra.mxu1 %vm4735_vm9, %v4638_v37  ;;  %4585 = vmatpush.msrb.mxu0 %v4519_v52  ;;  %v4673_v37 = vld [vmem:[%s9339_s0 + $0x110] sm:$0xff]  ;;  %v4706_v52 = vld [vmem:[%s9339_s0 + $0x218] sm:$0xff] }
 0xca4   : > { %4625 = vmatpush.msrb.mxu2 %v4521_v54  ;;  %4810 = vmatpush.msra.mxu3 %v4720_v7  ;;  %v4703_v54 = vld [vmem:[%s9339_s0 + $0x200] sm:$0xff]  ;;  %v4686_v7 = vld [vmem:[%s9339_s0 + $0x178] sm:$0xff] }
 0xca5   : > { %4586 = vmatpush.msrb.mxu0 %v4516_v55  ;;  %4829 = vmatpush.msrb.mxu1 %v4676_v43  ;;  %v4655_v55 = vld [vmem:[%s9339_s0 + $0x80] sm:$0xff]  ;;  %v4701_v43 = vld [vmem:[%s9339_s0 + $0x1f0] sm:$0xff] }
 0xca6   : > { %4626 = vmatpush.msrb.mxu2 %v4518_v58  ;;  %4811 = vmatpush.msra.mxu3 %v4717_v12  ;;  %v4652_v58 = vld [vmem:[%s9339_s0 + $0x68] sm:$0xff]  ;;  %v4683_v12 = vld [vmem:[%s9339_s0 + $0x160] sm:$0xff] }
 0xca7   : > { %4587 = vmatpush.msrb.mxu0 %v4513_v59  ;;  %4830 = vmatpush.msrb.mxu1 %v4673_v37  ;;  %v4697_v59 = vld [vmem:[%s9339_s0 + $0x1d0] sm:$0xff]  ;;  %v4644_v37 = vld [vmem:[%s9339_s0 + $0x28] sm:$0xff] }
 0xca8   : > { %4627 = vmatpush.msrb.mxu2 %v4515_v61  ;;  %4812 = vmatpush.msra.mxu3 %v4714_v36  ;;  %v4694_v61 = vld [vmem:[%s9339_s0 + $0x1b8] sm:$0xff]  ;;  %v4725_v36 = vld [vmem:[%s9339_s0 + $0x2b0] sm:$0xff] }
 0xca9   : > { %4588 = vmatpush.msrb.mxu0 %v4510_v62  ;;  %4831 = vmatpush.msrb.mxu1 %v4670_v38  ;;  %v4646_v62 = vld [vmem:[%s9339_s0 + $0x38] sm:$0xff]  ;;  %v4641_v38 = vld [vmem:[%s9339_s0 + $0x10] sm:$0xff] }
 0xcaa   : > { %4628 = vmatpush.msrb.mxu2 %v4512_v0  ;;  %4813 = vmatpush.msra.mxu3 %v4711_v16  ;;  %v4643_v0 = vld [vmem:[%s9339_s0 + $0x20] sm:$0xff] }
 0xcab   : > { %4589 = vmatpush.msrb.mxu0 %v4507_v1  ;;  %4832 = vmatpush.msrb.mxu1 %v4667_v44  ;;  %v4688_v1 = vld [vmem:[%s9339_s0 + $0x188] sm:$0xff] }
 0xcac   : > { %4629 = vmatpush.msrb.mxu2 %v4509_v4  ;;  %4814 = vmatpush.msra.mxu3 %v4708_v11  ;;  %v4719_v11 = vld [vmem:[%s9339_s0 + $0x280] sm:$0xff] }
 0xcad   : > { %4590 = vmatpush.msrb.mxu0 %v4504_v5  ;;  %4833 = vmatpush.msrb.mxu1 %v4664_v47 }
 0xcae   : > { %4630 = vmatpush.msrb.mxu2 %v4506_v6  ;;  %4815 = vmatpush.msra.mxu3 %v4705_v18  ;;  %v4716_v18 = vld [vmem:[%s9339_s0 + $0x268] sm:$0xff] }
 0xcaf   : > { %4786 = vmatpush.msra.mxu0 %v4684_v42  ;;  %4834 = vmatpush.msrb.mxu1 %v4661_v51 }
 0xcb0   : > { %4846 = vmatpush.msra.mxu2 %v4733_v9  ;;  %4816 = vmatpush.msra.mxu3 %v4702_v19  ;;  %v4713_v19 = vld [vmem:[%s9339_s0 + $0x250] sm:$0xff] }
 0xcb1   : > { %4787 = vmatpush.msra.mxu0 %v4681_v10  ;;  %4835 = vmatpush.msrb.mxu1 %v4658_v53  ;;  %v4731_v10 = vld [vmem:[%s9339_s0 + $0x2e0] sm:$0xff] }
 0xcb2   : > { %4847 = vmatpush.msra.mxu2 %v4730_v13  ;;  %4817 = vmatpush.msra.mxu3 %v4699_v29  ;;  %v4728_v13 = vld [vmem:[%s9339_s0 + $0x2c8] sm:$0xff] }
 0xcb3   : > { %4788 = vmatpush.msra.mxu0 %v4678_v14  ;;  %4836 = vmatpush.msrb.mxu1 %v4655_v55  ;;  %v4680_v14 = vld [vmem:[%s9339_s0 + $0x148] sm:$0xff] }
 0xcb4   : > { %4848 = vmatpush.msra.mxu2 %v4727_v8  ;;  %4818 = vmatpush.msra.mxu3 %v4696_v31  ;;  %v4677_v8 = vld [vmem:[%s9339_s0 + $0x130] sm:$0xff]  ;;  %v4656_v29 = vld [vmem:[%s9339_s0 + $0x88] sm:$0xff] }
 0xcb5   : > { %4789 = vmatpush.msra.mxu0 %v4675_v15  ;;  %4837 = vmatpush.msrb.mxu1 %v4652_v58  ;;  %v4722_v15 = vld [vmem:[%s9339_s0 + $0x298] sm:$0xff]  ;;  %v4653_v31 = vld [vmem:[%s9339_s0 + $0x70] sm:$0xff] }
 0xcb6   : > { %4849 = vmatpush.msra.mxu2 %v4724_v30  ;;  %4819 = vmatpush.msra.mxu3 %v4693_v33  ;;  %v4698_v30 = vld [vmem:[%s9339_s0 + $0x1d8] sm:$0xff] }
 0xcb7   : > { %4790 = vmatpush.msra.mxu0 %v4672_v17  ;;  %4838 = vmatpush.msrb.mxu1 %v4649_v60  ;;  %v4674_v17 = vld [vmem:[%s9339_s0 + $0x118] sm:$0xff] }
 0xcb8   : > { %4850 = vmatpush.msra.mxu2 %v4721_v32  ;;  %4820 = vmatpush.msra.mxu3 %v4690_v28  ;;  %v4695_v32 = vld [vmem:[%s9339_s0 + $0x1c0] sm:$0xff]  ;;  %v4650_v33 = vld [vmem:[%s9339_s0 + $0x58] sm:$0xff] }
 0xcb9   : > { %4791 = vmatpush.msra.mxu0 %v4669_v48  ;;  %4839 = vmatpush.msrb.mxu1 %v4646_v62  ;;  %v4671_v48 = vld [vmem:[%s9339_s0 + $0x100] sm:$0xff] }
 0xcba   : > { %4851 = vmatpush.msra.mxu2 %v4718_v57  ;;  %4821 = vmatpush.msra.mxu3 %v4687_v49  ;;  %v4692_v57 = vld [vmem:[%s9339_s0 + $0x1a8] sm:$0xff] }
 0xcbb   : > { %4792 = vmatpush.msra.mxu0 %v4666_v26  ;;  %4840 = vmatpush.msrb.mxu1 %v4643_v0  ;;  %v4668_v26 = vld [vmem:[%s9339_s0 + $0xe8] sm:$0xff] }
 0xcbc   : > { %4852 = vmatpush.msra.mxu2 %v4715_v39 }
 0xcbd   : > { %4793 = vmatpush.msra.mxu0 %v4663_v20  ;;  %4841 = vmatpush.msrb.mxu1 %v4640_v2  ;;  %v4710_v20 = vld [vmem:[%s9339_s0 + $0x238] sm:$0xff] }
 0xcbe   : > { %4853 = vmatpush.msra.mxu2 %v4712_v3 }
 0xcbf   : > { %4794 = vmatpush.msra.mxu0 %v4660_v21 }
 0xcc0   : > { %4854 = vmatpush.msra.mxu2 %v4709_v50 }
 0xcc1   : > { %4795 = vmatpush.msra.mxu0 %v4657_v23  ;;  %v4662_v23 = vld [vmem:[%s9339_s0 + $0xb8] sm:$0xff] }
 0xcc2   : > { %4855 = vmatpush.msra.mxu2 %v4706_v52 }
 0xcc3   : > { %4796 = vmatpush.msra.mxu0 %v4654_v25  ;;  %v4659_v25 = vld [vmem:[%s9339_s0 + $0xa0] sm:$0xff] }
 0xcc4   : > { %4856 = vmatpush.msra.mxu2 %v4703_v54 }
 0xcc5   : > { %4797 = vmatpush.msra.mxu0 %v4651_v35  ;;  %v4647_v35 = vld [vmem:[%s9339_s0 + $0x40] sm:$0xff] }
 0xcc6   : > { %4857 = vmatpush.msra.mxu2 %v4700_v56 }
 0xcc7   : > { %4798 = vmatpush.msra.mxu0 %v4648_v27  ;;  %v4689_v27 = vld [vmem:[%s9339_s0 + $0x190] sm:$0xff] }
 0xcc8   : > { %4858 = vmatpush.msra.mxu2 %v4697_v59 }
 0xcc9   : > { %4799 = vmatpush.msra.mxu0 %v4645_v40 }
 0xcca   : > { %4859 = vmatpush.msra.mxu2 %v4694_v61 }
 0xccb   : > { %4800 = vmatpush.msra.mxu0 %v4642_v46 }
 0xccc   : > { %4860 = vmatpush.msra.mxu2 %v4691_v63 }
 0xccd   : > { %4801 = vmatpush.msra.mxu0 %v4639_v41 }
 0xcce   : > { %4861 = vmatpush.msra.mxu2 %v4688_v1 }
 0xd08   : > { %v9047_v4 = vpop.f32.mrf.mxu1  ;;  %v4440_v5 = vpop.f32.mrf.mxu0 }
 0xd10   : > { %v4500_v42 = vpop.f32.mrf.mxu1  ;;  %v4572_v6 = vpop.f32.mrf.mxu0 }
 0xd11   : > { %v9055_v9 = vadd.f32 %v4500_v42, %v4440_v5  ;;  %4591 = vmatmul.f32.vlgmr.msrb.gmra.mxu0 %v4572_v6  ;;  %4611 = vmatmul.f32.vlgmr.msrb.gmra.mxu3 %v4572_v6 }
 0xd12   : > { %4631 = vmatmul.f32.vlgmr.msrb.gmra.mxu2 %v4572_v6  ;;  %4886 = vmatpush.msrb.mxu3 %v4734_v45 }
 0xd13   : > { %4866 = vmatpush.msrb.mxu0 %v4686_v7 }
 0xd14   : > { %4887 = vmatpush.msrb.mxu3 %v4731_v10 }
 0xd15   : > { %4867 = vmatpush.msrb.mxu0 %v4683_v12 }
 0xd16   : > { %4888 = vmatpush.msrb.mxu3 %v4728_v13 }
 0xd17   : > { %4868 = vmatpush.msrb.mxu0 %v4680_v14 }
 0xd18   : > { %4889 = vmatpush.msrb.mxu3 %v4725_v36  ;;  %v4763_v16 = vpop.f32.mrf.mxu1 }
 0xd19   : > { %4869 = vmatpush.msrb.mxu0 %v4677_v8  ;;  %4842 = vmatmul.f32.vlgmr.msrb.gmra.mxu1 %v4763_v16 }
 0xd1a   : > { %4890 = vmatpush.msrb.mxu3 %v4722_v15  ;;  %4802 = vmatmul.f32.vlgmr.msra.gmra.mxu0 %v4763_v16 }
 0xd1b   : > { %4870 = vmatpush.msrb.mxu0 %v4674_v17 }
 0xd1c   : > { %4891 = vmatpush.msrb.mxu3 %v4719_v11 }
 0xd1d   : > { %4871 = vmatpush.msrb.mxu0 %v4671_v48 }
 0xd1e   : > { %4892 = vmatpush.msrb.mxu3 %v4716_v18 }
 0xd1f   : > { %4872 = vmatpush.msrb.mxu0 %v4668_v26 }
 0xd20   : > { %4893 = vmatpush.msrb.mxu3 %v4713_v19  ;;  %v4783_v21 = vpop.f32.mrf.mxu1 }
 0xd21   : > { %4822 = vmatmul.f32.vlgmr.msra.gmra.mxu3 %v4783_v21  ;;  %4862 = vmatmul.f32.vlgmr.msra.gmra.mxu2 %v4783_v21 }
 0xd22   : > { %4894 = vmatpush.msrb.mxu3 %v4710_v20  ;;  %4873 = vmatpush.msrb.mxu0 %v4665_v34 }
 0xd24   : > { %4895 = vmatpush.msrb.mxu3 %v4707_v22  ;;  %4874 = vmatpush.msrb.mxu0 %v4662_v23 }
 0xd26   : > { %4896 = vmatpush.msrb.mxu3 %v4704_v24  ;;  %4875 = vmatpush.msrb.mxu0 %v4659_v25 }
 0xd28   : > { %4897 = vmatpush.msrb.mxu3 %v4701_v43  ;;  %4876 = vmatpush.msrb.mxu0 %v4656_v29 }
 0xd2a   : > { %4898 = vmatpush.msrb.mxu3 %v4698_v30  ;;  %4877 = vmatpush.msrb.mxu0 %v4653_v31 }
 0xd2c   : > { %4899 = vmatpush.msrb.mxu3 %v4695_v32  ;;  %4878 = vmatpush.msrb.mxu0 %v4650_v33 }
 0xd2e   : > { %4900 = vmatpush.msrb.mxu3 %v4692_v57  ;;  %4879 = vmatpush.msrb.mxu0 %v4647_v35 }
 0xd30   : > { %4901 = vmatpush.msrb.mxu3 %v4689_v27  ;;  %4880 = vmatpush.msrb.mxu0 %v4644_v37 }
 0xd31   : > { %4902 = vmatmul.f32.vlgmr.msrb.gmra.mxu3 %v4783_v21 }
 0xd32   : > { %4881 = vmatpush.msrb.mxu0 %v4641_v38 }
 0xd33   : > { %4882 = vmatmul.f32.vlgmr.msrb.gmra.mxu0 %v4763_v16 }
 0xd34   : > { %6080 = shalt.err (!%p6077_p8)
}
 0xd35   : > { %s6235_s28 = smov 128   ;;  %s6236_s30 = smov 8  }
 0xd36   : > { %5767 = dma.vmem_to_hbm [thread:$0]  (%p6422_p5), %s4961_s23, 512, %s4963_s4, %s9153_s7, %s6235_s28, %s6235_s28, %s6236_s30  }
 0xd37   : > { %s4977_s8 = sshll.u32 %s7314_s27, 4  ;;  %s5724_s0 = sshll.u32 %s6403_s3, 4  ;;  %s4978_s8 = int_to_ptr.vmem [resolvable:$true] %s4977_s8 }
 0xd38   : > { %s9342_s13 = sld [smem:[#allocation52_spill]] }
 0xd3e   : > { %s4976_s14 = scalar_lea.hbm %s9342_s13, %s5724_s0  ;;  %s6101_s4 = scalar_lea.hbm %s9342_s13, 32 }
 0xd3f   : > { %s4979_s12 = sshll.u32 %s4976_s14, 4  ;;  %s4980_s12 = int_to_ptr.hbm [resolvable:$true] %s4979_s12 }
 0xd40   : > { %s6095_s29 = sshra.s32 %s4980_s12, 4  ;;  %s6096_s29 = int_to_ptr.hbm [resolvable:$true] %s6095_s29 }
 0xd41   : > { %s6097_s26 = scalar_lea.hbm %s6096_s29, 16  ;;  %p6102_p12 = scmp.lt.s32.totalorder %s6096_s29, %s9342_s13 }
 0xd42   : > { %p6098_p9 = scmp.ne.s32.totalorder %s6096_s29, %s6097_s26  ;;  %p6103_p13 = scmp.lt.s32.totalorder %s6101_s4, %s6097_s26 }
 0xd44   : > { %p6099_p10 = pnand %p6098_p9, %p6422_p5  ;;  %p6104_p0 = por %p6103_p13, %p6102_p12 }
 0xd46   : > { %p6100_p11 = pneg %p6099_p10 }
 0xd48   : > { %p6105_p1 = pnand %p6104_p0, %p6100_p11 }
 0xd4a   : > { %6108 = shalt.err (!%p6105_p1)
}
 0xd4b   : > { %5768 = dma.vmem_to_hbm [thread:$0]  (%p6422_p5), %s4978_s8, 256, %s4980_s12, %s9153_s7, %s6235_s28, %s6235_s28, %s6236_s30  }
 0xd4c   : > { %s5719_s0 = sshll.u32 %s6403_s3, 3  ;;  %s4994_s1 = sshll.u32 %s7489_s2, 4  ;;  %s4995_s1 = int_to_ptr.vmem [resolvable:$true] %s4994_s1 }
 0xd4d   : > { %s9343_s14 = sld [smem:[#allocation53_spill]]  ;;  %s4933_s26 = scalar_lea.sflag [#allocation18], %s7178_s9 }
 0xd53   : > { %s4992_s10 = scalar_lea.hbm %s9343_s14, %s5719_s0  ;;  %s6129_s7 = scalar_lea.hbm %s9343_s14, 16 }
 0xd54   : > { %s4996_s29 = sshll.u32 %s4992_s10, 4  ;;  %s4997_s29 = int_to_ptr.hbm [resolvable:$true] %s4996_s29 }
 0xd55   : > { %s6123_s4 = sshra.s32 %s4997_s29, 4  ;;  %s6124_s4 = int_to_ptr.hbm [resolvable:$true] %s6123_s4 }
 0xd56   : > { %s6125_s27 = scalar_lea.hbm %s6124_s4, 8  ;;  %p6130_p7 = scmp.lt.s32.totalorder %s6124_s4, %s9343_s14 }
 0xd57   : > { %p6126_p2 = scmp.ne.s32.totalorder %s6124_s4, %s6125_s27  ;;  %p6131_p8 = scmp.lt.s32.totalorder %s6129_s7, %s6125_s27 }
 0xd59   : > { %p6127_p3 = pnand %p6126_p2, %p6422_p5  ;;  %p6132_p9 = por %p6131_p8, %p6130_p7 }
 0xd5b   : > { %p6128_p4 = pneg %p6127_p3 }
 0xd5d   : > { %p6133_p10 = pnand %p6132_p9, %p6128_p4 }
 0xd5f   : > { %6136 = shalt.err (!%p6133_p10)
}
 0xd60   : > { %5769 = dma.vmem_to_hbm [thread:$0]  (%p6422_p5), %s4995_s1, 128, %s4997_s29, %s4933_s26   ;;  %v4400_v28 = vpop.f32.mrf.mxu2  ;;  %v4460_v40 = vpop.f32.mrf.mxu3  ;;  %vm4915_vm10 = vcmask 912384  }
 0xd61   : > { %v4461_v52 = vadd.f32 %v4460_v40, %v4400_v28  ;;  %s5740_s30 = smul.u32 12, %s7178_s9  ;;  %s9344_s1 = sld [smem:[#allocation50_spill]] }
 0xd62   : > { %s5741_s13 = smul.u32 12, %s6403_s3  ;;  %s4918_s29 = scalar_lea.sflag [#allocation4], %s7178_s9 }
 0xd63   : > { %s945_s8 = scalar_lea.vmem [#allocation13], %s5740_s30 }
 0xd64   : > { %s4946_s6 = sshll.u32 %s945_s8, 4  ;;  %s4947_s6 = int_to_ptr.vmem [resolvable:$true] %s4946_s6 }
 0xd67   : > { %s4944_s11 = scalar_lea.hbm %s9344_s1, %s5741_s13  ;;  %s6157_s23 = scalar_lea.hbm %s9344_s1, 24 }
 0xd68   : > { %v4480_v39 = vpop.f32.mrf.mxu2  ;;  %s4948_s10 = sshll.u32 %s4944_s11, 4  ;;  %s4949_s10 = int_to_ptr.hbm [resolvable:$true] %s4948_s10 }
 0xd69   : > { %v4481_v49 = vadd.f32 %v4480_v39, %v9047_v4  ;;  %s6151_s26 = sshra.s32 %s4949_s10, 4  ;;  %s6152_s26 = int_to_ptr.hbm [resolvable:$true] %s6151_s26 }
 0xd6a   : > { %s6153_s3 = scalar_lea.hbm %s6152_s26, 12  ;;  %p6158_p0 = scmp.lt.s32.totalorder %s6152_s26, %s9344_s1 }
 0xd6b   : > { %p6154_p11 = scmp.ne.s32.totalorder %s6152_s26, %s6153_s3  ;;  %p6159_p1 = scmp.lt.s32.totalorder %s6157_s23, %s6153_s3 }
 0xd6d   : > { %p6155_p12 = pnand %p6154_p11, %p6422_p5  ;;  %p6160_p2 = por %p6159_p1, %p6158_p0 }
 0xd6f   : > { %p6156_p13 = pneg %p6155_p12 }
 0xd71   : > { %p6161_p3 = pnand %p6160_p2, %p6156_p13 }
 0xd8e   : > { %v4592_v44 = vpop.f32.mrf.mxu0 }
 0xd8f   : > { %v4635_v56 = vadd.f32 %v4592_v44, %v4461_v52 }
 0xd94   : > { %v4612_v46 = vpop.f32.mrf.mxu3 }
 0xd95   : > { %v4632_v47 = vpop.f32.mrf.mxu2  ;;  %v4636_v53 = vadd.f32 %v4612_v46, %v4481_v49 }
 0xd96   : > { %v4843_v41 = vpop.f32.mrf.mxu1  ;;  %v4637_v0 = vadd.f32 %v4632_v47, %v9055_v9 }
 0xd97   : > { %v4803_v3 = vpop.f32.mrf.mxu0 }
 0xda4   : > { %v4823_v50 = vpop.f32.mrf.mxu3  ;;  %v4863_v51 = vpop.f32.mrf.mxu2 }
 0xda5   : > { %v4824_v54 = vadd.f32 %v4823_v50, %v4803_v3  ;;  %v4864_v55 = vadd.f32 %v4863_v51, %v4843_v41 }
 0xda7   : > { %v4907_v58 = vadd.f32 %v4864_v55, %v4636_v53  ;;  %v4906_v59 = vadd.f32 %v4824_v54, %v4635_v56 }
 0xda9   : > { %v4911_v60 = vrot.slane %v4907_v58, 4 }
 0xdab   : > { %v4912_v61 = vsel %vm4739_vm8, %v4906_v59, %v4911_v60 }
 0xdac   : > { %4914 = vst [vmem:[%s945_s8] sm:$0xff] %v4912_v61 }
 0xdb0   : > { %v4883_v62 = vpop.f32.mrf.mxu0 }
 0xdb4   : > { %v4903_v63 = vpop.f32.mrf.mxu3 }
 0xdb5   : > { %v4904_v1 = vadd.f32 %v4903_v63, %v4883_v62 }
 0xdb7   : > { %v4908_v2 = vadd.f32 %v4904_v1, %v4637_v0 }
 0xdb9   : > { %4916 = vst.msk [vmem:[%s945_s8 + $0x8] sm:$0xf] %vm4915_vm10, %v4908_v2 }
 0xdba   : > { %6164 = shalt.err (!%p6161_p3)
}
 0xdbb   : > { %5766 = dma.vmem_to_hbm [thread:$0]  (%p6422_p5), %s4947_s6, 192, %s4949_s10, %s4918_s29  }
 0xdbc PF: > { %s9345_s9 = sld [smem:[#allocation28_spill]] }
 0xdbd   : > { %s9346_s28 = sld [smem:[#allocation26_spill]] }
 0xdc2   : > { %p5818_p4 = scmp.ge.s32.totalorder %s9345_s9, 2 }
 0xdc3   : > { %s5008_s8 = sand.u32 1, %s9346_s28  }
 0xdc4   : > { %p5794_p7 = pnand %p5818_p4, %p6426_p6  ;;  %s5009_s13 = scalar_lea.sflag [#allocation4], %s5008_s8 }
 0xdc6   : > { %p5795_p8 = pneg %p5794_p7 }
 0xdc8   : > { %6198 = dma.done.wait (%p5795_p8), %s5009_s13, 192  }
 0xdc9   : > { %6200 = vsyncadd (%p5795_p8), %s5009_s13, 4294967104  ;;  %s9348_s12 = sadd.s32 4294967294, %s9345_s9  }
 0xdca   : > { %s5018_s0 = sand.u32 1, %s9348_s12  }
 0xdcb   : > { %s5019_s11 = scalar_lea.sflag [#allocation15], %s5018_s0 }
 0xdcc   : > { %6202 = dma.done.wait (%p5795_p8), %s5019_s11, 768  }
 0xdcd   : > { %6204 = vsyncadd (%p5795_p8), %s5019_s11, 4294966528  ;;  %s5039_s24 = scalar_lea.sflag [#allocation18], %s5008_s8 }
 0xdce   : > { %6206 = dma.done.wait (%p5795_p8), %s5039_s24, 128  }
 0xdcf   : > { %6208 = vsyncadd (%p5795_p8), %s5039_s24, 4294967168  ;;  %s9349_s30 = sld [smem:[#allocation29_spill]]  ;;  %s9352_s8 = smov %s6215_s5 }
 0xdd0   : > { %s9350_s6 = sld [smem:[#allocation27_spill]] }
 0xdd1   : > { %s9351_s9 = sld [smem:[#allocation30_spill]] }
 0xdd5   : > { %p49_p5 = scmp.ge.s32.totalorder %s9349_s30, 4  }
 0xdd6   : > { %s9353_s5 = smov %s9350_s6 }
 0xdd7   :  { %51 = sbr.rel (!%p49_p5) target bundleno = 33 (0x21), region = 277 }
 0xddc   :  { %5045 = vsyncpa [#allocation3], 1 }
 0xddd   :  { %5047 = vsyncpa [#allocation3 + $0x1], 1 }
 0xdde   :  { %5048 = vsyncpa [#allocation6], 1 }
 0xddf   :  { %5049 = vsyncpa [#allocation9], 1 }
 0xde0   :  { %5050 = vsyncpa [#allocation12], 1 }
 0xde1   :  { %5051 = vsyncpa [#allocation4], 1 }
 0xde2   :  { %5053 = vsyncpa [#allocation4 + $0x1], 1 }
 0xde3   :  { %5054 = vsyncpa [#allocation15], 1 }
 0xde4   :  { %5056 = vsyncpa [#allocation15 + $0x1], 1 }
 0xde5   :  { %5057 = vsyncpa [#allocation18], 1 }
 0xde6   :  { %5059 = vsyncpa [#allocation18 + $0x1], 1 }

</bundles_post_ra>
